<compile_context>
chip_gen: v6e
topology: v6e:2x2x1
jax: 0.10.0
libtpu: 0.0.40
codegen_flags: <defaults>
</compile_context>

<pallas_src>
import functools

import jax
import jax.numpy as jnp
from jax import lax
from jax.experimental import pallas as pl
from jax.experimental.pallas import tpu as pltpu


def _round_up(x, m):
    return (x + m - 1) // m * m


def _vmem_limit_bytes():
    """~3/4 of physical VMEM, clamped to [32, 96] MiB (96 on v5e/v6e, 48 on v7x)."""
    cap = None
    try:
        cap = getattr(pltpu.get_tpu_info(), "vmem_capacity_bytes", None)
    except Exception:
        cap = None
    if not cap:
        cap = 64 * 1024 * 1024
    return int(max(32 * 1024 * 1024, min(96 * 1024 * 1024, cap * 3 // 4)))


def _const_spec(shape):
    """Single-buffered BlockSpec for an operand that is constant across the grid."""
    zeros = (0,) * len(shape)
    try:
        return pl.BlockSpec(shape, lambda n, t: zeros, pipeline_mode=pl.Buffered(1))
    except (TypeError, AttributeError):   # older BlockSpec signature fallback
        return pl.BlockSpec(shape, lambda n, t: zeros)


# --------------------------------- kernel --------------------------------- #

def _convblock_kernel(xc_ref, hb_ref, wcat_ref, bcat_ref, w2_ref, b2_ref, out_ref, *,
                      K, pad, l_tile, l_out, cp, cp_in, halo_rows,
                      with_shortcut, pre_im2col):
    t = pl.program_id(1)
    l1 = l_tile + 2 * pad                              # h1 rows (with conv2 halo)

    xc = xc_ref[0]                                     # (l_tile, F) centre rows
    hb = hb_ref[0][:halo_rows]                         # (halo_rows, F) bottom halo
    window = jnp.concatenate([xc, hb], axis=0)         # rows <-> global t*tl - left + j

    prec = (lax.Precision.HIGHEST if window.dtype == jnp.float32
            else lax.Precision.DEFAULT)

    # ---- conv1 (+ optional fused shortcut conv); BN scale folded into weights ----
    if pre_im2col:
        # stride>1 path: window rows are im2col patches, one dot, contraction K*cp_in.
        acc = jnp.dot(window, wcat_ref[...],
                      preferred_element_type=jnp.float32, precision=prec)
    else:
        # stride==1 path: build the K taps via static sublane slices, accumulate dots.
        acc = None
        for k in range(K):
            p = jnp.dot(window[k:k + l1, :],
                        wcat_ref[k * cp_in:(k + 1) * cp_in, :],
                        preferred_element_type=jnp.float32, precision=prec)
            acc = p if acc is None else acc + p
    h_all = jnp.maximum(acc + bcat_ref[...], 0.0)       # (l1, wout) f32 epilogue

    # conv2's zero padding == zeroing h1 rows whose *global* index is outside
    # [0, l_out); halo rows belonging to neighbouring tiles stay valid.
    r = lax.broadcasted_iota(jnp.int32, (l1, 1), 0)
    g = t * l_tile + r - pad
    h1 = jnp.where((g >= 0) & (g < l_out), h_all[:, :cp], 0.0).astype(window.dtype)

    # ---- conv2: K accumulated dots on shifted windows of h1 ----
    acc2 = None
    for k in range(K):
        p = jnp.dot(h1[k:k + l_tile, :], w2_ref[k * cp:(k + 1) * cp, :],
                    preferred_element_type=jnp.float32, precision=prec)
        acc2 = p if acc2 is None else acc2 + p
    h2 = jnp.maximum(acc2 + b2_ref[...], 0.0)

    # ---- residual ----
    if with_shortcut:
        res = h_all[pad:pad + l_tile, cp:2 * cp]        # fused shortcut-conv output
    else:
        # identity residual: centre x rows (stride == 1, c_in == c_out).
        res = window[2 * pad:2 * pad + l_tile, :cp].astype(jnp.float32)

    out_ref[0] = (h2 + res).astype(out_ref.dtype)


# --------------------------------- wrapper --------------------------------- #

def _fold_conv_bn(w, bn, c_in_pad, c_out_pad, eps=1e-5):
    """Fold eval-mode BN into the conv weight; return (K*Cin_pad, Cout_pad) W, (1, Cout_pad) b."""
    gamma, beta, mean, var = [a.astype(jnp.float32) for a in bn]
    s = gamma / jnp.sqrt(var + eps)
    b = beta - mean * s
    c_out, c_in, K = w.shape
    wt = jnp.transpose(w.astype(jnp.float32), (2, 1, 0)) * s[None, None, :]  # (K, Cin, Cout)
    wt = jnp.pad(wt, ((0, 0), (0, c_in_pad - c_in), (0, c_out_pad - c_out)))
    wt = wt.reshape(K * c_in_pad, c_out_pad)
    bp = jnp.pad(b, (0, c_out_pad - c_out)).reshape(1, c_out_pad)
    return wt, bp


def conv_block_forward(x, params, *, kernel_size, stride=1,
                       with_conv_shortcut=False, compute_dtype=jnp.bfloat16,
                       l_tile=512, channels_last=False, out_dtype=None):
    """ConvBlock forward.

    x: (N, C_in, L) by default (PyTorch layout), or (N, L, C_in) if channels_last.
    Returns the same layout with C_out / L_out; dtype = out_dtype (default x.dtype).
    """
    if channels_last:
        N, L, c_in = x.shape
        x_nlc = x.astype(compute_dtype)
    else:
        N, c_in, L = x.shape
        x_nlc = jnp.transpose(x, (0, 2, 1)).astype(compute_dtype)
    if out_dtype is None:
        out_dtype = x.dtype

    K = kernel_size
    assert K % 2 == 1, "ConvBlock residual add requires odd kernel_size (padding=K//2)"
    pad = K // 2
    L_out = (L + 2 * pad - K) // stride + 1
    c_out = params['w1'].shape[0]
    if not with_conv_shortcut:
        assert c_in == c_out and stride == 1, \
            "identity residual requires in_chans == out_chans and stride == 1"

    cp_in = _round_up(c_in, 128)
    cp_out = _round_up(c_out, 128)
    pre_im2col = stride != 1                       # only the strided path needs im2col

    if pre_im2col:
        left, halo_rows, F, data_rows = pad, 2 * pad, K * cp_in, L_out
    else:
        left, halo_rows, F, data_rows = 2 * pad, 4 * pad, cp_in, L

    Hh = _round_up(halo_rows, 8)
    tl = max(Hh, min(_round_up(l_tile, Hh), _round_up(L_out, Hh)))
    T = -(-L_out // tl)
    total_rows = T * tl + Hh                       # row r <-> global index r - left

    # ---- single wrapper materialisation pass, already in compute_dtype ----
    if pre_im2col:
        xp = jnp.pad(x_nlc, ((0, 0), (pad, pad), (0, cp_in - c_in)))
        taps = [xp[:, k:k + stride * (L_out - 1) + 1:stride, :] for k in range(K)]
        feat = jnp.concatenate(taps, axis=-1)                    # (N, L_out, K*cp_in)
        feat_full = jnp.pad(feat, ((0, 0), (left, total_rows - left - data_rows), (0, 0)))
    else:
        feat_full = jnp.pad(x_nlc, ((0, 0), (left, total_rows - left - data_rows),
                                    (0, cp_in - c_in)))          # (N, total_rows, cp_in)

    # ---- weights: BN folded, conv1 & shortcut fused along the output dim ----
    w1, b1 = _fold_conv_bn(params['w1'], params['bn1'], cp_in, cp_out)
    w2, b2 = _fold_conv_bn(params['w2'], params['bn2'], cp_out, cp_out)
    if with_conv_shortcut:
        w3, b3 = _fold_conv_bn(params['w3'], params['bn3'], cp_in, cp_out)
        wcat = jnp.concatenate([w1, w3], axis=1)                 # (K*cp_in, 2*cp_out)
        bcat = jnp.concatenate([b1, b3], axis=1)
    else:
        wcat, bcat = w1, b1
    wcat = wcat.astype(compute_dtype)
    w2 = w2.astype(compute_dtype)
    wout = wcat.shape[1]

    kernel = functools.partial(
        _convblock_kernel, K=K, pad=pad, l_tile=tl, l_out=L_out, cp=cp_out,
        cp_in=cp_in, halo_rows=halo_rows, with_shortcut=with_conv_shortcut,
        pre_im2col=pre_im2col)

    itm = jnp.dtype(compute_dtype).itemsize
    flops = 2 * N * T * ((tl + 2 * pad) * (K * cp_in) * wout + tl * (K * cp_out) * cp_out)
    bytes_accessed = int(N * total_rows * F * itm + (wcat.size + w2.size) * itm
                         + (bcat.size + b2.size) * 4 + N * T * tl * cp_out * itm)

    hstep = tl // Hh                                   # halo block index stride

    out = pl.pallas_call(
        kernel,
        out_shape=jax.ShapeDtypeStruct((N, T * tl, cp_out), compute_dtype),
        grid=(N, T),
        in_specs=[
            # centre rows  [t*tl, t*tl + tl)          (global t*tl - left + j)
            pl.BlockSpec((1, tl, F), lambda n, t: (n, t, 0)),
            # bottom halo  [(t+1)*tl, (t+1)*tl + Hh)  (overlap expressed via BlockSpec)
            pl.BlockSpec((1, Hh, F), lambda n, t: (n, (t + 1) * hstep, 0)),
            _const_spec((K * cp_in, wout)),
            _const_spec((1, wout)),
            _const_spec((K * cp_out, cp_out)),
            _const_spec((1, cp_out)),
        ],
        out_specs=pl.BlockSpec((1, tl, cp_out), lambda n, t: (n, t, 0)),
        compiler_params=pltpu.CompilerParams(
            dimension_semantics=("parallel", "parallel"),
            vmem_limit_bytes=_vmem_limit_bytes()),
        cost_estimate=pl.CostEstimate(flops=int(flops), transcendentals=0,
                                      bytes_accessed=bytes_accessed),
    )(feat_full, feat_full, wcat, bcat, w2, b2)

    out = out[:, :L_out, :c_out]
    if not channels_last:
        out = jnp.transpose(out, (0, 2, 1))            # back to (N, C_out, L_out)
    return out.astype(out_dtype)


# ----------------------- pure-JAX reference (for checking) ----------------------- #

def _conv1dbn_ref(x, w, bn, stride, pad):
    y = lax.conv_general_dilated(x, w, window_strides=(stride,),
                                 padding=[(pad, pad)],
                                 dimension_numbers=('NCH', 'OIH', 'NCH'),
                                 precision=lax.Precision.HIGHEST)
    gamma, beta, mean, var = bn
    scale = gamma / jnp.sqrt(var + 1e-5)
    y = (y - mean[None, :, None]) * scale[None, :, None] + beta[None, :, None]
    return jnp.maximum(y, 0.0)


def conv_block_ref(x, params, *, kernel_size, stride=1, with_conv_shortcut=False):
    pad = kernel_size // 2
    out = _conv1dbn_ref(x, params['w1'], params['bn1'], stride, pad)
    out = _conv1dbn_ref(out, params['w2'], params['bn2'], 1, pad)
    if with_conv_shortcut:
        residual = _conv1dbn_ref(x, params['w3'], params['bn3'], stride, pad)
    else:
        residual = x
    return out + residual


# --------------------------------------- main --------------------------------------- #

if __name__ == "__main__":
    keys = jax.random.split(jax.random.PRNGKey(0), 12)

    def make_bn(k, C):
        k1, k2, k3, k4 = jax.random.split(k, 4)
        gamma = jax.random.uniform(k1, (C,), jnp.float32, 0.5, 1.5)
        beta = 0.1 * jax.random.normal(k2, (C,), jnp.float32)
        mean = 0.1 * jax.random.normal(k3, (C,), jnp.float32)
        var = jax.random.uniform(k4, (C,), jnp.float32, 0.5, 1.5)
        return (gamma, beta, mean, var)

    def check(x, params, *, kernel_size, stride, with_conv_shortcut):
        ref = conv_block_ref(x, params, kernel_size=kernel_size, stride=stride,
                             with_conv_shortcut=with_conv_shortcut)
        # f32 run validates exact semantics; bf16 (default perf path) at loose tol.
        for dtype, tol in ((jnp.float32, 1e-3), (jnp.bfloat16, 1e-1)):
            out = jax.block_until_ready(conv_block_forward(
                x, params, kernel_size=kernel_size, stride=stride,
                with_conv_shortcut=with_conv_shortcut, compute_dtype=dtype))
            assert out.shape == ref.shape, (out.shape, ref.shape)
            err = float(jnp.max(jnp.abs(out - ref)))
            assert jnp.allclose(out, ref, atol=tol, rtol=tol), (str(dtype), err)

    # case 1: no conv shortcut (identity residual), in_chans == out_chans, stride 1
    N, C, L, K = 2, 8, 16, 3
    x = jax.random.normal(keys[0], (N, C, L), jnp.float32)
    params = {
        'w1': 0.1 * jax.random.normal(keys[1], (C, C, K), jnp.float32),
        'bn1': make_bn(keys[2], C),
        'w2': 0.1 * jax.random.normal(keys[3], (C, C, K), jnp.float32),
        'bn2': make_bn(keys[4], C),
    }
    check(x, params, kernel_size=K, stride=1, with_conv_shortcut=False)

    # case 2: conv shortcut, channel change + stride 2
    Cin2, Cout2, stride2 = 4, 8, 2
    x2 = jax.random.normal(keys[5], (N, Cin2, L), jnp.float32)
    params2 = {
        'w1': 0.1 * jax.random.normal(keys[6], (Cout2, Cin2, K), jnp.float32),
        'bn1': make_bn(keys[7], Cout2),
        'w2': 0.1 * jax.random.normal(keys[8], (Cout2, Cout2, K), jnp.float32),
        'bn2': make_bn(keys[9], Cout2),
        'w3': 0.1 * jax.random.normal(keys[10], (Cout2, Cin2, K), jnp.float32),
        'bn3': make_bn(keys[11], Cout2),
    }
    check(x2, params2, kernel_size=K, stride=stride2, with_conv_shortcut=True)

    print("KERNEL_OK")
</pallas_src>

<mosaic_0001>
module attributes {stable_mosaic.version = 11 : i64} {
  func.func @_convblock_kernel(%arg0: i32, %arg1: i32, %arg2: memref<1x16x128xf32, #tpu.memory_space<vmem>>, %arg3: memref<1x8x128xf32, #tpu.memory_space<vmem>>, %arg4: memref<384x128xf32, #tpu.memory_space<vmem>>, %arg5: memref<1x128xf32, #tpu.memory_space<vmem>>, %arg6: memref<384x128xf32, #tpu.memory_space<vmem>>, %arg7: memref<1x128xf32, #tpu.memory_space<vmem>>, %arg8: memref<1x16x128xf32, #tpu.memory_space<vmem>>) attributes {dimension_semantics = [#tpu.dimension_semantics<parallel>, #tpu.dimension_semantics<parallel>], iteration_bounds = array<i64: 2, 1>, scalar_prefetch = 0 : i64, scratch_operands = 0 : i64, tpu.core_type = #tpu.core_type<tc>, window_params = [{transform_indices = @transform_0, window_bounds = array<i64: 1, 16, 128>}, {transform_indices = @transform_1, window_bounds = array<i64: 1, 8, 128>}, {pipeline_mode = #tpu.pipeline_mode<synchronous>, transform_indices = @transform_2, window_bounds = array<i64: 384, 128>}, {pipeline_mode = #tpu.pipeline_mode<synchronous>, transform_indices = @transform_3, window_bounds = array<i64: 1, 128>}, {pipeline_mode = #tpu.pipeline_mode<synchronous>, transform_indices = @transform_4, window_bounds = array<i64: 384, 128>}, {pipeline_mode = #tpu.pipeline_mode<synchronous>, transform_indices = @transform_5, window_bounds = array<i64: 1, 128>}, {transform_indices = @transform_6, window_bounds = array<i64: 1, 16, 128>}]} {
    %c0 = arith.constant 0 : index
    %c0_0 = arith.constant 0 : index
    %c0_1 = arith.constant 0 : index
    %0 = vector.load %arg2[%c0, %c0_0, %c0_1] : memref<1x16x128xf32, #tpu.memory_space<vmem>>, vector<1x16x128xf32>
    %1 = vector.shape_cast %0 : vector<1x16x128xf32> to vector<16x128xf32>
    %c0_2 = arith.constant 0 : index
    %c0_3 = arith.constant 0 : index
    %c0_4 = arith.constant 0 : index
    %2 = vector.load %arg3[%c0_2, %c0_3, %c0_4] : memref<1x8x128xf32, #tpu.memory_space<vmem>>, vector<1x8x128xf32>
    %3 = vector.shape_cast %2 : vector<1x8x128xf32> to vector<8x128xf32>
    %4 = vector.extract_strided_slice %3 {offsets = [0, 0], sizes = [4, 128], strides = [1, 1]} : vector<8x128xf32> to vector<4x128xf32>
    %5 = tpu.concatenate %1, %4 in 0 : vector<16x128xf32>, vector<4x128xf32> -> vector<20x128xf32>
    %6 = vector.extract_strided_slice %5 {offsets = [0, 0], sizes = [18, 128], strides = [1, 1]} : vector<20x128xf32> to vector<18x128xf32>
    %c0_5 = arith.constant 0 : index
    %c0_6 = arith.constant 0 : index
    %7 = vector.load %arg4[%c0_5, %c0_6] : memref<384x128xf32, #tpu.memory_space<vmem>>, vector<128x128xf32>
    %cst = arith.constant dense<0.000000e+00> : vector<18x128xf32>
    %8 = tpu.matmul %6, %7, %cst {dimension_numbers = #tpu.dot_dimension_numbers<[1], [0], [0], [1], [0, 0, 1, 1], [], []>, precision = #tpu.contract_precision<fp32>} : vector<18x128xf32>, vector<128x128xf32>, vector<18x128xf32> -> vector<18x128xf32>
    %9 = vector.extract_strided_slice %5 {offsets = [1, 0], sizes = [18, 128], strides = [1, 1]} : vector<20x128xf32> to vector<18x128xf32>
    %c128 = arith.constant 128 : index
    %c0_7 = arith.constant 0 : index
    %10 = vector.load %arg4[%c128, %c0_7] : memref<384x128xf32, #tpu.memory_space<vmem>>, vector<128x128xf32>
    %cst_8 = arith.constant dense<0.000000e+00> : vector<18x128xf32>
    %11 = tpu.matmul %9, %10, %cst_8 {dimension_numbers = #tpu.dot_dimension_numbers<[1], [0], [0], [1], [0, 0, 1, 1], [], []>, precision = #tpu.contract_precision<fp32>} : vector<18x128xf32>, vector<128x128xf32>, vector<18x128xf32> -> vector<18x128xf32>
    %12 = arith.addf %8, %11 : vector<18x128xf32>
    %13 = vector.extract_strided_slice %5 {offsets = [2, 0], sizes = [18, 128], strides = [1, 1]} : vector<20x128xf32> to vector<18x128xf32>
    %c256 = arith.constant 256 : index
    %c0_9 = arith.constant 0 : index
    %14 = vector.load %arg4[%c256, %c0_9] : memref<384x128xf32, #tpu.memory_space<vmem>>, vector<128x128xf32>
    %cst_10 = arith.constant dense<0.000000e+00> : vector<18x128xf32>
    %15 = tpu.matmul %13, %14, %cst_10 {dimension_numbers = #tpu.dot_dimension_numbers<[1], [0], [0], [1], [0, 0, 1, 1], [], []>, precision = #tpu.contract_precision<fp32>} : vector<18x128xf32>, vector<128x128xf32>, vector<18x128xf32> -> vector<18x128xf32>
    %16 = arith.addf %12, %15 : vector<18x128xf32>
    %c0_11 = arith.constant 0 : index
    %c0_12 = arith.constant 0 : index
    %17 = vector.load %arg5[%c0_11, %c0_12] : memref<1x128xf32, #tpu.memory_space<vmem>>, vector<1x128xf32>
    %18 = vector.broadcast %17 : vector<1x128xf32> to vector<18x128xf32>
    %19 = arith.addf %16, %18 : vector<18x128xf32>
    %cst_13 = arith.constant 0.000000e+00 : f32
    %20 = vector.broadcast %cst_13 : f32 to vector<18x128xf32>
    %21 = arith.maximumf %19, %20 : vector<18x128xf32>
    %22 = tpu.iota {dimensions = array<i32: 0>} : vector<18x1xi32>
    %c16_i32 = arith.constant 16 : i32
    %23 = arith.muli %arg1, %c16_i32 : i32
    %24 = vector.broadcast %23 : i32 to vector<18x1xi32>
    %25 = arith.addi %24, %22 : vector<18x1xi32>
    %c1_i32 = arith.constant 1 : i32
    %26 = vector.broadcast %c1_i32 : i32 to vector<18x1xi32>
    %27 = arith.subi %25, %26 : vector<18x1xi32>
    %c0_i32 = arith.constant 0 : i32
    %28 = vector.broadcast %c0_i32 : i32 to vector<18x1xi32>
    %29 = arith.cmpi sge, %27, %28 : vector<18x1xi32>
    %c16_i32_14 = arith.constant 16 : i32
    %30 = vector.broadcast %c16_i32_14 : i32 to vector<18x1xi32>
    %31 = arith.cmpi slt, %27, %30 : vector<18x1xi32>
    %32 = arith.andi %29, %31 : vector<18x1xi1>
    %cst_15 = arith.constant 0.000000e+00 : f32
    %33 = vector.shape_cast %32 : vector<18x1xi1> to vector<18x1xi1>
    %34 = vector.broadcast %33 : vector<18x1xi1> to vector<18x128xi1>
    %35 = vector.broadcast %cst_15 : f32 to vector<18x128xf32>
    %36 = arith.select %34, %21, %35 : vector<18x128xi1>, vector<18x128xf32>
    %37 = vector.extract_strided_slice %36 {offsets = [0, 0], sizes = [16, 128], strides = [1, 1]} : vector<18x128xf32> to vector<16x128xf32>
    %c0_16 = arith.constant 0 : index
    %c0_17 = arith.constant 0 : index
    %38 = vector.load %arg6[%c0_16, %c0_17] : memref<384x128xf32, #tpu.memory_space<vmem>>, vector<128x128xf32>
    %cst_18 = arith.constant dense<0.000000e+00> : vector<16x128xf32>
    %39 = tpu.matmul %37, %38, %cst_18 {dimension_numbers = #tpu.dot_dimension_numbers<[1], [0], [0], [1], [0, 0, 1, 1], [], []>, precision = #tpu.contract_precision<fp32>} : vector<16x128xf32>, vector<128x128xf32>, vector<16x128xf32> -> vector<16x128xf32>
    %40 = vector.extract_strided_slice %36 {offsets = [1, 0], sizes = [16, 128], strides = [1, 1]} : vector<18x128xf32> to vector<16x128xf32>
    %c128_19 = arith.constant 128 : index
    %c0_20 = arith.constant 0 : index
    %41 = vector.load %arg6[%c128_19, %c0_20] : memref<384x128xf32, #tpu.memory_space<vmem>>, vector<128x128xf32>
    %cst_21 = arith.constant dense<0.000000e+00> : vector<16x128xf32>
    %42 = tpu.matmul %40, %41, %cst_21 {dimension_numbers = #tpu.dot_dimension_numbers<[1], [0], [0], [1], [0, 0, 1, 1], [], []>, precision = #tpu.contract_precision<fp32>} : vector<16x128xf32>, vector<128x128xf32>, vector<16x128xf32> -> vector<16x128xf32>
    %43 = arith.addf %39, %42 : vector<16x128xf32>
    %44 = vector.extract_strided_slice %36 {offsets = [2, 0], sizes = [16, 128], strides = [1, 1]} : vector<18x128xf32> to vector<16x128xf32>
    %c256_22 = arith.constant 256 : index
    %c0_23 = arith.constant 0 : index
    %45 = vector.load %arg6[%c256_22, %c0_23] : memref<384x128xf32, #tpu.memory_space<vmem>>, vector<128x128xf32>
    %cst_24 = arith.constant dense<0.000000e+00> : vector<16x128xf32>
    %46 = tpu.matmul %44, %45, %cst_24 {dimension_numbers = #tpu.dot_dimension_numbers<[1], [0], [0], [1], [0, 0, 1, 1], [], []>, precision = #tpu.contract_precision<fp32>} : vector<16x128xf32>, vector<128x128xf32>, vector<16x128xf32> -> vector<16x128xf32>
    %47 = arith.addf %43, %46 : vector<16x128xf32>
    %c0_25 = arith.constant 0 : index
    %c0_26 = arith.constant 0 : index
    %48 = vector.load %arg7[%c0_25, %c0_26] : memref<1x128xf32, #tpu.memory_space<vmem>>, vector<1x128xf32>
    %49 = vector.broadcast %48 : vector<1x128xf32> to vector<16x128xf32>
    %50 = arith.addf %47, %49 : vector<16x128xf32>
    %cst_27 = arith.constant 0.000000e+00 : f32
    %51 = vector.broadcast %cst_27 : f32 to vector<16x128xf32>
    %52 = arith.maximumf %50, %51 : vector<16x128xf32>
    %53 = vector.extract_strided_slice %5 {offsets = [2, 0], sizes = [16, 128], strides = [1, 1]} : vector<20x128xf32> to vector<16x128xf32>
    %54 = arith.addf %52, %53 : vector<16x128xf32>
    %c0_28 = arith.constant 0 : index
    %c0_29 = arith.constant 0 : index
    %c0_30 = arith.constant 0 : index
    %55 = vector.load %arg8[%c0_28, %c0_29, %c0_30] : memref<1x16x128xf32, #tpu.memory_space<vmem>>, vector<1x16x128xf32>
    %56 = vector.shape_cast %55 : vector<1x16x128xf32> to vector<16x128xf32>
    %57 = vector.shape_cast %54 : vector<16x128xf32> to vector<1x16x128xf32>
    tpu.vector_store %arg8[%c0_28, %c0_29, %c0_30], %57 {strides = array<i32>} : memref<1x16x128xf32, #tpu.memory_space<vmem>>, vector<1x16x128xf32>,
    return
  }
  func.func @transform_0(%arg0: i32, %arg1: i32) -> (i32, i32, i32) {
    %c0_i32 = arith.constant 0 : i32
    %c0_i32_0 = arith.constant 0 : i32
    return %arg0, %arg1, %c0_i32 : i32, i32, i32
  }
  func.func @transform_1(%arg0: i32, %arg1: i32) -> (i32, i32, i32) {
    %c1_i32 = arith.constant 1 : i32
    %0 = arith.addi %arg1, %c1_i32 : i32
    %c2_i32 = arith.constant 2 : i32
    %1 = arith.muli %0, %c2_i32 : i32
    %c0_i32 = arith.constant 0 : i32
    %c0_i32_0 = arith.constant 0 : i32
    return %arg0, %1, %c0_i32 : i32, i32, i32
  }
  func.func @transform_2(%arg0: i32, %arg1: i32) -> (i32, i32) {
    %c0_i32 = arith.constant 0 : i32
    %c0_i32_0 = arith.constant 0 : i32
    %c0_i32_1 = arith.constant 0 : i32
    return %c0_i32, %c0_i32_0 : i32, i32
  }
  func.func @transform_3(%arg0: i32, %arg1: i32) -> (i32, i32) {
    %c0_i32 = arith.constant 0 : i32
    %c0_i32_0 = arith.constant 0 : i32
    %c0_i32_1 = arith.constant 0 : i32
    return %c0_i32, %c0_i32_0 : i32, i32
  }
  func.func @transform_4(%arg0: i32, %arg1: i32) -> (i32, i32) {
    %c0_i32 = arith.constant 0 : i32
    %c0_i32_0 = arith.constant 0 : i32
    %c0_i32_1 = arith.constant 0 : i32
    return %c0_i32, %c0_i32_0 : i32, i32
  }
  func.func @transform_5(%arg0: i32, %arg1: i32) -> (i32, i32) {
    %c0_i32 = arith.constant 0 : i32
    %c0_i32_0 = arith.constant 0 : i32
    %c0_i32_1 = arith.constant 0 : i32
    return %c0_i32, %c0_i32_0 : i32, i32
  }
  func.func @transform_6(%arg0: i32, %arg1: i32) -> (i32, i32, i32) {
    %c0_i32 = arith.constant 0 : i32
    %c0_i32_0 = arith.constant 0 : i32
    return %arg0, %arg1, %c0_i32 : i32, i32, i32
  }
}

</mosaic_0001>

<bundles_post_ra>
// kernel: tpu_custom_call.1
= control target key start
LH: loop header
LB: loop body
LE: loop exit
PB: predicated region body
PF: predicated region fallthrough
CT: control target
= control target key end

     0   :  { %s9988_s0 = inlined_call_operand.hbm [shape: f32[2,24,128], index: 0, kind: input, shape index: {}]   ;;  %s9989_s1 = inlined_call_operand.hbm [shape: f32[2,24,128], index: 1, kind: input, shape index: {}]   ;;  %s9990_s2 = inlined_call_operand.hbm [shape: f32[384,128], index: 2, kind: input, shape index: {}]   ;;  %s9991_s3 = inlined_call_operand.vmem [shape: f32[1,128], index: 3, kind: input, shape index: {}]   ;;  %s9992_s4 = inlined_call_operand.hbm [shape: f32[384,128], index: 4, kind: input, shape index: {}]   ;;  %s9993_s5 = inlined_call_operand.vmem [shape: f32[1,128], index: 5, kind: input, shape index: {}]   ;;  %s9994_s6 = inlined_call_operand.hbm [shape: f32[2,16,128], index: 6, kind: output, shape index: {}]  }
   0x1   :  { %10055 = sst [smem:[#allocation41_spill]] %s9988_s0 }
   0x2   :  { %10056 = sst [smem:[#allocation42_spill]] %s9990_s2 }
   0x3   :  { %10057 = sst [smem:[#allocation43_spill]] %s9992_s4 }
   0x4   :  { %11 = vsyncpa [#allocation3], 0 }
   0x5   :  { %13 = vsyncpa [#allocation3 + $0x1], 0 }
   0x6   :  { %14 = vsyncpa [#allocation6], 0 }
   0x7   :  { %16 = vsyncpa [#allocation6 + $0x1], 0 }
   0x8   :  { %17 = vsyncpa [#allocation9], 0 }
   0x9   :  { %18 = vsyncpa [#allocation4], 0 }
   0xa   :  { %20 = vsyncpa [#allocation4 + $0x1], 0  ;;  %s7366_s21 = smov 0   ;;  %s7368_s22 = smov 0  }
   0xb   :  { %s7370_s23 = smov 0   ;;  %s7372_s24 = smov 0  }
   0xc   :  { %s7374_s25 = smov 0   ;;  %s7376_s26 = smov 0  }
   0xd LB: > { %10058 = sst [smem:[#allocation16_spill]] %s7306_s23  ;;  %s7397_s27 = sadd.s32 4294967295, %s7318_s26   ;;  %s7318_s26 = sphi %s7376_s26, %s26_s26   ;;  %s7314_s25 = sphi %s7374_s25, %s10135_s25   ;;  %s7310_s24 = sphi %s7372_s24, %s10134_s24   ;;  %s7306_s23 = sphi %s7370_s23, %s10133_s23   ;;  %s7302_s22 = sphi %s7368_s22, %s10137_s22   ;;  %s7298_s21 = sphi %s7366_s21, %s10136_s21  }
   0xe   : > { %10059 = sst [smem:[#allocation17_spill]] %s7314_s25  ;;  %s4961_s28 = sadd.s32 4294967294, %s7318_s26  }
   0xf   : > { %10060 = sst [smem:[#allocation18_spill]] %s7318_s26  ;;  %p60_p0 = scmp.ne.s32.totalorder %s7302_s22, %s7298_s21 }
  0x10   : > { %p61_p1 = scmp.eq.s32.totalorder %s7397_s27, 0  ;;  %p202_p2 = scmp.eq.s32.totalorder %s7397_s27, 1 }
  0x11   : > { %p208_p3 = scmp.eq.s32.totalorder %s4961_s28, 1  ;;  %p4962_p5 = scmp.ge.s32.totalorder %s7318_s26, 1 }
  0x12   : > { %p7406_p4 = por %p61_p1, %p60_p0  ;;  %p215_p7 = scmp.lt.s32.totalorder %s7318_s26, 3 }
  0x13   : > { %p7411_p6 = por %p208_p3, %p60_p0  ;;  %s7320_s8 = smov [#allocation7]  }
  0x14   : > { %p7416_p8 = pnand %p4962_p5, %p215_p7  ;;  %s227_s9 = sshll.u32 %s7320_s8, 4  ;;  %s228_s9 = int_to_ptr.vmem [resolvable:$true] %s227_s9 }
  0x15   : > { %s10062_s30 = scalar_select %p7411_p6, 1, 0 }
  0x16   : > { %p7036_p9 = pneg %p7416_p8  ;;  %s7321_s11 = smov [#allocation8]  }
  0x17   : > { %10063 = sst [smem:[#allocation19_spill]] %s10062_s30  ;;  %s243_s12 = sshll.u32 %s7321_s11, 4  ;;  %s244_s12 = int_to_ptr.vmem [resolvable:$true] %s243_s12 }
  0x18   : > { %p7425_p11 = pnand %p7036_p9, %p61_p1  ;;  %s7128_s13 = scalar_lea.vmem %s228_s9, 6144 }
  0x19   : > { %p7129_p13 = scmp.ne.s32.totalorder %s228_s9, %s7128_s13  ;;  %p7136_p5 = scmp.lt.s32.totalorder %s228_s9, %s228_s9 }
  0x1a   : > { %p7119_p12 = pneg %p7425_p11  ;;  %p7137_p7 = scmp.lt.s32.totalorder %s7128_s13, %s7128_s13 }
  0x1c   : > { %p7131_p0 = pnand %p7129_p13, %p7119_p12  ;;  %p7138_p10 = por %p7137_p7, %p7136_p5 }
  0x1e   : > { %p7132_p3 = pneg %p7131_p0 }
  0x20   : > { %p7139_p9 = pnand %p7138_p10, %p7132_p3 }
  0x22   : > { %7142 = shalt.err (!%p7139_p9)
}
  0x23   : > { %s9995_s14 = smov 128   ;;  %s9996_s15 = smov 8  }
  0x24   : > { %s10066_s2 = sld [smem:[#allocation42_spill]]  ;;  %s7154_s18 = scalar_lea.vmem %s244_s12, 6144 }
  0x25   : > { %p7155_p13 = scmp.ne.s32.totalorder %s244_s12, %s7154_s18  ;;  %p7162_p10 = scmp.lt.s32.totalorder %s244_s12, %s244_s12 }
  0x26   : > { %p7163_p3 = scmp.lt.s32.totalorder %s7154_s18, %s7154_s18 }
  0x27   : > { %p7157_p0 = pnand %p7155_p13, %p7119_p12 }
  0x28   : > { %p7164_p7 = por %p7163_p3, %p7162_p10 }
  0x29   : > { %p7158_p5 = pneg %p7157_p0 }
  0x2a   : > { %7039 = dma.hbm_to_vmem [thread:$0]  (!%p7425_p11), %s10066_s2, 6144, %s228_s9, [#allocation6], %s9995_s14, %s9995_s14, %s9996_s15  }
  0x2b   : > { %p7165_p9 = pnand %p7164_p7, %p7158_p5 }
  0x2d   : > { %7168 = shalt.err (!%p7165_p9)
}
  0x2e   : > { %s10067_s4 = sld [smem:[#allocation43_spill]]  ;;  %s38_s28 = sadd.s32 1, %s7314_s25 }
  0x2f   : > { %s47_s8 = sadd.s32 1, %s7306_s23  ;;  %p40_p12 = scmp.ge.s32.totalorder %s38_s28, 2 }
  0x30   : > { %p54_p13 = scmp.ne.s32.totalorder %s7306_s23, %s7302_s22  ;;  %p55_p0 = scmp.eq.s32.totalorder %s7318_s26, 0 }
  0x31   : > { %p7056_p5 = scmp.lt.s32.totalorder %s7318_s26, 2  ;;  %s10139_s28 = smov (%p40_p12, %s38_s28), 0 }
  0x32   : > { %10068 = sst [smem:[#allocation20_spill]] %s10139_s28  ;;  %p56_p10 = por %p55_p0, %p54_p13 }
  0x33   : > { %p7463_p3 = por %p202_p2, %p54_p13  ;;  %s42_s10 = ssub.s32 %s7314_s25, %s10139_s28 }
  0x34   : > { %7042 = dma.hbm_to_vmem [thread:$0]  (!%p7425_p11), %s10067_s4, 6144, %s244_s12, [#allocation9], %s9995_s14, %s9995_s14, %s9996_s15  }
  0x35   : > { %s7470_s11 = sand.u32 1, %s7306_s23   ;;  %p45_p11 = scmp.eq.s32.totalorder %s42_s10, 0 }
  0x36   : > { %s4966_s12 = sshll.u32 %s7470_s11, 4  ;;  %s7021_s13 = smul.u32 384, %s7314_s25 }
  0x37   : > { %s7475_s16 = scalar_select %p45_p11, %s7306_s23, %s47_s8  }
  0x38   : > { %s10071_s0 = sld [smem:[#allocation41_spill]]  ;;  %s264_s20 = scalar_lea.vmem [#allocation2], %s4966_s12 }
  0x39   : > { %10070 = sst [smem:[#allocation21_spill]] %s7475_s16  ;;  %s279_s14 = sshll.u32 %s264_s20, 4  ;;  %s280_s14 = int_to_ptr.vmem [resolvable:$true] %s279_s14 }
  0x3a   : > { %p7482_p2 = pnand %p7056_p5, %p56_p10  ;;  %s289_s2 = sand.u32 1, %s7318_s26  }
  0x3b   : > { %s261_s10 = scalar_lea.sflag [#allocation3], %s7470_s11  ;;  %s7182_s8 = scalar_lea.vmem %s280_s14, 256 }
  0x3c   : > { %p7171_p7 = pneg %p7482_p2  ;;  %p7183_p9 = scmp.ne.s32.totalorder %s280_s14, %s7182_s8 }
  0x3d   : > { %s7324_s12 = smov [#allocation2]  }
  0x3e   : > { %s277_s19 = scalar_lea.hbm %s10071_s0, %s7021_s13  ;;  %p7185_p12 = pnand %p7183_p9, %p7171_p7 }
  0x3f   : > { %s7187_s17 = sshll.u32 %s7324_s12, 4  ;;  %s7188_s17 = int_to_ptr.vmem [resolvable:$false] %s7187_s17 }
  0x40   : > { %p7186_p13 = pneg %p7185_p12  ;;  %s7189_s18 = scalar_lea.vmem %s7188_s17, 512 }
  0x41   : > { %p7190_p0 = scmp.lt.s32.totalorder %s280_s14, %s7188_s17  ;;  %p7191_p5 = scmp.lt.s32.totalorder %s7189_s18, %s7182_s8 }
  0x43   : > { %p7192_p10 = por %p7191_p5, %p7190_p0 }
  0x45   : > { %p7193_p11 = pnand %p7192_p10, %p7186_p13 }
  0x47   : > { %7196 = shalt.err (!%p7193_p11)
}
  0x48   : > { %s10073_s20 = smov 8   ;;  %s10074_s0 = smov 128  }
  0x49   : > { %7046 = dma.hbm_to_vmem [thread:$0]  (!%p7482_p2), %s277_s19, 256, %s280_s14, %s261_s10, %s10074_s0, %s10074_s0, %s10073_s20  }
  0x4a   : > { %s4968_s4 = sshll.u32 %s7470_s11, 3  ;;  %s4873_s12 = scalar_lea.hbm %s9989_s1, %s7021_s13 }
  0x4b   : > { %s4874_s16 = scalar_lea.hbm %s4873_s12, 256  ;;  %s293_s23 = scalar_lea.vmem [#allocation5], %s4968_s4 }
  0x4c   : > { %s304_s17 = sshll.u32 %s293_s23, 4  ;;  %s290_s8 = scalar_lea.sflag [#allocation6], %s289_s2  ;;  %s305_s17 = int_to_ptr.vmem [resolvable:$true] %s304_s17 }
  0x4d   : > { %s7210_s18 = scalar_lea.vmem %s305_s17, 128  ;;  %s7325_s26 = smov [#allocation5]  }
  0x4e   : > { %p7211_p9 = scmp.ne.s32.totalorder %s305_s17, %s7210_s18  ;;  %s7215_s30 = sshll.u32 %s7325_s26, 4  ;;  %s7216_s30 = int_to_ptr.vmem [resolvable:$false] %s7215_s30 }
  0x4f   : > { %s7217_s0 = scalar_lea.vmem %s7216_s30, 256  ;;  %p7218_p0 = scmp.lt.s32.totalorder %s305_s17, %s7216_s30 }
  0x50   : > { %p7213_p12 = pnand %p7211_p9, %p7171_p7  ;;  %p7219_p5 = scmp.lt.s32.totalorder %s7217_s0, %s7210_s18 }
  0x52   : > { %p7214_p13 = pneg %p7213_p12  ;;  %p7220_p10 = por %p7219_p5, %p7218_p0 }
  0x54   : > { %p7221_p11 = pnand %p7220_p10, %p7214_p13 }
  0x56   : > { %7224 = shalt.err (!%p7221_p11)
}
  0x57   : > { %7049 = dma.hbm_to_vmem [thread:$0]  (!%p7482_p2), %s4874_s16, 128, %s305_s17, %s290_s8  }
  0x58   : > { %313 = sbr.rel (%p7416_p8) target bundleno = 1164 (0x48c), region = 44 }
  0x5d   : > { %s7510_s2 = sand.u32 1, %s7302_s22  }
  0x5e   : > { %s4971_s4 = sshll.u32 %s7510_s2, 4  ;;  %s316_s23 = scalar_lea.sflag [#allocation3], %s7510_s2 }
  0x5f   : > { %s7516_s25 = scalar_lea.vmem [#allocation2], %s4971_s4 }
  0x60   : > { %7277 = dma.done.wait (%p7406_p4), %s316_s23, 256  }
  0x61   : > { %7279 = vsyncadd (%p7406_p4), %s316_s23, 4294967040  ;;  %s324_s26 = sand.u32 1, %s7397_s27   ;;  %s4972_s30 = sshll.u32 %s7510_s2, 3 }
  0x62   : > { %s325_s7 = scalar_lea.sflag [#allocation6], %s324_s26  ;;  %s7524_s14 = scalar_lea.vmem [#allocation5], %s4972_s30 }
  0x63   : > { %7281 = dma.done.wait (%p7406_p4), %s325_s7, 128  }
  0x64   : > { %7283 = vsyncadd (%p7406_p4), %s325_s7, 4294967168 }
  0x65   : > { %7285 = dma.done.wait (%p61_p1), [#allocation6], 6144  }
  0x66   : > { %7287 = vsyncadd (%p61_p1), [#allocation6], 4294961152 }
  0x67   : > { %7289 = dma.done.wait (%p61_p1), [#allocation9], 6144  }
  0x68   : > { %7291 = vsyncadd (%p61_p1), [#allocation9], 4294961152  ;;  %v7326_v0 = vmov 0.0   ;;  %vm7327_vm0 = vmmov 0   ;;  %v412_v1 = vld [vmem:[#allocation7 + $0xf8] sm:$0xff]  ;;  %v411_v2 = vld [vmem:[#allocation7 + $0xf0] sm:$0xff] }
  0x69   : > { %5653 = vmatprep.subr.mxu0 %v7326_v0  ;;  %5694 = vmatprep.subr.mxu1 %v7326_v0  ;;  %v410_v3 = vld [vmem:[#allocation7 + $0xe8] sm:$0xff]  ;;  %v7544_v4 = vand.u32 4294901760, %v412_v1  ;;  %v7546_v5 = vand.u32 4294901760, %v411_v2  ;;  %v409_v7 = vld [vmem:[#allocation7 + $0xe0] sm:$0xff]  ;;  %v408_v8 = vld [vmem:[#allocation7 + $0xd8] sm:$0xff]  ;;  %vm416_vm1 = vcmask 1046528  }
  0x6a   : > { %5685 = vmatprep.mubr.msk.f32.mxu0 %vm7327_vm0, %v7326_v0  ;;  %5726 = vmatprep.mubr.msk.f32.mxu1 %vm7327_vm0, %v7326_v0  ;;  %v7548_v6 = vand.u32 4294901760, %v410_v3  ;;  %v407_v9 = vld [vmem:[#allocation7 + $0xd0] sm:$0xff]  ;;  %v7550_v10 = vand.u32 4294901760, %v409_v7  ;;  %v7552_v11 = vand.u32 4294901760, %v408_v8  ;;  %v406_v13 = vld [vmem:[#allocation7 + $0xc8] sm:$0xff]  ;;  %v405_v14 = vld [vmem:[#allocation7 + $0xc0] sm:$0xff] }
  0x6b   : > { %v7554_v12 = vand.u32 4294901760, %v407_v9  ;;  %5654 = vmatpush3.msra.mxu0 %v7544_v4  ;;  %v7558_v15 = vsub.f32 %v412_v1, %v7544_v4  ;;  %v7561_v16 = vsub.f32 %v411_v2, %v7546_v5  ;;  %v7563_v17 = vand.u32 4294901760, %v406_v13  ;;  %v404_v19 = vld [vmem:[#allocation7 + $0xb8] sm:$0xff]  ;;  %v403_v29 = vld [vmem:[#allocation7 + $0xb0] sm:$0xff]  ;;  %v402_v36 = vld [vmem:[#allocation7 + $0xa8] sm:$0xff]  ;;  %s4986_s11 = sshll.u32 %s7310_s24, 8 }
  0x6c   : > { %v7566_v18 = vsub.f32 %v410_v3, %v7548_v6  ;;  %5655 = vmatprep.subr.mxu0 %v7326_v0  ;;  %v7570_v20 = vsub.f32 %v409_v7, %v7550_v10  ;;  %v7573_v21 = vsub.f32 %v408_v8, %v7552_v11  ;;  %v7579_v25 = vand.u32 4294901760, %v405_v14  ;;  %v401_v42 = vld [vmem:[#allocation7 + $0xa0] sm:$0xff]  ;;  %v400_v50 = vld [vmem:[#allocation7 + $0x98] sm:$0xff]  ;;  %v399_v55 = vld [vmem:[#allocation7 + $0x90] sm:$0xff]  ;;  %s369_s13 = scalar_lea.vmem [#allocation10], %s4971_s4  ;;  %s9937_s20 = scalar_lea.hbm %s9994_s6, %s4986_s11 }
  0x6d   : > { %5656 = vmatpush3.msra.mxu0 %v7546_v5  ;;  %v539_v22 = vand.u32 4294901760, %v7558_v15  ;;  %v546_v23 = vand.u32 4294901760, %v7561_v16  ;;  %v7583_v27 = vand.u32 4294901760, %v404_v19  ;;  %v7587_v30 = vsub.f32 %v407_v9, %v7554_v12  ;;  %v7625_v48 = vld [vmem:[%s7516_s25] sm:$0xff]  ;;  %v7633_v51 = vld [vmem:[%s7516_s25 + $0x8] sm:$0xff]  ;;  %s4827_s16 = sshll.u32 %s369_s13, 4  ;;  %s9939_s16 = int_to_ptr.vmem [resolvable:$true] %s4827_s16 }
  0x6e   : > { %v553_v24 = vand.u32 4294901760, %v7566_v18  ;;  %5657 = vmatprep.subr.mxu0 %v7326_v0  ;;  %v560_v26 = vand.u32 4294901760, %v7570_v20  ;;  %v567_v28 = vand.u32 4294901760, %v7573_v21  ;;  %v7600_v34 = vsub.f32 %v406_v13, %v7563_v17  ;;  %v398_v3 = vld [vmem:[#allocation7 + $0x88] sm:$0xff]  ;;  %v397_v9 = vld [vmem:[#allocation7 + $0x80] sm:$0xff]  ;;  %s4812_s24 = scalar_lea.sflag [#allocation4], %s7510_s2 }
  0x6f   : > { %5658 = vmatpush3.msra.mxu0 %v7548_v6  ;;  %v540_v31 = vsub.f32 %v7558_v15, %v539_v22  ;;  %v547_v32 = vsub.f32 %v7561_v16, %v546_v23  ;;  %v574_v35 = vand.u32 4294901760, %v7587_v30  ;;  %v7608_v40 = vand.u32 4294901760, %v403_v29  ;;  %s7226_s12 = scalar_lea.vmem %s9939_s16, 256  ;;  %s7328_s17 = smov [#allocation10]  }
  0x70   : > { %v554_v33 = vsub.f32 %v7566_v18, %v553_v24  ;;  %5659 = vmatprep.subr.mxu0 %v7326_v0  ;;  %v561_v39 = vsub.f32 %v7570_v20, %v560_v26  ;;  %v568_v41 = vsub.f32 %v7573_v21, %v567_v28  ;;  %v7615_v43 = vsub.f32 %v405_v14, %v7579_v25  ;;  %p7227_p1 = scmp.ne.s32.totalorder %s9939_s16, %s7226_s12  ;;  %s7230_s8 = sshll.u32 %s7328_s17, 4  ;;  %s7231_s8 = int_to_ptr.vmem [resolvable:$false] %s7230_s8 }
  0x71   : > { %5660 = vmatpush3.msra.mxu0 %v7550_v10  ;;  %v541_v37 = vand.u32 4294901760, %v540_v31  ;;  %v548_v38 = vand.u32 4294901760, %v547_v32  ;;  %v7618_v45 = vand.u32 4294901760, %v402_v36  ;;  %v581_v46 = vand.u32 4294901760, %v7600_v34  ;;  %s7232_s18 = scalar_lea.vmem %s7231_s8, 512  ;;  %p7233_p2 = scmp.lt.s32.totalorder %s9939_s16, %s7231_s8 }
  0x72   : > { %5661 = vmatprep.subr.mxu0 %v7326_v0  ;;  %v555_v44 = vand.u32 4294901760, %v554_v33  ;;  %v7622_v47 = vsub.f32 %v404_v19, %v7583_v27  ;;  %v575_v49 = vsub.f32 %v7587_v30, %v574_v35  ;;  %v562_v52 = vand.u32 4294901760, %v561_v39  ;;  %p7228_p4 = pnand %p7227_p1, %p7463_p3  ;;  %p7234_p7 = scmp.lt.s32.totalorder %s7232_s18, %s7226_s12 }
  0x73   : > { %5662 = vmatpush3.msra.mxu0 %v7552_v11  ;;  %5695 = vmatpush3.msra.mxu1 %v541_v37  ;;  %v7636_v53 = vand.u32 4294901760, %v401_v42  ;;  %v588_v54 = vand.u32 4294901760, %v7615_v43  ;;  %v7640_v56 = vsub.f32 %v403_v29, %v7608_v40  ;;  %v569_v57 = vand.u32 4294901760, %v568_v41 }
  0x74   : > { %5663 = vmatprep.subr.mxu0 %v7326_v0  ;;  %5696 = vmatprep.subr.mxu1 %v7326_v0  ;;  %v595_v58 = vand.u32 4294901760, %v7622_v47  ;;  %v417_v59 = vrot.slane %v7625_v48, 1  ;;  %v582_v60 = vsub.f32 %v7600_v34, %v581_v46  ;;  %v7650_v61 = vand.u32 4294901760, %v400_v50  ;;  %p7229_p8 = pneg %p7228_p4  ;;  %p7235_p9 = por %p7234_p7, %p7233_p2 }
  0x75   : > { %5664 = vmatpush3.msra.mxu0 %v7554_v12  ;;  %5697 = vmatpush3.msra.mxu1 %v548_v38  ;;  %v7653_v62 = vsub.f32 %v402_v36, %v7618_v45  ;;  %v418_v63 = vrot.slane %v7633_v51, 1  ;;  %v576_v1 = vand.u32 4294901760, %v575_v49  ;;  %v7658_v2 = vand.u32 4294901760, %v399_v55 }
  0x76   : > { %5665 = vmatprep.subr.mxu0 %v7326_v0  ;;  %5698 = vmatprep.subr.mxu1 %v7326_v0  ;;  %v589_v7 = vsub.f32 %v7615_v43, %v588_v54  ;;  %v602_v8 = vand.u32 4294901760, %v7640_v56  ;;  %v7666_v13 = vsub.f32 %v401_v42, %v7636_v53  ;;  %v596_v19 = vsub.f32 %v7622_v47, %v595_v58  ;;  %p7236_p12 = pnand %p7235_p9, %p7229_p8 }
  0x77   : > { %5666 = vmatpush3.msra.mxu0 %v7563_v17  ;;  %5699 = vmatpush3.msra.mxu1 %v555_v44  ;;  %v419_v14 = vsel %vm416_vm1, %v417_v59, %v418_v63  ;;  %v583_v31 = vand.u32 4294901760, %v582_v60  ;;  %v7679_v32 = vand.u32 4294901760, %v398_v3  ;;  %v609_v33 = vand.u32 4294901760, %v7653_v62 }
  0x78   : > { %5667 = vmatprep.subr.mxu0 %v7326_v0  ;;  %5700 = vmatprep.subr.mxu1 %v7326_v0  ;;  %v7676_v29 = vand.u32 4294901760, %v419_v14  ;;  %v7683_v36 = vsub.f32 %v400_v50, %v7650_v61  ;;  %v7687_v37 = vand.u32 4294901760, %v397_v9  ;;  %v590_v39 = vand.u32 4294901760, %v589_v7 }
  0x79   : > { %5668 = vmatpush3.msra.mxu0 %v7579_v25  ;;  %5701 = vmatpush3.msra.mxu1 %v562_v52  ;;  %v603_v41 = vsub.f32 %v7640_v56, %v602_v8  ;;  %v616_v42 = vand.u32 4294901760, %v7666_v13  ;;  %v7698_v44 = vsub.f32 %v399_v55, %v7658_v2  ;;  %v597_v49 = vand.u32 4294901760, %v596_v19 }
  0x7a   : > { %5669 = vmatprep.subr.mxu0 %v7326_v0  ;;  %5702 = vmatprep.subr.mxu1 %v7326_v0  ;;  %v7690_v38 = vsub.f32 %v419_v14, %v7676_v29  ;;  %v610_v50 = vsub.f32 %v7653_v62, %v609_v33  ;;  %v7709_v59 = vsub.f32 %v398_v3, %v7679_v32  ;;  %vm1895_vm2 = vcmask 1045504  }
  0x7b   : > { %5670 = vmatpush3.msra.mxu0 %v7583_v27  ;;  %5703 = vmatpush3.msra.mxu1 %v569_v57  ;;  %v10003_v57 = vand.u32 4294901760, %v7683_v36  ;;  %v604_v55 = vand.u32 4294901760, %v603_v41  ;;  %v617_v60 = vsub.f32 %v7666_v13, %v616_v42  ;;  %v7719_v7 = vsub.f32 %v397_v9, %v7687_v37 }
  0x7c   : > { %5671 = vmatprep.subr.mxu0 %v7326_v0  ;;  %5704 = vmatprep.subr.mxu1 %v7326_v0  ;;  %v508_v52 = vand.u32 4294901760, %v7690_v38  ;;  %v611_v3 = vand.u32 4294901760, %v610_v50  ;;  %v637_v9 = vand.u32 4294901760, %v7709_v59 }
  0x7d   : > { %5672 = vmatpush3.msra.mxu0 %v7608_v40  ;;  %5705 = vmatpush3.msra.mxu1 %v576_v1  ;;  %v10004_v1 = vand.u32 4294901760, %v7698_v44  ;;  %v624_v19 = vsub.f32 %v7683_v36, %v10003_v57  ;;  %v644_v41 = vand.u32 4294901760, %v7719_v7 }
  0x7e   : > { %5673 = vmatprep.subr.mxu0 %v7326_v0  ;;  %5706 = vmatprep.subr.mxu1 %v7326_v0  ;;  %v509_v14 = vsub.f32 %v7690_v38, %v508_v52 }
  0x7f   : > { %5674 = vmatpush3.msra.mxu0 %v7618_v45  ;;  %5707 = vmatpush3.msra.mxu1 %v583_v31  ;;  %v618_v31 = vand.u32 4294901760, %v617_v60  ;;  %v625_v57 = vand.u32 4294901760, %v624_v19 }
  0x80   : > { %5675 = vmatprep.subr.mxu0 %v7326_v0  ;;  %5708 = vmatprep.subr.mxu1 %v7326_v0  ;;  %v510_v50 = vand.u32 4294901760, %v509_v14 }
  0x81   : > { %5676 = vmatpush3.msra.mxu0 %v7636_v53  ;;  %5709 = vmatpush3.msra.mxu1 %v590_v39  ;;  %v631_v39 = vsub.f32 %v7698_v44, %v10004_v1 }
  0x82   : > { %5677 = vmatprep.subr.mxu0 %v7326_v0  ;;  %5710 = vmatprep.subr.mxu1 %v7326_v0 }
  0x83   : > { %5678 = vmatpush3.msra.mxu0 %v7650_v61  ;;  %5711 = vmatpush3.msra.mxu1 %v597_v49  ;;  %v7739_v49 = vld [vmem:[%s7524_s14] sm:$0xff]  ;;  %v632_v1 = vand.u32 4294901760, %v631_v39 }
  0x84   : > { %5679 = vmatprep.subr.mxu0 %v7326_v0  ;;  %5712 = vmatprep.subr.mxu1 %v7326_v0  ;;  %v420_v60 = vrot.slane %v7739_v49, 1 }
  0x85   : > { %5680 = vmatpush3.msra.mxu0 %v7658_v2  ;;  %5713 = vmatpush3.msra.mxu1 %v604_v55  ;;  %v638_v55 = vsub.f32 %v7709_v59, %v637_v9 }
  0x86   : > { %5681 = vmatprep.subr.mxu0 %v7326_v0  ;;  %5714 = vmatprep.subr.mxu1 %v7326_v0  ;;  %v421_v19 = vsel %vm416_vm1, %v418_v63, %v420_v60 }
  0x87   : > { %5682 = vmatpush3.msra.mxu0 %v7679_v32  ;;  %5715 = vmatpush3.msra.mxu1 %v611_v3  ;;  %v645_v3 = vsub.f32 %v7719_v7, %v644_v41  ;;  %v639_v14 = vand.u32 4294901760, %v638_v55 }
  0x88   : > { %5683 = vmatprep.subr.mxu0 %v7326_v0  ;;  %5716 = vmatprep.subr.mxu1 %v7326_v0 }
  0x89   : > { %5684 = vmatpush3.msra.mxu0 %v7687_v37  ;;  %5717 = vmatpush3.msra.mxu1 %v618_v31  ;;  %v646_v31 = vand.u32 4294901760, %v645_v3 }
  0x8a   : > { %5718 = vmatprep.subr.mxu1 %v7326_v0  ;;  %5735 = vmatprep.subr.mxu0 %v7326_v0 }
  0x8b   : > { %5686 = vmatmul.mubr.f32.vlgmr.msra.gmra.mxu0 %v510_v50  ;;  %5719 = vmatpush3.msra.mxu1 %v625_v57  ;;  %v7765_v57 = vand.u32 4294901760, %v421_v19 }
  0x8c   : > { %5736 = vmatpush3.msra.mxu0 %v7558_v15  ;;  %5720 = vmatprep.subr.mxu1 %v7326_v0 }
  0x8d   : > { %5737 = vmatprep.subr.mxu0 %v7326_v0  ;;  %5721 = vmatpush3.msra.mxu1 %v632_v1  ;;  %v7775_v63 = vsub.f32 %v421_v19, %v7765_v57  ;;  %v7779_v1 = vand.u32 4294901760, %v420_v60 }
  0x8e   : > { %5738 = vmatpush3.msra.mxu0 %v7561_v16  ;;  %5722 = vmatprep.subr.mxu1 %v7326_v0 }
  0x8f   : > { %5739 = vmatprep.subr.mxu0 %v7326_v0  ;;  %5723 = vmatpush3.msra.mxu1 %v639_v14  ;;  %v518_v39 = vand.u32 4294901760, %v7775_v63  ;;  %v7791_v50 = vsub.f32 %v420_v60, %v7779_v1 }
  0x90   : > { %5740 = vmatpush3.msra.mxu0 %v7566_v18  ;;  %5724 = vmatprep.subr.mxu1 %v7326_v0  ;;  %v393_v18 = vld [vmem:[#allocation7 + $0x60] sm:$0xff] }
  0x91   : > { %5741 = vmatprep.subr.mxu0 %v7326_v0  ;;  %5725 = vmatpush3.msra.mxu1 %v646_v31  ;;  %v519_v55 = vsub.f32 %v7775_v63, %v518_v39  ;;  %v528_v60 = vand.u32 4294901760, %v7791_v50 }
  0x92   : > { %5742 = vmatpush3.msra.mxu0 %v7570_v20  ;;  %5727 = vmatmul.mubr.f32.vlgmr.msra.gmra.mxu1 %v7676_v29 }
  0x93   : > { %5743 = vmatprep.subr.mxu0 %v7326_v0  ;;  %5776 = vmatprep.subr.mxu1 %v7326_v0  ;;  %v520_v3 = vand.u32 4294901760, %v519_v55  ;;  %v529_v14 = vsub.f32 %v7791_v50, %v528_v60 }
  0x94   : > { %5744 = vmatpush3.msra.mxu0 %v7573_v21  ;;  %5777 = vmatpush3.msra.mxu1 %v7544_v4  ;;  %v392_v21 = vld [vmem:[#allocation7 + $0x58] sm:$0xff] }
  0x95   : > { %5745 = vmatprep.subr.mxu0 %v7326_v0  ;;  %5778 = vmatprep.subr.mxu1 %v7326_v0  ;;  %v530_v19 = vand.u32 4294901760, %v529_v14  ;;  %v384_v14 = vld [vmem:[#allocation7 + $0x18] sm:$0xff] }
  0x96   : > { %5746 = vmatpush3.msra.mxu0 %v7587_v30  ;;  %5779 = vmatpush3.msra.mxu1 %v7546_v5 }
  0x97   : > { %5747 = vmatprep.subr.mxu0 %v7326_v0  ;;  %5780 = vmatprep.subr.mxu1 %v7326_v0 }
  0x98   : > { %5748 = vmatpush3.msra.mxu0 %v7600_v34  ;;  %5781 = vmatpush3.msra.mxu1 %v7548_v6 }
  0x99   : > { %5749 = vmatprep.subr.mxu0 %v7326_v0  ;;  %5782 = vmatprep.subr.mxu1 %v7326_v0 }
  0x9a   : > { %5750 = vmatpush3.msra.mxu0 %v7615_v43  ;;  %5783 = vmatpush3.msra.mxu1 %v7550_v10  ;;  %v389_v43 = vld [vmem:[#allocation7 + $0x40] sm:$0xff] }
  0x9b   : > { %5751 = vmatprep.subr.mxu0 %v7326_v0  ;;  %5784 = vmatprep.subr.mxu1 %v7326_v0 }
  0x9c   : > { %5752 = vmatpush3.msra.mxu0 %v7622_v47  ;;  %5785 = vmatpush3.msra.mxu1 %v7552_v11 }
  0x9d   : > { %5753 = vmatprep.subr.mxu0 %v7326_v0  ;;  %5786 = vmatprep.subr.mxu1 %v7326_v0 }
  0x9e   : > { %5754 = vmatpush3.msra.mxu0 %v7640_v56  ;;  %5787 = vmatpush3.msra.mxu1 %v7554_v12 }
  0x9f   : > { %5755 = vmatprep.subr.mxu0 %v7326_v0  ;;  %5788 = vmatprep.subr.mxu1 %v7326_v0 }
  0xa0   : > { %5756 = vmatpush3.msra.mxu0 %v7653_v62  ;;  %5789 = vmatpush3.msra.mxu1 %v7563_v17 }
  0xa1   : > { %5757 = vmatprep.subr.mxu0 %v7326_v0  ;;  %5790 = vmatprep.subr.mxu1 %v7326_v0 }
  0xa2   : > { %5688 = vmatprep.mubr.msk.f32.mxu0 %vm7327_vm0, %v7326_v0  ;;  %5758 = vmatpush3.msra.mxu0 %v7666_v13 }
  0xa3   : > { %5791 = vmatpush3.msra.mxu1 %v7579_v25  ;;  %5689 = vmatmul.mubr.f32.gmra.mxu0 %v520_v3 }
  0xa4   : > { %5759 = vmatprep.subr.mxu0 %v7326_v0  ;;  %5792 = vmatprep.subr.mxu1 %v7326_v0 }
  0xa5   : > { %5760 = vmatpush3.msra.mxu0 %v7683_v36  ;;  %5793 = vmatpush3.msra.mxu1 %v7583_v27 }
  0xa6   : > { %5761 = vmatprep.subr.mxu0 %v7326_v0  ;;  %5794 = vmatprep.subr.mxu1 %v7326_v0 }
  0xa7   : > { %5691 = vmatprep.mubr.msk.f32.mxu0 %vm7327_vm0, %v7326_v0  ;;  %5762 = vmatpush3.msra.mxu0 %v7698_v44 }
  0xa8   : > { %5795 = vmatpush3.msra.mxu1 %v7608_v40  ;;  %5692 = vmatmul.mubr.f32.gmra.mxu0 %v530_v19  ;;  %v8072_v19 = vand.u32 4294901760, %v7625_v48 }
  0xa9   : > { %5763 = vmatprep.subr.mxu0 %v7326_v0  ;;  %5796 = vmatprep.subr.mxu1 %v7326_v0 }
  0xaa   : > { %5764 = vmatpush3.msra.mxu0 %v7709_v59  ;;  %5797 = vmatpush3.msra.mxu1 %v7618_v45 }
  0xab   : > { %5729 = vmatprep.mubr.msk.f32.mxu1 %vm7327_vm0, %v7326_v0  ;;  %5765 = vmatprep.subr.mxu0 %v7326_v0 }
  0xac   : > { %5798 = vmatprep.subr.mxu1 %v7326_v0  ;;  %5730 = vmatmul.mubr.f32.gmra.mxu1 %v7765_v57 }
  0xad   : > { %5766 = vmatpush3.msra.mxu0 %v7719_v7  ;;  %5767 = vmatprep.mubr.msk.f32.mxu0 %vm7327_vm0, %v7326_v0 }
  0xae   : > { %5799 = vmatpush3.msra.mxu1 %v7636_v53  ;;  %5768 = vmatmul.mubr.f32.vlgmr.msra.gmra.mxu0 %v7690_v38  ;;  %v386_v38 = vld [vmem:[#allocation7 + $0x28] sm:$0xff] }
  0xaf   : > { %5800 = vmatprep.subr.mxu1 %v7326_v0  ;;  %5817 = vmatprep.subr.mxu0 %v7326_v0 }
  0xb0   : > { %5801 = vmatpush3.msra.mxu1 %v7650_v61  ;;  %5818 = vmatpush3.msra.mxu0 %v539_v22  ;;  %v7964_v22 = vand.u32 4294901760, %v393_v18 }
  0xb1   : > { %5732 = vmatprep.mubr.msk.f32.mxu1 %vm7327_vm0, %v7326_v0  ;;  %5802 = vmatprep.subr.mxu1 %v7326_v0 }
  0xb2   : > { %5819 = vmatprep.subr.mxu0 %v7326_v0  ;;  %5733 = vmatmul.mubr.f32.gmra.mxu1 %v7779_v1  ;;  %v7983_v30 = vsub.f32 %v393_v18, %v7964_v22  ;;  %v8089_v18 = vand.u32 4294901760, %v384_v14 }
  0xb3   : > { %5770 = vmatprep.mubr.msk.f32.mxu0 %vm7327_vm0, %v7326_v0  ;;  %5803 = vmatpush3.msra.mxu1 %v7658_v2 }
  0xb4   : > { %5820 = vmatpush3.msra.mxu0 %v546_v23  ;;  %5804 = vmatprep.subr.mxu1 %v7326_v0 }
  0xb5   : > { %5771 = vmatmul.mubr.f32.gmra.mxu0 %v7775_v63  ;;  %5821 = vmatprep.subr.mxu0 %v7326_v0  ;;  %v385_v63 = vld [vmem:[#allocation7 + $0x20] sm:$0xff] }
  0xb6   : > { %5805 = vmatpush3.msra.mxu1 %v7679_v32  ;;  %5822 = vmatpush3.msra.mxu0 %v553_v24 }
  0xb7   : > { %5806 = vmatprep.subr.mxu1 %v7326_v0  ;;  %5823 = vmatprep.subr.mxu0 %v7326_v0 }
  0xb8   : > { %5773 = vmatprep.mubr.msk.f32.mxu0 %vm7327_vm0, %v7326_v0  ;;  %5807 = vmatpush3.msra.mxu1 %v7687_v37 }
  0xb9   : > { %5808 = vmatprep.mubr.msk.f32.mxu1 %vm7327_vm0, %v7326_v0  ;;  %5824 = vmatpush3.msra.mxu0 %v560_v26  ;;  %v7974_v26 = vand.u32 4294901760, %v392_v21 }
  0xba   : > { %5774 = vmatmul.mubr.f32.gmra.mxu0 %v7791_v50  ;;  %5809 = vmatmul.mubr.f32.vlgmr.msra.gmra.mxu1 %v508_v52 }
  0xbb   : > { %5825 = vmatprep.subr.mxu0 %v7326_v0  ;;  %5858 = vmatprep.subr.mxu1 %v7326_v0 }
  0xbc   : > { %5826 = vmatpush3.msra.mxu0 %v567_v28  ;;  %5859 = vmatpush3.msra.mxu1 %v7544_v4  ;;  %v396_v4 = vld [vmem:[#allocation7 + $0x78] sm:$0xff]  ;;  %v390_v28 = vld [vmem:[#allocation7 + $0x48] sm:$0xff] }
  0xbd   : > { %5827 = vmatprep.subr.mxu0 %v7326_v0  ;;  %5860 = vmatprep.subr.mxu1 %v7326_v0 }
  0xbe   : > { %5811 = vmatprep.mubr.msk.f32.mxu1 %vm7327_vm0, %v7326_v0  ;;  %5828 = vmatpush3.msra.mxu0 %v574_v35 }
  0xbf   : > { %5861 = vmatpush3.msra.mxu1 %v7546_v5  ;;  %5829 = vmatprep.subr.mxu0 %v7326_v0  ;;  %v10075_v5 = vand.u32 4294901760, %v7683_v36  ;;  %v10005_v36 = vrot.slane %v7633_v51, 2 }
  0xc0   : > { %5812 = vmatmul.mubr.f32.gmra.mxu1 %v518_v39  ;;  %5862 = vmatprep.subr.mxu1 %v7326_v0 }
  0xc1   : > { %5830 = vmatpush3.msra.mxu0 %v581_v46  ;;  %5863 = vmatpush3.msra.mxu1 %v7548_v6  ;;  %v7932_v6 = vand.u32 4294901760, %v396_v4  ;;  %v7998_v46 = vand.u32 4294901760, %v390_v28 }
  0xc2   : > { %5831 = vmatprep.subr.mxu0 %v7326_v0  ;;  %5864 = vmatprep.subr.mxu1 %v7326_v0 }
  0xc3   : > { %5814 = vmatprep.mubr.msk.f32.mxu1 %vm7327_vm0, %v7326_v0  ;;  %5832 = vmatpush3.msra.mxu0 %v588_v54  ;;  %v7947_v16 = vsub.f32 %v396_v4, %v7932_v6 }
  0xc4   : > { %5865 = vmatpush3.msra.mxu1 %v7550_v10  ;;  %5833 = vmatprep.subr.mxu0 %v7326_v0  ;;  %v395_v10 = vld [vmem:[#allocation7 + $0x70] sm:$0xff] }
  0xc5   : > { %5815 = vmatmul.mubr.f32.gmra.mxu1 %v528_v60  ;;  %5866 = vmatprep.subr.mxu1 %v7326_v0  ;;  %v7941_v15 = vand.u32 4294901760, %v395_v10  ;;  %v1266_v23 = vand.u32 4294901760, %v7947_v16 }
  0xc6   : > { %5834 = vmatpush3.msra.mxu0 %v595_v58  ;;  %5867 = vmatpush3.msra.mxu1 %v7552_v11  ;;  %v10076_v11 = vand.u32 4294901760, %v7698_v44  ;;  %v8011_v58 = vand.u32 4294901760, %v389_v43 }
  0xc7   : > { %5835 = vmatprep.subr.mxu0 %v7326_v0  ;;  %5868 = vmatprep.subr.mxu1 %v7326_v0  ;;  %v7960_v20 = vsub.f32 %v395_v10, %v7941_v15  ;;  %v1267_v34 = vsub.f32 %v7947_v16, %v1266_v23 }
  0xc8   : > { %5836 = vmatpush3.msra.mxu0 %v602_v8  ;;  %5869 = vmatpush3.msra.mxu1 %v7554_v12  ;;  %v394_v12 = vld [vmem:[#allocation7 + $0x68] sm:$0xff]  ;;  %v8023_v8 = vsub.f32 %v390_v28, %v7998_v46 }
  0xc9   : > { %5837 = vmatprep.subr.mxu0 %v7326_v0  ;;  %5870 = vmatprep.subr.mxu1 %v7326_v0  ;;  %v1268_v54 = vand.u32 4294901760, %v1267_v34 }
  0xca   : > { %5838 = vmatpush3.msra.mxu0 %v609_v33  ;;  %5871 = vmatpush3.msra.mxu1 %v7563_v17  ;;  %v7951_v17 = vand.u32 4294901760, %v394_v12  ;;  %v1896_v33 = vrot.slane %v7625_v48, 2  ;;  %v1308_v31 = vand.u32 4294901760, %v8023_v8 }
  0xcb   : > { %5839 = vmatprep.subr.mxu0 %v7326_v0  ;;  %5872 = vmatprep.subr.mxu1 %v7326_v0 }
  0xcc   : > { %5840 = vmatpush3.msra.mxu0 %v616_v42  ;;  %5873 = vmatpush3.msra.mxu1 %v7579_v25  ;;  %v7970_v24 = vsub.f32 %v394_v12, %v7951_v17  ;;  %v391_v25 = vld [vmem:[#allocation7 + $0x50] sm:$0xff]  ;;  %v8060_v39 = vsel %vm1895_vm2, %v1896_v33, %v10005_v36  ;;  %v1309_v10 = vsub.f32 %v8023_v8, %v1308_v31  ;;  %v381_v33 = vld [vmem:[#allocation7] sm:$0xff] }
  0xcd   : > { %5841 = vmatprep.subr.mxu0 %v7326_v0  ;;  %5874 = vmatprep.subr.mxu1 %v7326_v0  ;;  %v7988_v35 = vand.u32 4294901760, %v391_v25  ;;  %10077 = vst [vmem:[#allocation22_spill] sm:$0xff] %v8060_v39  ;;  %v383_v12 = vld [vmem:[#allocation7 + $0x10] sm:$0xff] }
  0xce   : > { %5842 = vmatpush3.msra.mxu0 %v10075_v5  ;;  %5875 = vmatpush3.msra.mxu1 %v7583_v27  ;;  %v1273_v27 = vand.u32 4294901760, %v7960_v20 }
  0xcf   : > { %5843 = vmatprep.subr.mxu0 %v7326_v0  ;;  %5876 = vmatprep.subr.mxu1 %v7326_v0  ;;  %v8009_v56 = vsub.f32 %v391_v25, %v7988_v35 }
  0xd0   : > { %5844 = vmatpush3.msra.mxu0 %v10076_v11  ;;  %5877 = vmatpush3.msra.mxu1 %v7608_v40  ;;  %v1280_v40 = vand.u32 4294901760, %v7970_v24  ;;  %v1274_v47 = vsub.f32 %v7960_v20, %v1273_v27 }
  0xd1   : > { %5845 = vmatprep.subr.mxu0 %v7326_v0  ;;  %5878 = vmatprep.subr.mxu1 %v7326_v0  ;;  %v1301_v52 = vand.u32 4294901760, %v8009_v56 }
  0xd2   : > { %5846 = vmatpush3.msra.mxu0 %v637_v9  ;;  %5879 = vmatpush3.msra.mxu1 %v7618_v45  ;;  %v7996_v45 = vsub.f32 %v392_v21, %v7974_v26  ;;  %v1281_v62 = vsub.f32 %v7970_v24, %v1280_v40 }
  0xd3   : > { %5847 = vmatprep.subr.mxu0 %v7326_v0  ;;  %5880 = vmatprep.subr.mxu1 %v7326_v0  ;;  %v1302_v60 = vsub.f32 %v8009_v56, %v1301_v52 }
  0xd4   : > { %5848 = vmatpush3.msra.mxu0 %v644_v41  ;;  %5849 = vmatprep.mubr.msk.f32.mxu0 %vm7327_vm0, %v7326_v0  ;;  %v1282_v59 = vand.u32 4294901760, %v1281_v62  ;;  %v8053_v41 = vand.u32 4294901760, %v386_v38 }
  0xd5   : > { %5881 = vmatpush3.msra.mxu1 %v7636_v53  ;;  %5850 = vmatmul.mubr.f32.vlgmr.msra.gmra.mxu0 %v7676_v29  ;;  %v388_v53 = vld [vmem:[#allocation7 + $0x38] sm:$0xff]  ;;  %v1303_v21 = vand.u32 4294901760, %v1302_v60 }
  0xd6   : > { %5882 = vmatprep.subr.mxu1 %v7326_v0  ;;  %5899 = vmatprep.subr.mxu0 %v7326_v0  ;;  %v8025_v13 = vand.u32 4294901760, %v388_v53  ;;  %v8080_v5 = vsub.f32 %v386_v38, %v8053_v41 }
  0xd7   : > { %5883 = vmatpush3.msra.mxu1 %v7650_v61  ;;  %5900 = vmatpush3.msra.mxu0 %v7932_v6  ;;  %v1287_v61 = vand.u32 4294901760, %v7983_v30 }
  0xd8   : > { %5884 = vmatprep.subr.mxu1 %v7326_v0  ;;  %5901 = vmatprep.subr.mxu0 %v7326_v0  ;;  %v8048_v7 = vsub.f32 %v388_v53, %v8025_v13  ;;  %v8105_v53 = vsub.f32 %v7625_v48, %v8072_v19  ;;  %v10007_v62 = vand.u32 4294901760, %v8080_v5  ;;  %v8118_v48 = vand.u32 4294901760, %v7633_v51 }
  0xd9   : > { %5852 = vmatprep.mubr.msk.f32.mxu0 %vm7327_vm0, %v7326_v0  ;;  %5885 = vmatpush3.msra.mxu1 %v7658_v2  ;;  %v387_v2 = vld [vmem:[#allocation7 + $0x30] sm:$0xff]  ;;  %v1288_v42 = vsub.f32 %v7983_v30, %v1287_v61 }
  0xda   : > { %5902 = vmatpush3.msra.mxu0 %v7941_v15  ;;  %5886 = vmatprep.subr.mxu1 %v7326_v0  ;;  %v8039_v44 = vand.u32 4294901760, %v387_v2  ;;  %v1322_v11 = vand.u32 4294901760, %v8048_v7  ;;  %v1337_v60 = vsub.f32 %v8080_v5, %v10007_v62 }
  0xdb   : > { %5853 = vmatmul.mubr.f32.gmra.mxu0 %v7765_v57  ;;  %5903 = vmatprep.subr.mxu0 %v7326_v0  ;;  %v1289_v50 = vand.u32 4294901760, %v1288_v42 }
  0xdc   : > { %5887 = vmatpush3.msra.mxu1 %v7679_v32  ;;  %5904 = vmatpush3.msra.mxu0 %v7951_v17  ;;  %v1294_v32 = vand.u32 4294901760, %v7996_v45  ;;  %v8065_v55 = vsub.f32 %v387_v2, %v8039_v44  ;;  %v8115_v2 = vsub.f32 %v384_v14, %v8089_v18  ;;  %v8137_v14 = vand.u32 4294901760, %v381_v33 }
  0xdd   : > { %5888 = vmatprep.subr.mxu1 %v7326_v0  ;;  %5905 = vmatprep.subr.mxu0 %v7326_v0 }
  0xde   : > { %5855 = vmatprep.mubr.msk.f32.mxu0 %vm7327_vm0, %v7326_v0  ;;  %5889 = vmatpush3.msra.mxu1 %v7687_v37  ;;  %v1275_v37 = vand.u32 4294901760, %v1274_v47  ;;  %v1295_v9 = vsub.f32 %v7996_v45, %v1294_v32  ;;  %v10009_v28 = vand.u32 4294901760, %v8065_v55  ;;  %v382_v47 = vld [vmem:[#allocation7 + $0x8] sm:$0xff] }
  0xdf   : > { %5890 = vmatprep.mubr.msk.f32.mxu1 %vm7327_vm0, %v7326_v0  ;;  %5906 = vmatpush3.msra.mxu0 %v7964_v22  ;;  %v8124_v42 = vand.u32 4294901760, %v382_v47 }
  0xe0   : > { %5856 = vmatmul.mubr.f32.gmra.mxu0 %v7779_v1  ;;  %5891 = vmatmul.mubr.f32.vlgmr.msra.gmra.mxu1 %v7676_v29  ;;  %v8034_v29 = vsub.f32 %v389_v43, %v8011_v58  ;;  %v1296_v4 = vand.u32 4294901760, %v1295_v9  ;;  %v8101_v43 = vand.u32 4294901760, %v383_v12  ;;  %v1330_v38 = vsub.f32 %v8065_v55, %v10009_v28 }
  0xe1   : > { %5907 = vmatprep.subr.mxu0 %v7326_v0  ;;  %5940 = vmatprep.subr.mxu1 %v7326_v0 }
  0xe2   : > { %5908 = vmatpush3.msra.mxu0 %v7974_v26  ;;  %5941 = vmatpush3.msra.mxu1 %v1268_v54  ;;  %v1315_v3 = vand.u32 4294901760, %v8034_v29  ;;  %v1310_v54 = vand.u32 4294901760, %v1309_v10  ;;  %v8144_v10 = vsub.f32 %v7633_v51, %v8118_v48 }
  0xe3   : > { %5909 = vmatprep.subr.mxu0 %v7326_v0  ;;  %5942 = vmatprep.subr.mxu1 %v7326_v0 }
  0xe4   : > { %5893 = vmatprep.mubr.msk.f32.mxu1 %vm7327_vm0, %v7326_v0  ;;  %5910 = vmatpush3.msra.mxu0 %v7988_v35  ;;  %v1316_v25 = vsub.f32 %v8034_v29, %v1315_v3 }
  0xe5   : > { %5943 = vmatpush3.msra.mxu1 %v1275_v37  ;;  %5911 = vmatprep.subr.mxu0 %v7326_v0 }
  0xe6   : > { %5894 = vmatmul.mubr.f32.gmra.mxu1 %v7765_v57  ;;  %5944 = vmatprep.subr.mxu1 %v7326_v0  ;;  %v8075_v57 = vand.u32 4294901760, %v385_v63  ;;  %v1317_v37 = vand.u32 4294901760, %v1316_v25  ;;  %v8151_v25 = vand.u32 4294901760, %v7739_v49 }
  0xe7   : > { %5912 = vmatpush3.msra.mxu0 %v7998_v46  ;;  %5945 = vmatpush3.msra.mxu1 %v1282_v59  ;;  %v8129_v59 = vsub.f32 %v383_v12, %v8101_v43  ;;  %v1331_v12 = vand.u32 4294901760, %v1330_v38  ;;  %v8164_v38 = vsub.f32 %v381_v33, %v8137_v14 }
  0xe8   : > { %5913 = vmatprep.subr.mxu0 %v7326_v0  ;;  %5946 = vmatprep.subr.mxu1 %v7326_v0  ;;  %v8099_v34 = vsub.f32 %v385_v63, %v8075_v57  ;;  %v1235_v63 = vand.u32 4294901760, %v8105_v53 }
  0xe9   : > { %5896 = vmatprep.mubr.msk.f32.mxu1 %vm7327_vm0, %v7326_v0  ;;  %5914 = vmatpush3.msra.mxu0 %v8011_v58 }
  0xea   : > { %5947 = vmatpush3.msra.mxu1 %v1289_v50  ;;  %5915 = vmatprep.subr.mxu0 %v7326_v0  ;;  %v10006_v9 = vand.u32 4294901760, %v8099_v34 }
  0xeb   : > { %5897 = vmatmul.mubr.f32.gmra.mxu1 %v7779_v1  ;;  %5948 = vmatprep.subr.mxu1 %v7326_v0  ;;  %v1323_v1 = vsub.f32 %v8048_v7, %v1322_v11 }
  0xec   : > { %5916 = vmatpush3.msra.mxu0 %v8025_v13  ;;  %5949 = vmatpush3.msra.mxu1 %v1296_v4  ;;  %v10008_v4 = vand.u32 4294901760, %v8115_v2 }
  0xed   : > { %5917 = vmatprep.subr.mxu0 %v7326_v0  ;;  %5950 = vmatprep.subr.mxu1 %v7326_v0  ;;  %v1324_v50 = vand.u32 4294901760, %v1323_v1  ;;  %v1236_v1 = vsub.f32 %v8105_v53, %v1235_v63 }
  0xee   : > { %5918 = vmatpush3.msra.mxu0 %v8039_v44  ;;  %5951 = vmatpush3.msra.mxu1 %v1303_v21  ;;  %v8148_v21 = vsub.f32 %v382_v47, %v8124_v42  ;;  %v1338_v47 = vand.u32 4294901760, %v1337_v60  ;;  %v1351_v36 = vsub.f32 %v8115_v2, %v10008_v4 }
  0xef   : > { %5919 = vmatprep.subr.mxu0 %v7326_v0  ;;  %5952 = vmatprep.subr.mxu1 %v7326_v0  ;;  %v1237_v60 = vand.u32 4294901760, %v1236_v1 }
  0xf0   : > { %5920 = vmatpush3.msra.mxu0 %v8053_v41  ;;  %5953 = vmatpush3.msra.mxu1 %v1310_v54  ;;  %v1344_v54 = vsub.f32 %v8099_v34, %v10006_v9  ;;  %v1245_v9 = vand.u32 4294901760, %v8144_v10  ;;  %v10011_v62 = vand.u32 4294901760, %v8148_v21 }
  0xf1   : > { %5921 = vmatprep.subr.mxu0 %v7326_v0  ;;  %5954 = vmatprep.subr.mxu1 %v7326_v0 }
  0xf2   : > { %5922 = vmatpush3.msra.mxu0 %v8075_v57  ;;  %5955 = vmatpush3.msra.mxu1 %v1317_v37  ;;  %v10010_v37 = vand.u32 4294901760, %v8129_v59  ;;  %v1345_v33 = vand.u32 4294901760, %v1344_v54  ;;  %v1246_v28 = vsub.f32 %v8144_v10, %v1245_v9  ;;  %v1365_v54 = vsub.f32 %v8148_v21, %v10011_v62 }
  0xf3   : > { %5923 = vmatprep.subr.mxu0 %v7326_v0  ;;  %5956 = vmatprep.subr.mxu1 %v7326_v0 }
  0xf4   : > { %5924 = vmatpush3.msra.mxu0 %v8089_v18  ;;  %5957 = vmatpush3.msra.mxu1 %v1324_v50  ;;  %v8176_v50 = vsub.f32 %v7739_v49, %v8151_v25  ;;  %v1358_v4 = vsub.f32 %v8129_v59, %v10010_v37  ;;  %v1352_v49 = vand.u32 4294901760, %v1351_v36  ;;  %v1247_v37 = vand.u32 4294901760, %v1246_v28 }
  0xf5   : > { %5925 = vmatprep.subr.mxu0 %v7326_v0  ;;  %5958 = vmatprep.subr.mxu1 %v7326_v0  ;;  %v1366_v62 = vand.u32 4294901760, %v1365_v54 }
  0xf6   : > { %5926 = vmatpush3.msra.mxu0 %v8101_v43  ;;  %5959 = vmatpush3.msra.mxu1 %v1331_v12  ;;  %v1371_v12 = vand.u32 4294901760, %v8164_v38  ;;  %v1255_v1 = vand.u32 4294901760, %v8176_v50 }
  0xf7   : > { %5927 = vmatprep.subr.mxu0 %v7326_v0  ;;  %5960 = vmatprep.subr.mxu1 %v7326_v0 }
  0xf8   : > { %5928 = vmatpush3.msra.mxu0 %v8124_v42  ;;  %5961 = vmatpush3.msra.mxu1 %v1338_v47  ;;  %v1359_v47 = vand.u32 4294901760, %v1358_v4  ;;  %v1372_v36 = vsub.f32 %v8164_v38, %v1371_v12  ;;  %v1256_v4 = vsub.f32 %v8176_v50, %v1255_v1 }
  0xf9   : > { %5929 = vmatprep.subr.mxu0 %v7326_v0  ;;  %5962 = vmatprep.subr.mxu1 %v7326_v0 }
  0xfa   : > { %5930 = vmatpush3.msra.mxu0 %v8137_v14  ;;  %5931 = vmatprep.mubr.msk.f32.mxu0 %vm7327_vm0, %v7326_v0  ;;  %v1257_v28 = vand.u32 4294901760, %v1256_v4 }
  0xfb   : > { %5963 = vmatpush3.msra.mxu1 %v1345_v33  ;;  %5932 = vmatmul.mubr.f32.vlgmr.msra.gmra.mxu0 %v1237_v60  ;;  %v1373_v33 = vand.u32 4294901760, %v1372_v36 }
  0xfc   : > { %5964 = vmatprep.subr.mxu1 %v7326_v0  ;;  %5981 = vmatprep.subr.mxu0 %v7326_v0 }
  0xfd   : > { %5965 = vmatpush3.msra.mxu1 %v1352_v49  ;;  %5982 = vmatpush3.msra.mxu0 %v7947_v16  ;;  %v1894_v16 = vld [vmem:[#allocation7 + $0x178] sm:$0xff] }
  0xfe   : > { %5966 = vmatprep.subr.mxu1 %v7326_v0  ;;  %5983 = vmatprep.subr.mxu0 %v7326_v0 }
  0xff   : > { %5934 = vmatprep.mubr.msk.f32.mxu0 %vm7327_vm0, %v7326_v0  ;;  %5967 = vmatpush3.msra.mxu1 %v1359_v47  ;;  %v1883_v47 = vld [vmem:[#allocation7 + $0x120] sm:$0xff] }
 0x100   : > { %5984 = vmatpush3.msra.mxu0 %v7960_v20  ;;  %5968 = vmatprep.subr.mxu1 %v7326_v0  ;;  %v10081_v20 = vand.u32 4294901760, %v8115_v2 }
 0x101   : > { %5935 = vmatmul.mubr.f32.gmra.mxu0 %v1247_v37  ;;  %5985 = vmatprep.subr.mxu0 %v7326_v0 }
 0x102   : > { %5969 = vmatpush3.msra.mxu1 %v1366_v62  ;;  %5986 = vmatpush3.msra.mxu0 %v7970_v24  ;;  %v10082_v24 = vand.u32 4294901760, %v8129_v59 }
 0x103   : > { %5970 = vmatprep.subr.mxu1 %v7326_v0  ;;  %5987 = vmatprep.subr.mxu0 %v7326_v0 }
 0x104   : > { %5937 = vmatprep.mubr.msk.f32.mxu0 %vm7327_vm0, %v7326_v0  ;;  %5971 = vmatpush3.msra.mxu1 %v1373_v33 }
 0x105   : > { %5972 = vmatprep.mubr.msk.f32.mxu1 %vm7327_vm0, %v7326_v0  ;;  %5988 = vmatpush3.msra.mxu0 %v7983_v30  ;;  %v10083_v30 = vand.u32 4294901760, %v8148_v21 }
 0x106   : > { %5938 = vmatmul.mubr.f32.gmra.mxu0 %v1257_v28  ;;  %5973 = vmatmul.mubr.f32.vlgmr.msra.gmra.mxu1 %v8072_v19 }
 0x107   : > { %5989 = vmatprep.subr.mxu0 %v7326_v0  ;;  %6022 = vmatprep.subr.mxu1 %v7326_v0 }
 0x108   : > { %5990 = vmatpush3.msra.mxu0 %v7996_v45  ;;  %6023 = vmatpush3.msra.mxu1 %v7932_v6 }
 0x109   : > { %5991 = vmatprep.subr.mxu0 %v7326_v0  ;;  %6024 = vmatprep.subr.mxu1 %v7326_v0 }
 0x10a   : > { %5975 = vmatprep.mubr.msk.f32.mxu1 %vm7327_vm0, %v7326_v0  ;;  %5992 = vmatpush3.msra.mxu0 %v8009_v56 }
 0x10b   : > { %6025 = vmatpush3.msra.mxu1 %v7941_v15  ;;  %5993 = vmatprep.subr.mxu0 %v7326_v0 }
 0x10c   : > { %5976 = vmatmul.mubr.f32.gmra.mxu1 %v8118_v48  ;;  %6026 = vmatprep.subr.mxu1 %v7326_v0 }
 0x10d   : > { %5994 = vmatpush3.msra.mxu0 %v8023_v8  ;;  %6027 = vmatpush3.msra.mxu1 %v7951_v17 }
 0x10e   : > { %5995 = vmatprep.subr.mxu0 %v7326_v0  ;;  %6028 = vmatprep.subr.mxu1 %v7326_v0 }
 0x10f   : > { %5978 = vmatprep.mubr.msk.f32.mxu1 %vm7327_vm0, %v7326_v0  ;;  %5996 = vmatpush3.msra.mxu0 %v8034_v29 }
 0x110   : > { %6029 = vmatpush3.msra.mxu1 %v7964_v22  ;;  %5997 = vmatprep.subr.mxu0 %v7326_v0 }
 0x111   : > { %5979 = vmatmul.mubr.f32.gmra.mxu1 %v8151_v25  ;;  %6030 = vmatprep.subr.mxu1 %v7326_v0 }
 0x112   : > { %5998 = vmatpush3.msra.mxu0 %v8048_v7  ;;  %6031 = vmatpush3.msra.mxu1 %v7974_v26 }
 0x113   : > { %5999 = vmatprep.subr.mxu0 %v7326_v0  ;;  %6032 = vmatprep.subr.mxu1 %v7326_v0 }
 0x114   : > { %6000 = vmatpush3.msra.mxu0 %v8065_v55  ;;  %6033 = vmatpush3.msra.mxu1 %v7988_v35 }
 0x115   : > { %6001 = vmatprep.subr.mxu0 %v7326_v0  ;;  %6034 = vmatprep.subr.mxu1 %v7326_v0 }
 0x116   : > { %6002 = vmatpush3.msra.mxu0 %v8080_v5  ;;  %6035 = vmatpush3.msra.mxu1 %v7998_v46 }
 0x117   : > { %6003 = vmatprep.subr.mxu0 %v7326_v0  ;;  %6036 = vmatprep.subr.mxu1 %v7326_v0 }
 0x118   : > { %6004 = vmatpush3.msra.mxu0 %v8099_v34  ;;  %6037 = vmatpush3.msra.mxu1 %v8011_v58 }
 0x119   : > { %6005 = vmatprep.subr.mxu0 %v7326_v0  ;;  %6038 = vmatprep.subr.mxu1 %v7326_v0 }
 0x11a   : > { %6006 = vmatpush3.msra.mxu0 %v8115_v2  ;;  %6039 = vmatpush3.msra.mxu1 %v8025_v13 }
 0x11b   : > { %6007 = vmatprep.subr.mxu0 %v7326_v0  ;;  %6040 = vmatprep.subr.mxu1 %v7326_v0 }
 0x11c   : > { %6008 = vmatpush3.msra.mxu0 %v8129_v59  ;;  %6041 = vmatpush3.msra.mxu1 %v8039_v44 }
 0x11d   : > { %6009 = vmatprep.subr.mxu0 %v7326_v0  ;;  %6042 = vmatprep.subr.mxu1 %v7326_v0 }
 0x11e   : > { %6010 = vmatpush3.msra.mxu0 %v8148_v21  ;;  %6043 = vmatpush3.msra.mxu1 %v8053_v41 }
 0x11f   : > { %6011 = vmatprep.subr.mxu0 %v7326_v0  ;;  %6044 = vmatprep.subr.mxu1 %v7326_v0 }
 0x120   : > { %6012 = vmatpush3.msra.mxu0 %v8164_v38  ;;  %6013 = vmatprep.mubr.msk.f32.mxu0 %vm7327_vm0, %v7326_v0  ;;  %v1884_v38 = vld [vmem:[#allocation7 + $0x128] sm:$0xff] }
 0x121   : > { %6045 = vmatpush3.msra.mxu1 %v8075_v57  ;;  %6014 = vmatmul.mubr.f32.vlgmr.msra.gmra.mxu0 %v8105_v53  ;;  %v8483_v4 = vand.u32 4294901760, %v1884_v38 }
 0x122   : > { %6046 = vmatprep.subr.mxu1 %v7326_v0  ;;  %6063 = vmatprep.subr.mxu0 %v7326_v0 }
 0x123   : > { %6047 = vmatpush3.msra.mxu1 %v8089_v18  ;;  %6064 = vmatpush3.msra.mxu0 %v1266_v23  ;;  %v1893_v23 = vld [vmem:[#allocation7 + $0x170] sm:$0xff] }
 0x124   : > { %6048 = vmatprep.subr.mxu1 %v7326_v0  ;;  %6065 = vmatprep.subr.mxu0 %v7326_v0 }
 0x125   : > { %6016 = vmatprep.mubr.msk.f32.mxu0 %vm7327_vm0, %v7326_v0  ;;  %6049 = vmatpush3.msra.mxu1 %v8101_v43 }
 0x126   : > { %6066 = vmatpush3.msra.mxu0 %v1273_v27  ;;  %6050 = vmatprep.subr.mxu1 %v7326_v0  ;;  %v8371_v27 = vand.u32 4294901760, %v1893_v23 }
 0x127   : > { %6017 = vmatmul.mubr.f32.gmra.mxu0 %v8144_v10  ;;  %6067 = vmatprep.subr.mxu0 %v7326_v0 }
 0x128   : > { %6051 = vmatpush3.msra.mxu1 %v8124_v42  ;;  %6068 = vmatpush3.msra.mxu0 %v1280_v40  ;;  %v1891_v40 = vld [vmem:[#allocation7 + $0x160] sm:$0xff]  ;;  %v8390_v56 = vsub.f32 %v1893_v23, %v8371_v27 }
 0x129   : > { %6052 = vmatprep.subr.mxu1 %v7326_v0  ;;  %6069 = vmatprep.subr.mxu0 %v7326_v0 }
 0x12a   : > { %6019 = vmatprep.mubr.msk.f32.mxu0 %vm7327_vm0, %v7326_v0  ;;  %6053 = vmatpush3.msra.mxu1 %v8137_v14 }
 0x12b   : > { %6054 = vmatprep.mubr.msk.f32.mxu1 %vm7327_vm0, %v7326_v0  ;;  %6070 = vmatpush3.msra.mxu0 %v1287_v61 }
 0x12c   : > { %6020 = vmatmul.mubr.f32.gmra.mxu0 %v8176_v50  ;;  %6055 = vmatmul.mubr.f32.vlgmr.msra.gmra.mxu1 %v1235_v63 }
 0x12d   : > { %6071 = vmatprep.subr.mxu0 %v7326_v0  ;;  %6104 = vmatprep.subr.mxu1 %v7326_v0 }
 0x12e   : > { %6072 = vmatpush3.msra.mxu0 %v1294_v32  ;;  %6105 = vmatpush3.msra.mxu1 %v7932_v6  ;;  %v10078_v6 = vand.u32 4294901760, %v8065_v55  ;;  %v1889_v32 = vld [vmem:[#allocation7 + $0x150] sm:$0xff] }
 0x12f   : > { %6073 = vmatprep.subr.mxu0 %v7326_v0  ;;  %6106 = vmatprep.subr.mxu1 %v7326_v0 }
 0x130   : > { %6057 = vmatprep.mubr.msk.f32.mxu1 %vm7327_vm0, %v7326_v0  ;;  %6074 = vmatpush3.msra.mxu0 %v1301_v52  ;;  %v1888_v52 = vld [vmem:[#allocation7 + $0x148] sm:$0xff] }
 0x131   : > { %6107 = vmatpush3.msra.mxu1 %v7941_v15  ;;  %6075 = vmatprep.subr.mxu0 %v7326_v0  ;;  %v10079_v15 = vand.u32 4294901760, %v8080_v5 }
 0x132   : > { %6058 = vmatmul.mubr.f32.gmra.mxu1 %v1245_v9  ;;  %6108 = vmatprep.subr.mxu1 %v7326_v0  ;;  %v1885_v9 = vld [vmem:[#allocation7 + $0x130] sm:$0xff] }
 0x133   : > { %6076 = vmatpush3.msra.mxu0 %v1308_v31  ;;  %6109 = vmatpush3.msra.mxu1 %v7951_v17  ;;  %v10080_v17 = vand.u32 4294901760, %v8099_v34  ;;  %v8418_v31 = vand.u32 4294901760, %v1889_v32  ;;  %v8469_v60 = vand.u32 4294901760, %v1885_v9 }
 0x134   : > { %6077 = vmatprep.subr.mxu0 %v7326_v0  ;;  %6110 = vmatprep.subr.mxu1 %v7326_v0 }
 0x135   : > { %6060 = vmatprep.mubr.msk.f32.mxu1 %vm7327_vm0, %v7326_v0  ;;  %6078 = vmatpush3.msra.mxu0 %v1315_v3  ;;  %v8440_v62 = vsub.f32 %v1889_v32, %v8418_v31 }
 0x136   : > { %6111 = vmatpush3.msra.mxu1 %v7964_v22  ;;  %6079 = vmatprep.subr.mxu0 %v7326_v0  ;;  %v8362_v22 = vand.u32 4294901760, %v1894_v16 }
 0x137   : > { %6061 = vmatmul.mubr.f32.gmra.mxu1 %v1255_v1  ;;  %6112 = vmatprep.subr.mxu1 %v7326_v0 }
 0x138   : > { %6080 = vmatpush3.msra.mxu0 %v1322_v11  ;;  %6113 = vmatpush3.msra.mxu1 %v7974_v26  ;;  %v1892_v26 = vld [vmem:[#allocation7 + $0x168] sm:$0xff]  ;;  %v8428_v11 = vand.u32 4294901760, %v1888_v52 }
 0x139   : > { %6081 = vmatprep.subr.mxu0 %v7326_v0  ;;  %6114 = vmatprep.subr.mxu1 %v7326_v0  ;;  %v8381_v45 = vand.u32 4294901760, %v1892_v26 }
 0x13a   : > { %6082 = vmatpush3.msra.mxu0 %v10078_v6  ;;  %6115 = vmatpush3.msra.mxu1 %v7988_v35  ;;  %v8377_v35 = vsub.f32 %v1894_v16, %v8362_v22  ;;  %v8454_v63 = vsub.f32 %v1888_v52, %v8428_v11  ;;  %v8490_v6 = vsub.f32 %v1885_v9, %v8469_v60  ;;  %v8495_v16 = vand.u32 4294901760, %v1883_v47 }
 0x13b   : > { %6083 = vmatprep.subr.mxu0 %v7326_v0  ;;  %6116 = vmatprep.subr.mxu1 %v7326_v0  ;;  %v8400_v8 = vsub.f32 %v1892_v26, %v8381_v45 }
 0x13c   : > { %6084 = vmatpush3.msra.mxu0 %v10079_v15  ;;  %6117 = vmatpush3.msra.mxu1 %v7998_v46  ;;  %v1890_v46 = vld [vmem:[#allocation7 + $0x158] sm:$0xff]  ;;  %v2018_v61 = vand.u32 4294901760, %v8377_v35  ;;  %v2060_v33 = vand.u32 4294901760, %v8454_v63  ;;  %v8518_v52 = vsub.f32 %v1883_v47, %v8495_v16 }
 0x13d   : > { %6085 = vmatprep.subr.mxu0 %v7326_v0  ;;  %6118 = vmatprep.subr.mxu1 %v7326_v0  ;;  %v2032_v3 = vand.u32 4294901760, %v8400_v8 }
 0x13e   : > { %6086 = vmatpush3.msra.mxu0 %v10080_v17  ;;  %6119 = vmatpush3.msra.mxu1 %v8011_v58  ;;  %v8392_v58 = vand.u32 4294901760, %v1891_v40 }
 0x13f   : > { %6087 = vmatprep.subr.mxu0 %v7326_v0  ;;  %6120 = vmatprep.subr.mxu1 %v7326_v0 }
 0x140   : > { %6088 = vmatpush3.msra.mxu0 %v10081_v20  ;;  %6121 = vmatpush3.msra.mxu1 %v8025_v13  ;;  %v8402_v13 = vand.u32 4294901760, %v1890_v46  ;;  %v8410_v29 = vsub.f32 %v1891_v40, %v8392_v58  ;;  %v1882_v20 = vld [vmem:[#allocation7 + $0x118] sm:$0xff]  ;;  %v8509_v40 = vand.u32 4294901760, %v8060_v39 }
 0x141   : > { %6089 = vmatprep.subr.mxu0 %v7326_v0  ;;  %6122 = vmatprep.subr.mxu1 %v7326_v0 }
 0x142   : > { %6090 = vmatpush3.msra.mxu0 %v10082_v24  ;;  %6123 = vmatpush3.msra.mxu1 %v8039_v44  ;;  %v2025_v44 = vand.u32 4294901760, %v8390_v56  ;;  %v8423_v55 = vsub.f32 %v1890_v46, %v8402_v13  ;;  %v2039_v34 = vand.u32 4294901760, %v8410_v29  ;;  %v2061_v24 = vsub.f32 %v8454_v63, %v2060_v33 }
 0x143   : > { %6091 = vmatprep.subr.mxu0 %v7326_v0  ;;  %6124 = vmatprep.subr.mxu1 %v7326_v0  ;;  %v8514_v46 = vand.u32 4294901760, %v1882_v20  ;;  %v8535_v9 = vsub.f32 %v8060_v39, %v8509_v40 }
 0x144   : > { %6092 = vmatpush3.msra.mxu0 %v10083_v30  ;;  %6125 = vmatpush3.msra.mxu1 %v8053_v41  ;;  %v2019_v41 = vsub.f32 %v8377_v35, %v2018_v61  ;;  %v2046_v59 = vand.u32 4294901760, %v8423_v55  ;;  %v2040_v37 = vsub.f32 %v8410_v29, %v2039_v34  ;;  %v1881_v30 = vld [vmem:[#allocation7 + $0x110] sm:$0xff] }
 0x145   : > { %6093 = vmatprep.subr.mxu0 %v7326_v0  ;;  %6126 = vmatprep.subr.mxu1 %v7326_v0 }
 0x146   : > { %6094 = vmatpush3.msra.mxu0 %v1371_v12  ;;  %6095 = vmatprep.mubr.msk.f32.mxu0 %vm7327_vm0, %v7326_v0  ;;  %v2020_v53 = vand.u32 4294901760, %v2019_v41  ;;  %v2053_v12 = vand.u32 4294901760, %v8440_v62  ;;  %v2047_v1 = vsub.f32 %v8423_v55, %v2046_v59  ;;  %v2041_v28 = vand.u32 4294901760, %v2040_v37 }
 0x147   : > { %6127 = vmatpush3.msra.mxu1 %v8075_v57  ;;  %6096 = vmatmul.mubr.f32.vlgmr.msra.gmra.mxu0 %v8072_v19  ;;  %v1887_v57 = vld [vmem:[#allocation7 + $0x140] sm:$0xff]  ;;  %v10016_v41 = vand.u32 4294901760, %v8490_v6 }
 0x148   : > { %6128 = vmatprep.subr.mxu1 %v7326_v0  ;;  %6145 = vmatprep.subr.mxu0 %v7326_v0  ;;  %v8442_v2 = vand.u32 4294901760, %v1887_v57  ;;  %v2054_v15 = vsub.f32 %v8440_v62, %v2053_v12  ;;  %v2048_v23 = vand.u32 4294901760, %v2047_v1 }
 0x149   : > { %6129 = vmatpush3.msra.mxu1 %v8089_v18  ;;  %6146 = vmatpush3.msra.mxu0 %v8362_v22  ;;  %v2026_v18 = vsub.f32 %v8390_v56, %v2025_v44  ;;  %v2082_v37 = vsub.f32 %v8490_v6, %v10016_v41 }
 0x14a   : > { %6130 = vmatprep.subr.mxu1 %v7326_v0  ;;  %6147 = vmatprep.subr.mxu0 %v7326_v0  ;;  %v2055_v32 = vand.u32 4294901760, %v2054_v15 }
 0x14b   : > { %6098 = vmatprep.mubr.msk.f32.mxu0 %vm7327_vm0, %v7326_v0  ;;  %6131 = vmatpush3.msra.mxu1 %v8101_v43  ;;  %v512_v7 = vpop.f32.mrf.mxu0  ;;  %v1886_v43 = vld [vmem:[#allocation7 + $0x138] sm:$0xff]  ;;  %v2027_v21 = vand.u32 4294901760, %v2026_v18  ;;  %v2062_v18 = vand.u32 4294901760, %v2061_v24  ;;  %v2083_v24 = vand.u32 4294901760, %v2082_v37 }
 0x14c   : > { %6148 = vmatpush3.msra.mxu0 %v8371_v27  ;;  %6132 = vmatprep.subr.mxu1 %v7326_v0 }
 0x14d   : > { %6099 = vmatmul.mubr.f32.gmra.mxu0 %v8118_v48  ;;  %6149 = vmatprep.subr.mxu0 %v7326_v0  ;;  %v5687_v5 = vpop.f32.mrf.mxu0 }
 0x14e   : > { %6133 = vmatpush3.msra.mxu1 %v8124_v42  ;;  %6150 = vmatpush3.msra.mxu0 %v8381_v45  ;;  %v2033_v42 = vsub.f32 %v8400_v8, %v2032_v3  ;;  %v8526_v5 = vand.u32 4294901760, %v1881_v30 }
 0x14f   : > { %6134 = vmatprep.subr.mxu1 %v7326_v0  ;;  %6151 = vmatprep.subr.mxu0 %v7326_v0 }
 0x150   : > { %6101 = vmatprep.mubr.msk.f32.mxu0 %vm7327_vm0, %v7326_v0  ;;  %6135 = vmatpush3.msra.mxu1 %v8137_v14  ;;  %v8456_v14 = vand.u32 4294901760, %v1886_v43  ;;  %v2034_v54 = vand.u32 4294901760, %v2033_v42  ;;  %v1879_v42 = vld [vmem:[#allocation7 + $0x100] sm:$0xff] }
 0x151   : > { %6136 = vmatprep.mubr.msk.f32.mxu1 %vm7327_vm0, %v7326_v0  ;;  %6152 = vmatpush3.msra.mxu0 %v8392_v58 }
 0x152   : > { %6102 = vmatmul.mubr.f32.gmra.mxu0 %v8151_v25  ;;  %6137 = vmatmul.mubr.f32.vlgmr.msra.gmra.mxu1 %v8072_v19  ;;  %v683_v10 = vpop.f32.mrf.mxu1  ;;  %v8467_v19 = vsub.f32 %v1887_v57, %v8442_v2  ;;  %v8481_v36 = vsub.f32 %v1886_v43, %v8456_v14  ;;  %v1880_v57 = vld [vmem:[#allocation7 + $0x108] sm:$0xff] }
 0x153   : > { %6153 = vmatprep.subr.mxu0 %v7326_v0  ;;  %6186 = vmatprep.subr.mxu1 %v7326_v0  ;;  %v8463_v50 = vadd.f32 %v683_v10, %v512_v7  ;;  %v8542_v10 = vand.u32 4294901760, %v1880_v57 }
 0x154   : > { %6154 = vmatpush3.msra.mxu0 %v8402_v13  ;;  %6187 = vmatpush3.msra.mxu1 %v2020_v53  ;;  %v5728_v49 = vpop.f32.mrf.mxu1  ;;  %v2067_v17 = vand.u32 4294901760, %v8467_v19  ;;  %v2074_v26 = vand.u32 4294901760, %v8481_v36 }
 0x155   : > { %6155 = vmatprep.subr.mxu0 %v7326_v0  ;;  %6188 = vmatprep.subr.mxu1 %v7326_v0  ;;  %v8552_v49 = vsub.f32 %v1881_v30, %v8526_v5  ;;  %v8564_v15 = vsub.f32 %v1880_v57, %v8542_v10 }
 0x156   : > { %6139 = vmatprep.mubr.msk.f32.mxu1 %vm7327_vm0, %v7326_v0  ;;  %6156 = vmatpush3.msra.mxu0 %v8418_v31  ;;  %v2068_v7 = vsub.f32 %v8467_v19, %v2067_v17  ;;  %v2075_v43 = vsub.f32 %v8481_v36, %v2074_v26 }
 0x157   : > { %6189 = vmatpush3.msra.mxu1 %v2027_v21  ;;  %6157 = vmatprep.subr.mxu0 %v7326_v0 }
 0x158   : > { %6140 = vmatmul.mubr.f32.gmra.mxu1 %v8118_v48  ;;  %6190 = vmatprep.subr.mxu1 %v7326_v0  ;;  %v8502_v48 = vsub.f32 %v1884_v38, %v8483_v4  ;;  %v2069_v21 = vand.u32 4294901760, %v2068_v7  ;;  %v10013_v38 = vand.u32 4294901760, %v8518_v52  ;;  %v2076_v1 = vand.u32 4294901760, %v2075_v43 }
 0x159   : > { %6158 = vmatpush3.msra.mxu0 %v8428_v11  ;;  %6191 = vmatpush3.msra.mxu1 %v2034_v54  ;;  %v8554_v54 = vand.u32 4294901760, %v1879_v42  ;;  %v10014_v7 = vand.u32 4294901760, %v8552_v49 }
 0x15a   : > { %6159 = vmatprep.subr.mxu0 %v7326_v0  ;;  %6192 = vmatprep.subr.mxu1 %v7326_v0  ;;  %v10015_v53 = vand.u32 4294901760, %v8502_v48  ;;  %v2096_v30 = vsub.f32 %v8518_v52, %v10013_v38 }
 0x15b   : > { %6142 = vmatprep.mubr.msk.f32.mxu1 %vm7327_vm0, %v7326_v0  ;;  %6160 = vmatpush3.msra.mxu0 %v8442_v2 }
 0x15c   : > { %6193 = vmatpush3.msra.mxu1 %v2041_v28  ;;  %6161 = vmatprep.subr.mxu0 %v7326_v0  ;;  %v2089_v47 = vsub.f32 %v8502_v48, %v10015_v53  ;;  %v1987_v28 = vand.u32 4294901760, %v8535_v9  ;;  %v2097_v37 = vand.u32 4294901760, %v2096_v30 }
 0x15d   : > { %6143 = vmatmul.mubr.f32.gmra.mxu1 %v8151_v25  ;;  %6194 = vmatprep.subr.mxu1 %v7326_v0  ;;  %v8540_v25 = vsub.f32 %v1882_v20, %v8514_v46 }
 0x15e   : > { %6162 = vmatpush3.msra.mxu0 %v8456_v14  ;;  %6195 = vmatpush3.msra.mxu1 %v2048_v23  ;;  %v1988_v43 = vsub.f32 %v8535_v9, %v1987_v28 }
 0x15f   : > { %6163 = vmatprep.subr.mxu0 %v7326_v0  ;;  %6196 = vmatprep.subr.mxu1 %v7326_v0  ;;  %v10012_v20 = vand.u32 4294901760, %v8540_v25 }
 0x160   : > { %6164 = vmatpush3.msra.mxu0 %v8469_v60  ;;  %6197 = vmatpush3.msra.mxu1 %v2055_v32  ;;  %v8574_v32 = vsub.f32 %v1879_v42, %v8554_v54 }
 0x161   : > { %6165 = vmatprep.subr.mxu0 %v7326_v0  ;;  %6198 = vmatprep.subr.mxu1 %v7326_v0  ;;  %v2103_v42 = vsub.f32 %v8540_v25, %v10012_v20  ;;  %v1989_v20 = vand.u32 4294901760, %v1988_v43 }
 0x162   : > { %6166 = vmatpush3.msra.mxu0 %v8483_v4  ;;  %6199 = vmatpush3.msra.mxu1 %v2062_v18  ;;  %v2090_v18 = vand.u32 4294901760, %v2089_v47  ;;  %v2110_v47 = vsub.f32 %v8552_v49, %v10014_v7  ;;  %v7116_v7 = vld [vmem:[%s7524_s14] sm:$0xff] }
 0x163   : > { %6167 = vmatprep.subr.mxu0 %v7326_v0  ;;  %6200 = vmatprep.subr.mxu1 %v7326_v0  ;;  %v522_v23 = vpop.f32.mrf.mxu0  ;;  %v1899_v53 = vrot.slane %v7116_v7, 2 }
 0x164   : > { %6168 = vmatpush3.msra.mxu0 %v8495_v16  ;;  %6201 = vmatpush3.msra.mxu1 %v2069_v21  ;;  %v10017_v21 = vand.u32 4294901760, %v8564_v15 }
 0x165   : > { %6169 = vmatprep.subr.mxu0 %v7326_v0  ;;  %6202 = vmatprep.subr.mxu1 %v7326_v0  ;;  %v5690_v57 = vpop.f32.mrf.mxu0 }
 0x166   : > { %6170 = vmatpush3.msra.mxu0 %v8514_v46  ;;  %6203 = vmatpush3.msra.mxu1 %v2076_v1  ;;  %v10018_v57 = vand.u32 4294901760, %v8574_v32  ;;  %v2117_v30 = vsub.f32 %v8564_v15, %v10017_v21 }
 0x167   : > { %6171 = vmatprep.subr.mxu0 %v7326_v0  ;;  %6204 = vmatprep.subr.mxu1 %v7326_v0 }
 0x168   : > { %6172 = vmatpush3.msra.mxu0 %v8526_v5  ;;  %6205 = vmatpush3.msra.mxu1 %v2083_v24  ;;  %v532_v1 = vpop.f32.mrf.mxu0  ;;  %v2104_v24 = vand.u32 4294901760, %v2103_v42  ;;  %v2118_v7 = vand.u32 4294901760, %v2117_v30 }
 0x169   : > { %6173 = vmatprep.subr.mxu0 %v7326_v0  ;;  %6206 = vmatprep.subr.mxu1 %v7326_v0 }
 0x16a   : > { %6174 = vmatpush3.msra.mxu0 %v8542_v10  ;;  %6207 = vmatpush3.msra.mxu1 %v2090_v18  ;;  %v5693_v38 = vpop.f32.mrf.mxu0  ;;  %v2124_v18 = vsub.f32 %v8574_v32, %v10018_v57 }
 0x16b   : > { %6175 = vmatprep.subr.mxu0 %v7326_v0  ;;  %6208 = vmatprep.subr.mxu1 %v7326_v0  ;;  %v2111_v38 = vand.u32 4294901760, %v2110_v47  ;;  %v10084_v47 = vrot.slane %v7633_v51, 2 }
 0x16c   : > { %6176 = vmatpush3.msra.mxu0 %v8554_v54  ;;  %6209 = vmatpush3.msra.mxu1 %v2097_v37  ;;  %v689_v41 = vpop.f32.mrf.mxu1 }
 0x16d   : > { %6177 = vmatprep.mubr.msk.f32.mxu0 %vm7327_vm0, %v7326_v0  ;;  %6210 = vmatprep.subr.mxu1 %v7326_v0  ;;  %v690_v43 = vadd.f32 %v689_v41, %v522_v23  ;;  %v8616_v57 = vsel %vm1895_vm2, %v10084_v47, %v1899_v53 }
 0x16e   : > { %6227 = vmatprep.subr.mxu0 %v7326_v0  ;;  %6178 = vmatmul.mubr.f32.vlgmr.msra.gmra.mxu0 %v1989_v20  ;;  %v799_v42 = vpop.f32.mrf.mxu0  ;;  %v5731_v21 = vpop.f32.mrf.mxu1  ;;  %10085 = vst [vmem:[#allocation23_spill] sm:$0xff] %v8616_v57  ;;  %v2125_v20 = vand.u32 4294901760, %v2124_v18  ;;  %v8639_v18 = vand.u32 4294901760, %v1899_v53 }
 0x16f   : > { %6211 = vmatpush3.msra.mxu1 %v2104_v24  ;;  %6228 = vmatpush3.msra.mxu0 %v8377_v35  ;;  %v800_v37 = vadd.f32 %v799_v42, %v8463_v50  ;;  %v8623_v50 = vand.u32 4294901760, %v8616_v57 }
 0x170   : > { %6212 = vmatprep.subr.mxu1 %v7326_v0  ;;  %6229 = vmatprep.subr.mxu0 %v7326_v0  ;;  %v5769_v41 = vpop.f32.mrf.mxu0 }
 0x171   : > { %6213 = vmatpush3.msra.mxu1 %v2111_v38  ;;  %6230 = vmatpush3.msra.mxu0 %v8390_v56 }
 0x172   : > { %6214 = vmatprep.subr.mxu1 %v7326_v0  ;;  %6231 = vmatprep.subr.mxu0 %v7326_v0  ;;  %v695_v23 = vpop.f32.mrf.mxu1 }
 0x173   : > { %6215 = vmatpush3.msra.mxu1 %v2118_v7  ;;  %6232 = vmatpush3.msra.mxu0 %v8400_v8  ;;  %v696_v51 = vadd.f32 %v695_v23, %v532_v1  ;;  %v8635_v1 = vsub.f32 %v8616_v57, %v8623_v50 }
 0x174   : > { %6216 = vmatprep.subr.mxu1 %v7326_v0  ;;  %6233 = vmatprep.subr.mxu0 %v7326_v0  ;;  %v5734_v21 = vpop.f32.mrf.mxu1 }
 0x175   : > { %6217 = vmatpush3.msra.mxu1 %v2125_v20  ;;  %6218 = vmatprep.mubr.msk.f32.mxu1 %vm7327_vm0, %v7326_v0  ;;  %v806_v24 = vpop.f32.mrf.mxu0  ;;  %v1997_v7 = vand.u32 4294901760, %v8635_v1  ;;  %v8653_v20 = vsub.f32 %v1899_v53, %v8639_v18 }
 0x176   : > { %6234 = vmatpush3.msra.mxu0 %v8410_v29  ;;  %6219 = vmatmul.mubr.f32.vlgmr.msra.gmra.mxu1 %v8509_v40  ;;  %v807_v30 = vadd.f32 %v806_v24, %v690_v43 }
 0x177   : > { %6235 = vmatprep.subr.mxu0 %v7326_v0  ;;  %6268 = vmatprep.subr.mxu1 %v7326_v0  ;;  %v5772_v38 = vpop.f32.mrf.mxu0  ;;  %v2007_v53 = vand.u32 4294901760, %v8653_v20 }
 0x178   : > { %6236 = vmatpush3.msra.mxu0 %v8423_v55  ;;  %6269 = vmatpush3.msra.mxu1 %v8362_v22 }
 0x179   : > { %6237 = vmatprep.subr.mxu0 %v7326_v0  ;;  %6270 = vmatprep.subr.mxu1 %v7326_v0 }
 0x17a   : > { %6238 = vmatpush3.msra.mxu0 %v8440_v62  ;;  %6271 = vmatpush3.msra.mxu1 %v8371_v27  ;;  %v813_v43 = vpop.f32.mrf.mxu0  ;;  %v902_v42 = vpop.f32.mrf.mxu1 }
 0x17b   : > { %6239 = vmatprep.subr.mxu0 %v7326_v0  ;;  %6272 = vmatprep.subr.mxu1 %v7326_v0  ;;  %v814_v47 = vadd.f32 %v813_v43, %v696_v51  ;;  %v8648_v41 = vadd.f32 %v902_v42, %v800_v37  ;;  %v1998_v37 = vsub.f32 %v8635_v1, %v1997_v7 }
 0x17c   : > { %6240 = vmatpush3.msra.mxu0 %v8454_v63  ;;  %6273 = vmatpush3.msra.mxu1 %v8381_v45  ;;  %v5810_v23 = vpop.f32.mrf.mxu1  ;;  %v5775_v21 = vpop.f32.mrf.mxu0  ;;  %v2008_v42 = vsub.f32 %v8653_v20, %v2007_v53 }
 0x17d   : > { %6241 = vmatprep.subr.mxu0 %v7326_v0  ;;  %6274 = vmatprep.subr.mxu1 %v7326_v0  ;;  %v1999_v43 = vand.u32 4294901760, %v1998_v37 }
 0x17e   : > { %6242 = vmatpush3.msra.mxu0 %v8467_v19  ;;  %6275 = vmatpush3.msra.mxu1 %v8392_v58  ;;  %v2009_v37 = vand.u32 4294901760, %v2008_v42  ;;  %v10087_v19 = vand.u32 4294901760, %v8502_v48 }
 0x17f   : > { %6243 = vmatprep.subr.mxu0 %v7326_v0  ;;  %6276 = vmatprep.subr.mxu1 %v7326_v0 }
 0x180   : > { %6244 = vmatpush3.msra.mxu0 %v8481_v36  ;;  %6277 = vmatpush3.msra.mxu1 %v8402_v13  ;;  %v910_v51 = vpop.f32.mrf.mxu1 }
 0x181   : > { %6245 = vmatprep.subr.mxu0 %v7326_v0  ;;  %6278 = vmatprep.subr.mxu1 %v7326_v0  ;;  %v8669_v24 = vadd.f32 %v910_v51, %v807_v30 }
 0x182   : > { %6246 = vmatpush3.msra.mxu0 %v8490_v6  ;;  %6279 = vmatpush3.msra.mxu1 %v8418_v31  ;;  %v5813_v38 = vpop.f32.mrf.mxu1 }
 0x183   : > { %6247 = vmatprep.subr.mxu0 %v7326_v0  ;;  %6280 = vmatprep.subr.mxu1 %v7326_v0 }
 0x184   : > { %6248 = vmatpush3.msra.mxu0 %v8502_v48  ;;  %6281 = vmatpush3.msra.mxu1 %v8428_v11 }
 0x185   : > { %6249 = vmatprep.subr.mxu0 %v7326_v0  ;;  %6282 = vmatprep.subr.mxu1 %v7326_v0  ;;  %v918_v30 = vpop.f32.mrf.mxu1 }
 0x186   : > { %6180 = vmatprep.mubr.msk.f32.mxu0 %vm7327_vm0, %v7326_v0  ;;  %6250 = vmatpush3.msra.mxu0 %v8518_v52  ;;  %v8685_v23 = vadd.f32 %v918_v30, %v814_v47 }
 0x187   : > { %6283 = vmatpush3.msra.mxu1 %v8442_v2  ;;  %6181 = vmatmul.mubr.f32.gmra.mxu0 %v1999_v43  ;;  %v5816_v21 = vpop.f32.mrf.mxu1 }
 0x188   : > { %6251 = vmatprep.subr.mxu0 %v7326_v0  ;;  %6284 = vmatprep.subr.mxu1 %v7326_v0 }
 0x189   : > { %6252 = vmatpush3.msra.mxu0 %v8540_v25  ;;  %6285 = vmatpush3.msra.mxu1 %v8456_v14 }
 0x18a   : > { %6253 = vmatprep.subr.mxu0 %v7326_v0  ;;  %6286 = vmatprep.subr.mxu1 %v7326_v0 }
 0x18b   : > { %6183 = vmatprep.mubr.msk.f32.mxu0 %vm7327_vm0, %v7326_v0  ;;  %6254 = vmatpush3.msra.mxu0 %v8552_v49 }
 0x18c   : > { %6287 = vmatpush3.msra.mxu1 %v8469_v60  ;;  %6184 = vmatmul.mubr.f32.gmra.mxu0 %v2009_v37 }
 0x18d   : > { %6255 = vmatprep.subr.mxu0 %v7326_v0  ;;  %6288 = vmatprep.subr.mxu1 %v7326_v0 }
 0x18e   : > { %6256 = vmatpush3.msra.mxu0 %v8564_v15  ;;  %6289 = vmatpush3.msra.mxu1 %v8483_v4 }
 0x18f   : > { %6221 = vmatprep.mubr.msk.f32.mxu1 %vm7327_vm0, %v7326_v0  ;;  %6257 = vmatprep.subr.mxu0 %v7326_v0 }
 0x190   : > { %6290 = vmatprep.subr.mxu1 %v7326_v0  ;;  %6222 = vmatmul.mubr.f32.gmra.mxu1 %v8623_v50 }
 0x191   : > { %6258 = vmatpush3.msra.mxu0 %v8574_v32  ;;  %6259 = vmatprep.mubr.msk.f32.mxu0 %vm7327_vm0, %v7326_v0 }
 0x192   : > { %6291 = vmatpush3.msra.mxu1 %v8495_v16  ;;  %6260 = vmatmul.mubr.f32.vlgmr.msra.gmra.mxu0 %v8535_v9 }
 0x193   : > { %6292 = vmatprep.subr.mxu1 %v7326_v0  ;;  %6309 = vmatprep.subr.mxu0 %v7326_v0 }
 0x194   : > { %6293 = vmatpush3.msra.mxu1 %v8514_v46  ;;  %6310 = vmatpush3.msra.mxu0 %v2018_v61 }
 0x195   : > { %6224 = vmatprep.mubr.msk.f32.mxu1 %vm7327_vm0, %v7326_v0  ;;  %6294 = vmatprep.subr.mxu1 %v7326_v0  ;;  %v1037_v47 = vpop.f32.mrf.mxu0 }
 0x196   : > { %6311 = vmatprep.subr.mxu0 %v7326_v0  ;;  %6225 = vmatmul.mubr.f32.gmra.mxu1 %v8639_v18  ;;  %v1038_v51 = vadd.f32 %v1037_v47, %v8648_v41  ;;  %v2706_v47 = vld [vmem:[#allocation8 + $0xe8] sm:$0xff] }
 0x197   : > { %6262 = vmatprep.mubr.msk.f32.mxu0 %vm7327_vm0, %v7326_v0  ;;  %6295 = vmatpush3.msra.mxu1 %v8526_v5  ;;  %v5851_v38 = vpop.f32.mrf.mxu0 }
 0x198   : > { %6312 = vmatpush3.msra.mxu0 %v2025_v44  ;;  %6296 = vmatprep.subr.mxu1 %v7326_v0 }
 0x199   : > { %6263 = vmatmul.mubr.f32.gmra.mxu0 %v8635_v1  ;;  %6313 = vmatprep.subr.mxu0 %v7326_v0 }
 0x19a   : > { %6297 = vmatpush3.msra.mxu1 %v8542_v10  ;;  %6314 = vmatpush3.msra.mxu0 %v2032_v3 }
 0x19b   : > { %6298 = vmatprep.subr.mxu1 %v7326_v0  ;;  %6315 = vmatprep.subr.mxu0 %v7326_v0  ;;  %v1043_v35 = vpop.f32.mrf.mxu0 }
 0x19c   : > { %6265 = vmatprep.mubr.msk.f32.mxu0 %vm7327_vm0, %v7326_v0  ;;  %6299 = vmatpush3.msra.mxu1 %v8554_v54  ;;  %v1044_v56 = vadd.f32 %v1043_v35, %v8669_v24  ;;  %v8864_v35 = vand.u32 4294901760, %v2706_v47 }
 0x19d   : > { %6300 = vmatprep.mubr.msk.f32.mxu1 %vm7327_vm0, %v7326_v0  ;;  %6316 = vmatpush3.msra.mxu0 %v2039_v34  ;;  %v5854_v61 = vpop.f32.mrf.mxu0 }
 0x19e   : > { %6266 = vmatmul.mubr.f32.gmra.mxu0 %v8653_v20  ;;  %6301 = vmatmul.mubr.f32.vlgmr.msra.gmra.mxu1 %v1987_v28 }
 0x19f   : > { %6317 = vmatprep.subr.mxu0 %v7326_v0  ;;  %6350 = vmatprep.subr.mxu1 %v7326_v0 }
 0x1a0   : > { %6318 = vmatpush3.msra.mxu0 %v2046_v59  ;;  %6351 = vmatpush3.msra.mxu1 %v8362_v22  ;;  %v1049_v8 = vpop.f32.mrf.mxu0  ;;  %v1136_v44 = vpop.f32.mrf.mxu1 }
 0x1a1   : > { %6319 = vmatprep.subr.mxu0 %v7326_v0  ;;  %6352 = vmatprep.subr.mxu1 %v7326_v0  ;;  %v1050_v29 = vadd.f32 %v1049_v8, %v8685_v23  ;;  %v8755_v3 = vadd.f32 %v1136_v44, %v1038_v51  ;;  %v2707_v23 = vld [vmem:[#allocation8 + $0xf0] sm:$0xff]  ;;  %v2705_v8 = vld [vmem:[#allocation8 + $0xe0] sm:$0xff] }
 0x1a2   : > { %6303 = vmatprep.mubr.msk.f32.mxu1 %vm7327_vm0, %v7326_v0  ;;  %6320 = vmatpush3.msra.mxu0 %v2053_v12  ;;  %v5892_v55 = vpop.f32.mrf.mxu1  ;;  %v5857_v34 = vpop.f32.mrf.mxu0  ;;  %v8857_v21 = vand.u32 4294901760, %v2707_v23 }
 0x1a3   : > { %6353 = vmatpush3.msra.mxu1 %v8371_v27  ;;  %6321 = vmatprep.subr.mxu0 %v7326_v0  ;;  %v8876_v55 = vand.u32 4294901760, %v2705_v8  ;;  %v2704_v34 = vld [vmem:[#allocation8 + $0xd8] sm:$0xff] }
 0x1a4   : > { %6304 = vmatmul.mubr.f32.gmra.mxu1 %v1997_v7  ;;  %6354 = vmatprep.subr.mxu1 %v7326_v0  ;;  %v2708_v7 = vld [vmem:[#allocation8 + $0xf8] sm:$0xff]  ;;  %v8862_v38 = vsub.f32 %v2707_v23, %v8857_v21  ;;  %v2697_v23 = vld [vmem:[#allocation8 + $0xa0] sm:$0xff] }
 0x1a5   : > { %6322 = vmatpush3.msra.mxu0 %v2060_v33  ;;  %6355 = vmatpush3.msra.mxu1 %v8381_v45 }
 0x1a6   : > { %6323 = vmatprep.subr.mxu0 %v7326_v0  ;;  %6356 = vmatprep.subr.mxu1 %v7326_v0  ;;  %v1142_v22 = vpop.f32.mrf.mxu1 }
 0x1a7   : > { %6306 = vmatprep.mubr.msk.f32.mxu1 %vm7327_vm0, %v7326_v0  ;;  %6324 = vmatpush3.msra.mxu0 %v2067_v17  ;;  %v1143_v27 = vadd.f32 %v1142_v22, %v1044_v56 }
 0x1a8   : > { %6357 = vmatpush3.msra.mxu1 %v8392_v58  ;;  %6325 = vmatprep.subr.mxu0 %v7326_v0  ;;  %v5895_v62 = vpop.f32.mrf.mxu1  ;;  %v10086_v58 = vand.u32 4294901760, %v8490_v6 }
 0x1a9   : > { %6307 = vmatmul.mubr.f32.gmra.mxu1 %v2007_v53  ;;  %6358 = vmatprep.subr.mxu1 %v7326_v0  ;;  %v8886_v62 = vsub.f32 %v2705_v8, %v8876_v55  ;;  %v8974_v8 = vand.u32 4294901760, %v2697_v23 }
 0x1aa   : > { %6326 = vmatpush3.msra.mxu0 %v2074_v26  ;;  %6359 = vmatpush3.msra.mxu1 %v8402_v13  ;;  %v10088_v13 = vand.u32 4294901760, %v8518_v52 }
 0x1ab   : > { %6327 = vmatprep.subr.mxu0 %v7326_v0  ;;  %6360 = vmatprep.subr.mxu1 %v7326_v0  ;;  %v1148_v45 = vpop.f32.mrf.mxu1 }
 0x1ac   : > { %6328 = vmatpush3.msra.mxu0 %v10086_v58  ;;  %6361 = vmatpush3.msra.mxu1 %v8418_v31  ;;  %v1149_v59 = vadd.f32 %v1148_v45, %v1050_v29  ;;  %v10089_v31 = vand.u32 4294901760, %v8540_v25  ;;  %v8871_v29 = vand.u32 4294901760, %v8862_v38  ;;  %v8888_v45 = vand.u32 4294901760, %v2704_v34 }
 0x1ad   : > { %6329 = vmatprep.subr.mxu0 %v7326_v0  ;;  %6362 = vmatprep.subr.mxu1 %v7326_v0  ;;  %v5898_v63 = vpop.f32.mrf.mxu1 }
 0x1ae   : > { %6330 = vmatpush3.msra.mxu0 %v10087_v19  ;;  %6363 = vmatpush3.msra.mxu1 %v8428_v11  ;;  %v10090_v11 = vand.u32 4294901760, %v8552_v49  ;;  %10094 = vst [vmem:[#allocation25_spill] sm:$0xff] %v8871_v29  ;;  %v2831_v22 = vsub.f32 %v8862_v38, %v8871_v29 }
 0x1af   : > { %6331 = vmatprep.subr.mxu0 %v7326_v0  ;;  %6364 = vmatprep.subr.mxu1 %v7326_v0 }
 0x1b0   : > { %6332 = vmatpush3.msra.mxu0 %v10088_v13  ;;  %6365 = vmatpush3.msra.mxu1 %v8442_v2  ;;  %v10091_v2 = vand.u32 4294901760, %v8564_v15  ;;  %v2832_v19 = vand.u32 4294901760, %v2831_v22 }
 0x1b1   : > { %6333 = vmatprep.subr.mxu0 %v7326_v0  ;;  %6366 = vmatprep.subr.mxu1 %v7326_v0 }
 0x1b2   : > { %6334 = vmatpush3.msra.mxu0 %v10089_v31  ;;  %6367 = vmatpush3.msra.mxu1 %v8456_v14  ;;  %v10092_v14 = vand.u32 4294901760, %v8574_v32  ;;  %v8897_v31 = vand.u32 4294901760, %v8886_v62 }
 0x1b3   : > { %6335 = vmatprep.subr.mxu0 %v7326_v0  ;;  %6368 = vmatprep.subr.mxu1 %v7326_v0 }
 0x1b4   : > { %6336 = vmatpush3.msra.mxu0 %v10090_v11  ;;  %6369 = vmatpush3.msra.mxu1 %v8469_v60  ;;  %10096 = vst [vmem:[#allocation27_spill] sm:$0xff] %v8897_v31 }
 0x1b5   : > { %6337 = vmatprep.subr.mxu0 %v7326_v0  ;;  %6370 = vmatprep.subr.mxu1 %v7326_v0 }
 0x1b6   : > { %6338 = vmatpush3.msra.mxu0 %v10091_v2  ;;  %6371 = vmatpush3.msra.mxu1 %v8483_v4  ;;  %v8901_v2 = vsub.f32 %v2704_v34, %v8888_v45 }
 0x1b7   : > { %6339 = vmatprep.subr.mxu0 %v7326_v0  ;;  %6372 = vmatprep.subr.mxu1 %v7326_v0 }
 0x1b8   : > { %6340 = vmatpush3.msra.mxu0 %v10092_v14  ;;  %6341 = vmatprep.mubr.msk.f32.mxu0 %vm7327_vm0, %v7326_v0 }
 0x1b9   : > { %6373 = vmatpush3.msra.mxu1 %v8495_v16  ;;  %6342 = vmatmul.mubr.f32.vlgmr.msra.gmra.mxu0 %v8509_v40 }
 0x1ba   : > { %6374 = vmatprep.subr.mxu1 %v7326_v0  ;;  %6344 = vmatprep.mubr.msk.f32.mxu0 %vm7327_vm0, %v7326_v0 }
 0x1bb   : > { %6375 = vmatpush3.msra.mxu1 %v8514_v46  ;;  %6382 = vmatprep.mubr.msk.f32.mxu1 %vm7327_vm0, %v7326_v0  ;;  %v1239_v60 = vpop.f32.mrf.mxu0 }
 0x1bc   : > { %6376 = vmatprep.subr.mxu1 %v7326_v0  ;;  %v1240_v12 = vadd.f32 %v1239_v60, %v8755_v3  ;;  %v8874_v3 = vsub.f32 %v2706_v47, %v8864_v35  ;;  %v2702_v60 = vld [vmem:[#allocation8 + $0xc8] sm:$0xff] }
 0x1bd   : > { %6377 = vmatpush3.msra.mxu1 %v8526_v5  ;;  %6345 = vmatmul.mubr.f32.gmra.mxu0 %v8623_v50  ;;  %v5933_v36 = vpop.f32.mrf.mxu0 }
 0x1be   : > { %6378 = vmatprep.subr.mxu1 %v7326_v0  ;;  %6347 = vmatprep.mubr.msk.f32.mxu0 %vm7327_vm0, %v7326_v0  ;;  %v2845_v36 = vsub.f32 %v8886_v62, %v8897_v31 }
 0x1bf   : > { %6379 = vmatpush3.msra.mxu1 %v8542_v10 }
 0x1c0   : > { %6380 = vmatprep.subr.mxu1 %v7326_v0 }
 0x1c1   : > { %6381 = vmatpush3.msra.mxu1 %v8554_v54  ;;  %6348 = vmatmul.mubr.f32.gmra.mxu0 %v8639_v18  ;;  %v1249_v4 = vpop.f32.mrf.mxu0 }
 0x1c2   : > { %6383 = vmatmul.mubr.f32.vlgmr.msra.gmra.mxu1 %v8509_v40  ;;  %v1250_v33 = vadd.f32 %v1249_v4, %v1143_v27  ;;  %v8883_v27 = vand.u32 4294901760, %v8874_v3  ;;  %v8908_v4 = vand.u32 4294901760, %v2702_v60 }
 0x1c3   : > { %6385 = vmatprep.mubr.msk.f32.mxu1 %vm7327_vm0, %v7326_v0  ;;  %v5936_v6 = vpop.f32.mrf.mxu0 }
 0x1c4   : > { %10095 = vst [vmem:[#allocation26_spill] sm:$0xff] %v8883_v27  ;;  %v2838_v13 = vsub.f32 %v8874_v3, %v8883_v27 }
 0x1c6   : > { %6386 = vmatmul.mubr.f32.gmra.mxu1 %v8623_v50  ;;  %v1259_v16 = vpop.f32.mrf.mxu0  ;;  %v1410_v17 = vpop.f32.mrf.mxu1 }
 0x1c7   : > { %6388 = vmatprep.mubr.msk.f32.mxu1 %vm7327_vm0, %v7326_v0  ;;  %v1260_v48 = vadd.f32 %v1259_v16, %v1149_v59  ;;  %v1411_v26 = vadd.f32 %v1410_v17, %v1240_v12  ;;  %v8845_v0 = vand.u32 4294901760, %v2708_v7  ;;  %v2703_v59 = vld [vmem:[#allocation8 + $0xd0] sm:$0xff]  ;;  %v2839_v12 = vand.u32 4294901760, %v2838_v13  ;;  %v2701_v16 = vld [vmem:[#allocation8 + $0xc0] sm:$0xff] }
 0x1c8   : > { %v5974_v46 = vpop.f32.mrf.mxu1  ;;  %v5939_v52 = vpop.f32.mrf.mxu0  ;;  %v8903_v14 = vand.u32 4294901760, %v2703_v59  ;;  %v2846_v17 = vand.u32 4294901760, %v2845_v36  ;;  %v8986_v13 = vsub.f32 %v2697_v23, %v8974_v8 }
 0x1c9   : > { %6391 = vmatprep.subr.mxu0 %v8845_v0 }
 0x1ca   : > { %6389 = vmatmul.mubr.f32.gmra.mxu1 %v8639_v18  ;;  %v8850_v18 = vsub.f32 %v2708_v7, %v8845_v0  ;;  %6392 = vmatpush3.msra.mxu0 %v8845_v0  ;;  %v8914_v6 = vsub.f32 %v2703_v59, %v8903_v14  ;;  %v2698_v7 = vld [vmem:[#allocation8 + $0xa8] sm:$0xff] }
 0x1cb   : > { %6393 = vmatprep.subr.mxu0 %v8857_v21 }
 0x1cc   : > { %v1416_v5 = vpop.f32.mrf.mxu1  ;;  %v8855_v30 = vand.u32 4294901760, %v8850_v18  ;;  %6394 = vmatpush3.msra.mxu0 %v8857_v21  ;;  %v8926_v52 = vand.u32 4294901760, %v8914_v6 }
 0x1cd   : > { %v1417_v40 = vadd.f32 %v1416_v5, %v1250_v33  ;;  %6395 = vmatprep.subr.mxu0 %v8864_v35  ;;  %v8911_v33 = vand.u32 4294901760, %v8901_v2  ;;  %v2700_v5 = vld [vmem:[#allocation8 + $0xb8] sm:$0xff] }
 0x1ce   : > { %v5977_v9 = vpop.f32.mrf.mxu1  ;;  %10093 = vst [vmem:[#allocation24_spill] sm:$0xff] %v8855_v30  ;;  %v2824_v37 = vsub.f32 %v8850_v18, %v8855_v30  ;;  %6396 = vmatpush3.msra.mxu0 %v8864_v35  ;;  %10098 = vst [vmem:[#allocation29_spill] sm:$0xff] %v8926_v52 }
 0x1cf   : > { %6397 = vmatprep.subr.mxu0 %v8876_v55  ;;  %10097 = vst [vmem:[#allocation28_spill] sm:$0xff] %v8911_v33  ;;  %v2852_v46 = vsub.f32 %v8901_v2, %v8911_v33 }
 0x1d0   : > { %v2825_v61 = vand.u32 4294901760, %v2824_v37  ;;  %6398 = vmatpush3.msra.mxu0 %v8876_v55 }
 0x1d1   : > { %v1422_v25 = vpop.f32.mrf.mxu1  ;;  %6399 = vmatprep.subr.mxu0 %v8888_v45 }
 0x1d2   : > { %v1423_v10 = vadd.f32 %v1422_v25, %v1260_v48  ;;  %6426 = vmatprep.subr.mxu1 %v2825_v61  ;;  %6400 = vmatpush3.msra.mxu0 %v8888_v45  ;;  %v8918_v48 = vsub.f32 %v2702_v60, %v8908_v4  ;;  %v8935_v25 = vand.u32 4294901760, %v2700_v5 }
 0x1d3   : > { %v5980_v49 = vpop.f32.mrf.mxu1  ;;  %6427 = vmatpush3.msra.mxu1 %v2825_v61  ;;  %6401 = vmatprep.subr.mxu0 %v8903_v14 }
 0x1d4   : > { %6428 = vmatprep.subr.mxu1 %v2832_v19  ;;  %6402 = vmatpush3.msra.mxu0 %v8903_v14  ;;  %v2859_v49 = vsub.f32 %v8914_v6, %v8926_v52 }
 0x1d5   : > { %6429 = vmatpush3.msra.mxu1 %v2832_v19  ;;  %6403 = vmatprep.subr.mxu0 %v8908_v4 }
 0x1d6   : > { %6430 = vmatprep.subr.mxu1 %v2839_v12  ;;  %6404 = vmatpush3.msra.mxu0 %v8908_v4 }
 0x1d7   : > { %6431 = vmatpush3.msra.mxu1 %v2839_v12 }
 0x1d8   : > { %6432 = vmatprep.subr.mxu1 %v2846_v17 }
 0x1d9   : > { %6433 = vmatpush3.msra.mxu1 %v2846_v17 }
 0x1e1   : > { %v1526_v54 = vpop.f32.mrf.mxu0 }
 0x1e2   : > { %v1527_v28 = vadd.f32 %v1526_v54, %v1411_v26  ;;  %v8920_v26 = vand.u32 4294901760, %v2701_v16  ;;  %v2699_v54 = vld [vmem:[#allocation8 + $0xb0] sm:$0xff] }
 0x1e3   : > { %v6015_v15 = vpop.f32.mrf.mxu0 }
 0x1e4   : > { %v8933_v9 = vsub.f32 %v2701_v16, %v8920_v26  ;;  %6405 = vmatprep.subr.mxu0 %v8920_v26 }
 0x1e5   : > { %6406 = vmatpush3.msra.mxu0 %v8920_v26 }
 0x1e6   : > { %v8944_v15 = vand.u32 4294901760, %v8933_v9  ;;  %6407 = vmatprep.subr.mxu0 %v8935_v25 }
 0x1e7   : > { %v1533_v32 = vpop.f32.mrf.mxu0  ;;  %6408 = vmatpush3.msra.mxu0 %v8935_v25 }
 0x1e8   : > { %v1534_v50 = vadd.f32 %v1533_v32, %v1417_v40  ;;  %v8930_v40 = vand.u32 4294901760, %v8918_v48  ;;  %10100 = vst [vmem:[#allocation31_spill] sm:$0xff] %v8944_v15  ;;  %v8947_v32 = vsub.f32 %v2700_v5, %v8935_v25 }
 0x1e9   : > { %v6018_v1 = vpop.f32.mrf.mxu0 }
 0x1ea   : > { %10099 = vst [vmem:[#allocation30_spill] sm:$0xff] %v8930_v40  ;;  %v2860_v1 = vand.u32 4294901760, %v2859_v49 }
 0x1ec   : > { %v1540_v41 = vpop.f32.mrf.mxu0  ;;  %v1629_v20 = vpop.f32.mrf.mxu1 }
 0x1ed   : > { %v1541_v53 = vadd.f32 %v1540_v41, %v1423_v10  ;;  %v8847_v24 = vadd.f32 %v1629_v20, %v1527_v28  ;;  %v2853_v10 = vand.u32 4294901760, %v2852_v46  ;;  %v2866_v28 = vsub.f32 %v8918_v48, %v8930_v40 }
 0x1ee   : > { %v6056_v43 = vpop.f32.mrf.mxu1  ;;  %v6021_v42 = vpop.f32.mrf.mxu0  ;;  %v2873_v20 = vsub.f32 %v8933_v9, %v8944_v15  ;;  %v8997_v46 = vand.u32 4294901760, %v8986_v13  ;;  %v2647_v40 = vlaneseq }
 0x1ef   : > { %6434 = vmatprep.subr.mxu1 %v2853_v10  ;;  %v2867_v41 = vand.u32 4294901760, %v2866_v28  ;;  %v8962_v42 = vand.u32 4294901760, %v2698_v7 }
 0x1f0   : > { %6435 = vmatpush3.msra.mxu1 %v2853_v10  ;;  %v2874_v37 = vand.u32 4294901760, %v2873_v20  ;;  %10104 = vst [vmem:[#allocation35_spill] sm:$0xff] %v8997_v46  ;;  %v2694_v10 = vld [vmem:[#allocation8 + $0x88] sm:$0xff]  ;;  %v2901_v28 = vsub.f32 %v8986_v13, %v8997_v46  ;;  %v2648_v31 = vshrl.u32 %v2647_v40, 7 }
 0x1f1   : > { %6436 = vmatprep.subr.mxu1 %v2860_v1  ;;  %v8972_v61 = vsub.f32 %v2698_v7, %v8962_v42  ;;  %v9005_v49 = vand.u32 4294901760, %v2694_v10  ;;  %v2693_v7 = vld [vmem:[#allocation8 + $0x80] sm:$0xff] }
 0x1f2   : > { %v1637_v51 = vpop.f32.mrf.mxu1  ;;  %6437 = vmatpush3.msra.mxu1 %v2860_v1  ;;  %v9019_v23 = vand.u32 4294901760, %v2693_v7 }
 0x1f3   : > { %v8867_v56 = vadd.f32 %v1637_v51, %v1534_v50  ;;  %v8949_v50 = vand.u32 4294901760, %v2699_v54  ;;  %6438 = vmatprep.subr.mxu1 %v2867_v41  ;;  %v8983_v19 = vand.u32 4294901760, %v8972_v61  ;;  %v9017_v20 = vsub.f32 %v2694_v10, %v9005_v49 }
 0x1f4   : > { %v6059_v44 = vpop.f32.mrf.mxu1  ;;  %6439 = vmatpush3.msra.mxu1 %v2867_v41 }
 0x1f5   : > { %v8959_v43 = vsub.f32 %v2699_v54, %v8949_v50  ;;  %6409 = vmatprep.subr.mxu0 %v8949_v50  ;;  %v2696_v44 = vld [vmem:[#allocation8 + $0x98] sm:$0xff]  ;;  %6440 = vmatprep.subr.mxu1 %v2874_v37  ;;  %10103 = vst [vmem:[#allocation34_spill] sm:$0xff] %v8983_v19  ;;  %v2894_v17 = vsub.f32 %v8972_v61, %v8983_v19 }
 0x1f6   : > { %6410 = vmatpush3.msra.mxu0 %v8949_v50  ;;  %6441 = vmatpush3.msra.mxu1 %v2874_v37 }
 0x1f7   : > { %v1645_v58 = vpop.f32.mrf.mxu1  ;;  %v8968_v51 = vand.u32 4294901760, %v8959_v43  ;;  %6411 = vmatprep.subr.mxu0 %v8962_v42  ;;  %v2895_v54 = vand.u32 4294901760, %v2894_v17 }
 0x1f8   : > { %v8892_v63 = vadd.f32 %v1645_v58, %v1541_v53  ;;  %v8956_v53 = vand.u32 4294901760, %v8947_v32  ;;  %v8979_v58 = vand.u32 4294901760, %v2696_v44  ;;  %6412 = vmatpush3.msra.mxu0 %v8962_v42 }
 0x1f9   : > { %v6062_v11 = vpop.f32.mrf.mxu1  ;;  %10102 = vst [vmem:[#allocation33_spill] sm:$0xff] %v8968_v51  ;;  %v2887_v22 = vsub.f32 %v8959_v43, %v8968_v51  ;;  %6413 = vmatprep.subr.mxu0 %v8974_v8 }
 0x1fa   : > { %10101 = vst [vmem:[#allocation32_spill] sm:$0xff] %v8956_v53  ;;  %v2880_v47 = vsub.f32 %v8947_v32, %v8956_v53  ;;  %v2695_v11 = vld [vmem:[#allocation8 + $0x90] sm:$0xff]  ;;  %v8991_v36 = vsub.f32 %v2696_v44, %v8979_v58  ;;  %6414 = vmatpush3.msra.mxu0 %v8974_v8 }
 0x1fb   : > { %v2888_v12 = vand.u32 4294901760, %v2887_v22  ;;  %v8999_v5 = vand.u32 4294901760, %v2695_v11  ;;  %6415 = vmatprep.subr.mxu0 %v8979_v58 }
 0x1fc   : > { %v2881_v34 = vand.u32 4294901760, %v2880_v47  ;;  %6416 = vmatpush3.msra.mxu0 %v8979_v58  ;;  %v2902_v47 = vand.u32 4294901760, %v2901_v28 }
 0x1fd   : > { %v9011_v1 = vsub.f32 %v2695_v11, %v8999_v5  ;;  %6417 = vmatprep.subr.mxu0 %v8999_v5 }
 0x1fe   : > { %6442 = vmatprep.subr.mxu1 %v2881_v34  ;;  %6418 = vmatpush3.msra.mxu0 %v8999_v5 }
 0x1ff   : > { %6443 = vmatpush3.msra.mxu1 %v2881_v34  ;;  %v9023_v44 = vand.u32 4294901760, %v9011_v1  ;;  %6419 = vmatprep.subr.mxu0 %v9005_v49 }
 0x200   : > { %6444 = vmatprep.subr.mxu1 %v2888_v12  ;;  %6420 = vmatpush3.msra.mxu0 %v9005_v49 }
 0x201   : > { %6445 = vmatpush3.msra.mxu1 %v2888_v12  ;;  %10106 = vst [vmem:[#allocation37_spill] sm:$0xff] %v9023_v44  ;;  %v2915_v12 = vsub.f32 %v9011_v1, %v9023_v44  ;;  %6421 = vmatprep.subr.mxu0 %v9019_v23 }
 0x202   : > { %6446 = vmatprep.subr.mxu1 %v2895_v54  ;;  %6422 = vmatpush3.msra.mxu0 %v9019_v23 }
 0x203   : > { %6447 = vmatpush3.msra.mxu1 %v2895_v54  ;;  %v2916_v17 = vand.u32 4294901760, %v2915_v12  ;;  %6461 = vmatprep.subr.mxu0 %v8850_v18 }
 0x204   : > { %6448 = vmatprep.subr.mxu1 %v2902_v47 }
 0x205   : > { %6449 = vmatpush3.msra.mxu1 %v2902_v47 }
 0x207   : > { %v1764_v59 = vpop.f32.mrf.mxu0 }
 0x208   : > { %v1765_v60 = vadd.f32 %v1764_v59, %v8847_v24  ;;  %v9003_v24 = vand.u32 4294901760, %v8991_v36  ;;  %v9028_v59 = vand.u32 4294901760, %v9017_v20 }
 0x209   : > { %v6097_v16 = vpop.f32.mrf.mxu0 }
 0x20a   : > { %10105 = vst [vmem:[#allocation36_spill] sm:$0xff] %v9003_v24  ;;  %v2908_v41 = vsub.f32 %v8991_v36, %v9003_v24  ;;  %10107 = vst [vmem:[#allocation38_spill] sm:$0xff] %v9028_v59  ;;  %v9034_v16 = vsub.f32 %v2693_v7, %v9019_v23 }
 0x20c   : > { %v2909_v22 = vand.u32 4294901760, %v2908_v41  ;;  %10108 = vst [vmem:[#allocation39_spill] sm:$0xff] %v9034_v16  ;;  %v9041_v10 = vand.u32 4294901760, %v9034_v16 }
 0x20d   : > { %v1770_v37 = vpop.f32.mrf.mxu0 }
 0x20e   : > { %v1771_v34 = vadd.f32 %v1770_v37, %v8867_v56  ;;  %v2922_v56 = vsub.f32 %v9017_v20, %v9028_v59  ;;  %6450 = vmatprep.subr.mxu1 %v2909_v22  ;;  %10109 = vst [vmem:[#allocation40_spill] sm:$0xff] %v9041_v10  ;;  %v2929_v47 = vsub.f32 %v9034_v16, %v9041_v10 }
 0x20f   : > { %v6100_v11 = vpop.f32.mrf.mxu0  ;;  %6451 = vmatpush3.msra.mxu1 %v2909_v22 }
 0x210   : > { %v2923_v7 = vand.u32 4294901760, %v2922_v56  ;;  %6452 = vmatprep.subr.mxu1 %v2916_v17  ;;  %v2930_v12 = vand.u32 4294901760, %v2929_v47 }
 0x211   : > { %6453 = vmatpush3.msra.mxu1 %v2916_v17 }
 0x212   : > { %v1776_v54 = vpop.f32.mrf.mxu0  ;;  %v1863_v28 = vpop.f32.mrf.mxu1  ;;  %6454 = vmatprep.subr.mxu1 %v2923_v7 }
 0x213   : > { %v1777_v41 = vadd.f32 %v1776_v54, %v8892_v63  ;;  %v9045_v37 = vadd.f32 %v1863_v28, %v1765_v60  ;;  %6455 = vmatpush3.msra.mxu1 %v2923_v7 }
 0x214   : > { %v6138_v11 = vpop.f32.mrf.mxu1  ;;  %v6103_v39 = vpop.f32.mrf.mxu0  ;;  %6456 = vmatprep.subr.mxu1 %v2930_v12 }
 0x215   : > { %6457 = vmatpush3.msra.mxu1 %v2930_v12 }
 0x216   : > { %6496 = vmatprep.subr.mxu1 %v8845_v0 }
 0x218   : > { %v1869_v57 = vpop.f32.mrf.mxu1 }
 0x219   : > { %v9049_v59 = vadd.f32 %v1869_v57, %v1771_v34 }
 0x21a   : > { %v6141_v63 = vpop.f32.mrf.mxu1 }
 0x21d   : > { %v1875_v60 = vpop.f32.mrf.mxu1 }
 0x21e   : > { %v9052_v22 = vadd.f32 %v1875_v60, %v1777_v41 }
 0x21f   : > { %v6144_v56 = vpop.f32.mrf.mxu1 }
 0x22e   : > { %v1991_v54 = vpop.f32.mrf.mxu0 }
 0x230   : > { %v6179_v28 = vpop.f32.mrf.mxu0 }
 0x236   : > { %v2162_v11 = vpop.f32.mrf.mxu1 }
 0x237   : > { %v2163_v39 = vadd.f32 %v2162_v11, %v1991_v54 }
 0x238   : > { %v6220_v17 = vpop.f32.mrf.mxu1 }
 0x247   : > { %v2001_v10 = vpop.f32.mrf.mxu0 }
 0x249   : > { %v6182_v47 = vpop.f32.mrf.mxu0 }
 0x24c   : > { %v2011_v7 = vpop.f32.mrf.mxu0 }
 0x24e   : > { %v6185_v44 = vpop.f32.mrf.mxu0 }
 0x250   : > { %v2168_v24 = vpop.f32.mrf.mxu1 }
 0x251   : > { %v2169_v33 = vadd.f32 %v2168_v24, %v2001_v10 }
 0x252   : > { %v2278_v12 = vpop.f32.mrf.mxu0  ;;  %v6223_v57 = vpop.f32.mrf.mxu1 }
 0x253   : > { %v2279_v44 = vadd.f32 %v2278_v12, %v2163_v39 }
 0x254   : > { %v6261_v34 = vpop.f32.mrf.mxu0 }
 0x256   : > { %v2174_v46 = vpop.f32.mrf.mxu1 }
 0x257   : > { %v2175_v30 = vadd.f32 %v2174_v46, %v2011_v7  ;;  %v2650_v46 = vadd.s32 16, %v2648_v31 }
 0x258   : > { %v6226_v19 = vpop.f32.mrf.mxu1 }
 0x259   : > { %v2285_v63 = vpop.f32.mrf.mxu0 }
 0x25a   : > { %v2286_v19 = vadd.f32 %v2285_v63, %v2169_v33 }
 0x25b   : > { %v6264_v51 = vpop.f32.mrf.mxu0 }
 0x25e   : > { %v2292_v41 = vpop.f32.mrf.mxu0  ;;  %v2381_v60 = vpop.f32.mrf.mxu1 }
 0x25f   : > { %v2382_v57 = vadd.f32 %v2381_v60, %v2279_v44  ;;  %v2293_v39 = vadd.f32 %v2292_v41, %v2175_v30  ;;  %v4979_v30 = vadd.s32 4294967295, %v2650_v46 }
 0x260   : > { %v6302_v56 = vpop.f32.mrf.mxu1  ;;  %v6267_v53 = vpop.f32.mrf.mxu0 }
 0x261   : > { %vm2664_vm4 = vcmp.lt.s32.totalorder %v4979_v30, 16  ;;  %v10120_v30 = vld [vmem:[#allocation33_spill] sm:$0xff] }
 0x264   : > { %v2389_v28 = vpop.f32.mrf.mxu1 }
 0x265   : > { %v2390_v56 = vadd.f32 %v2389_v28, %v2286_v19 }
 0x266   : > { %v6305_v15 = vpop.f32.mrf.mxu1 }
 0x267   : > { %v4976_v15 = vld [vmem:[%s9991_s3] ss:$0 sm:$0xff] }
 0x269   : > { %v2397_v54 = vpop.f32.mrf.mxu1 }
 0x26a   : > { %v2398_v40 = vadd.f32 %v2397_v54, %v2293_v39 }
 0x26b   : > { %v6308_v11 = vpop.f32.mrf.mxu1 }
 0x26c   : > { %v4977_v11 = vadd.s32 4294967295, %v2648_v31 }
 0x26e   : > { %vm2659_vm3 = vcmp.ge.s32.totalorder %v4977_v11, 0 }
 0x279   : > { %v2516_v17 = vpop.f32.mrf.mxu0 }
 0x27a   : > { %v2517_v27 = vadd.f32 %v2516_v17, %v2382_v57 }
 0x27b   : > { %v6343_v47 = vpop.f32.mrf.mxu0 }
 0x27d   : > { %v2522_v52 = vpop.f32.mrf.mxu0 }
 0x27e   : > { %v2523_v12 = vadd.f32 %v2522_v52, %v2390_v56 }
 0x27f   : > { %v6346_v34 = vpop.f32.mrf.mxu0 }
 0x281   : > { %v2528_v51 = vpop.f32.mrf.mxu0 }
 0x282   : > { %v2615_v29 = vpop.f32.mrf.mxu1  ;;  %v2529_v7 = vadd.f32 %v2528_v51, %v2398_v40 }
 0x283   : > { %v2616_v53 = vadd.f32 %v2615_v29, %v2517_v27  ;;  %v6349_v16 = vpop.f32.mrf.mxu0 }
 0x284   : > { %v6384_v47 = vpop.f32.mrf.mxu1 }
 0x285   : > { %v2631_v24 = vadd.f32 %v2616_v53, %v9045_v37 }
 0x286   : > { %v2621_v10 = vpop.f32.mrf.mxu1 }
 0x287   : > { %v2641_v33 = vadd.f32 %v4976_v15, %v2631_v24  ;;  %v2622_v63 = vadd.f32 %v2621_v10, %v2523_v12 }
 0x288   : > { %v6387_v60 = vpop.f32.mrf.mxu1 }
 0x289   : > { %v2644_v29 = vmax.f32 %v2641_v33, 0.0  ;;  %v2632_v27 = vadd.f32 %v2622_v63, %v9049_v59 }
 0x28a   : > { %v2627_v16 = vpop.f32.mrf.mxu1 }
 0x28b   : > { %v9059_v28 = vsel %vm2659_vm3, %v2644_v29, 0.0  ;;  %v2642_v17 = vadd.f32 %v4976_v15, %v2632_v27  ;;  %v2628_v44 = vadd.f32 %v2627_v16, %v2529_v7  ;;  %v10119_v29 = vld [vmem:[#allocation32_spill] sm:$0xff] }
 0x28c   : > { %v6390_v52 = vpop.f32.mrf.mxu1  ;;  %v2712_v54 = vrot.slane %v9059_v28, 1  ;;  %v4103_v57 = vrot.slane %v9059_v28, 2 }
 0x28d   : > { %v9061_v41 = vmax.f32 %v2642_v17, 0.0  ;;  %v2633_v37 = vadd.f32 %v2628_v44, %v9052_v22  ;;  %v9229_v44 = vand.u32 4294901760, %v9059_v28 }
 0x28f   : > { %v2713_v31 = vrot.slane %v9061_v41, 1  ;;  %v2643_v34 = vadd.f32 %v4976_v15, %v2633_v37  ;;  %v4104_v59 = vrot.slane %v9061_v41, 2 }
 0x291   : > { %v2646_v19 = vmax.f32 %v2643_v34, 0.0  ;;  %v2714_v51 = vsel %vm416_vm1, %v2712_v54, %v2713_v31  ;;  %v9070_v56 = vsel %vm1895_vm2, %v4103_v57, %v4104_v59  ;;  %v10121_v57 = vld [vmem:[#allocation34_spill] sm:$0xff] }
 0x292   : > { %v9072_v53 = vand.u32 4294901760, %v2714_v51 }
 0x293   : > { %v2676_v11 = vsel %vm2664_vm4, %v2646_v19, 0.0  ;;  %v2684_v19 = vld [vmem:[#allocation8 + $0x38] sm:$0xff] }
 0x294   : > { %v2715_v22 = vrot.slane %v2676_v11, 1  ;;  %v4106_v47 = vrot.slane %v2676_v11, 2  ;;  %6458 = vmatprep.mubr.f32.mxu1 %v9072_v53  ;;  %v2801_v39 = vsub.f32 %v2714_v51, %v9072_v53 }
 0x296   : > { %v2716_v15 = vsel %vm416_vm1, %v2713_v31, %v2715_v22  ;;  %v2802_v12 = vand.u32 4294901760, %v2801_v39  ;;  %v9078_v24 = vsel %vm1895_vm2, %v4104_v59, %v4106_v47 }
 0x297   : > { %v9080_v10 = vand.u32 4294901760, %v2716_v15 }
 0x298   : > { %v2803_v40 = vsub.f32 %v2801_v39, %v2802_v12 }
 0x299   : > { %6459 = vmatmul.mubr.f32.vlgmr.msra.gmra.mxu1 %v9080_v10  ;;  %v9084_v33 = vsub.f32 %v2716_v15, %v9080_v10 }
 0x29a   : > { %6497 = vmatpush3.msra.mxu1 %v8845_v0  ;;  %6528 = vmatprep.mubr.f32.mxu1 %v2802_v12  ;;  %v2804_v63 = vand.u32 4294901760, %v2803_v40 }
 0x29b   : > { %6498 = vmatprep.subr.mxu1 %v8857_v21  ;;  %v2812_v60 = vand.u32 4294901760, %v9084_v33 }
 0x29c   : > { %6499 = vmatpush3.msra.mxu1 %v8857_v21  ;;  %6423 = vmatprep.mubr.f32.mxu0 %v2804_v63  ;;  %v2682_v63 = vld [vmem:[#allocation8 + $0x28] sm:$0xff] }
 0x29d   : > { %6500 = vmatprep.subr.mxu1 %v8864_v35  ;;  %v2813_v46 = vsub.f32 %v9084_v33, %v2812_v60 }
 0x29e   : > { %6501 = vmatpush3.msra.mxu1 %v8864_v35 }
 0x29f   : > { %6502 = vmatprep.subr.mxu1 %v8876_v55  ;;  %v2814_v7 = vand.u32 4294901760, %v2813_v46 }
 0x2a0   : > { %6503 = vmatpush3.msra.mxu1 %v8876_v55 }
 0x2a1   : > { %6504 = vmatprep.subr.mxu1 %v8888_v45  ;;  %6424 = vmatmul.mubr.f32.vlgmr.msra.gmra.mxu0 %v2814_v7 }
 0x2a2   : > { %6462 = vmatpush3.msra.mxu0 %v8850_v18  ;;  %6505 = vmatpush3.msra.mxu1 %v8888_v45  ;;  %v10110_v18 = vld [vmem:[#allocation39_spill] sm:$0xff] }
 0x2a3   : > { %6463 = vmatprep.subr.mxu0 %v8862_v38  ;;  %6493 = vmatprep.mubr.f32.mxu0 %v2801_v39  ;;  %v2683_v39 = vld [vmem:[#allocation8 + $0x30] sm:$0xff] }
 0x2a4   : > { %6506 = vmatprep.subr.mxu1 %v8903_v14  ;;  %6464 = vmatpush3.msra.mxu0 %v8862_v38  ;;  %v2692_v38 = vld [vmem:[#allocation8 + $0x78] sm:$0xff]  ;;  %v9287_v46 = vand.u32 4294901760, %v2683_v39 }
 0x2a5   : > { %6507 = vmatpush3.msra.mxu1 %v8903_v14  ;;  %6465 = vmatprep.subr.mxu0 %v8874_v3 }
 0x2a6   : > { %6508 = vmatprep.subr.mxu1 %v8908_v4  ;;  %6466 = vmatpush3.msra.mxu0 %v8874_v3  ;;  %v9172_v3 = vand.u32 4294901760, %v2692_v38 }
 0x2a7   : > { %6509 = vmatpush3.msra.mxu1 %v8908_v4  ;;  %6467 = vmatprep.subr.mxu0 %v8886_v62 }
 0x2a8   : > { %6510 = vmatprep.subr.mxu1 %v8920_v26  ;;  %6468 = vmatpush3.msra.mxu0 %v8886_v62  ;;  %v10114_v62 = vld [vmem:[#allocation27_spill] sm:$0xff] }
 0x2a9   : > { %6511 = vmatpush3.msra.mxu1 %v8920_v26  ;;  %6469 = vmatprep.subr.mxu0 %v8901_v2 }
 0x2aa   : > { %6512 = vmatprep.subr.mxu1 %v8935_v25  ;;  %6470 = vmatpush3.msra.mxu0 %v8901_v2  ;;  %v10115_v2 = vld [vmem:[#allocation28_spill] sm:$0xff] }
 0x2ab   : > { %6513 = vmatpush3.msra.mxu1 %v8935_v25  ;;  %6471 = vmatprep.subr.mxu0 %v8914_v6 }
 0x2ac   : > { %6514 = vmatprep.subr.mxu1 %v8949_v50  ;;  %6472 = vmatpush3.msra.mxu0 %v8914_v6  ;;  %v9185_v6 = vsub.f32 %v2692_v38, %v9172_v3 }
 0x2ad   : > { %6515 = vmatpush3.msra.mxu1 %v8949_v50  ;;  %6473 = vmatprep.subr.mxu0 %v8918_v48 }
 0x2ae   : > { %6516 = vmatprep.subr.mxu1 %v8962_v42  ;;  %6474 = vmatpush3.msra.mxu0 %v8918_v48  ;;  %v10116_v48 = vld [vmem:[#allocation29_spill] sm:$0xff] }
 0x2af   : > { %6517 = vmatpush3.msra.mxu1 %v8962_v42  ;;  %6475 = vmatprep.subr.mxu0 %v8933_v9 }
 0x2b0   : > { %6518 = vmatprep.subr.mxu1 %v8974_v8  ;;  %6476 = vmatpush3.msra.mxu0 %v8933_v9 }
 0x2b1   : > { %6519 = vmatpush3.msra.mxu1 %v8974_v8  ;;  %6477 = vmatprep.subr.mxu0 %v8947_v32 }
 0x2b2   : > { %6520 = vmatprep.subr.mxu1 %v8979_v58  ;;  %6478 = vmatpush3.msra.mxu0 %v8947_v32  ;;  %v10117_v32 = vld [vmem:[#allocation30_spill] sm:$0xff] }
 0x2b3   : > { %6521 = vmatpush3.msra.mxu1 %v8979_v58  ;;  %6479 = vmatprep.subr.mxu0 %v8959_v43 }
 0x2b4   : > { %6522 = vmatprep.subr.mxu1 %v8999_v5  ;;  %6480 = vmatpush3.msra.mxu0 %v8959_v43 }
 0x2b5   : > { %6523 = vmatpush3.msra.mxu1 %v8999_v5  ;;  %6481 = vmatprep.subr.mxu0 %v8972_v61 }
 0x2b6   : > { %6524 = vmatprep.subr.mxu1 %v9005_v49  ;;  %6482 = vmatpush3.msra.mxu0 %v8972_v61 }
 0x2b7   : > { %6525 = vmatpush3.msra.mxu1 %v9005_v49  ;;  %6483 = vmatprep.subr.mxu0 %v8986_v13 }
 0x2b8   : > { %6526 = vmatprep.subr.mxu1 %v9019_v23  ;;  %6484 = vmatpush3.msra.mxu0 %v8986_v13  ;;  %v2687_v13 = vld [vmem:[#allocation8 + $0x50] sm:$0xff] }
 0x2b9   : > { %6527 = vmatpush3.msra.mxu1 %v9019_v23  ;;  %6485 = vmatprep.subr.mxu0 %v8991_v36  ;;  %v9222_v16 = vand.u32 4294901760, %v2687_v13 }
 0x2ba   : > { %6529 = vmatmul.mubr.f32.vlgmr.msra.gmra.mxu1 %v2812_v60  ;;  %6566 = vmatprep.subr.mxu1 %v8845_v0 }
 0x2bb   : > { %6486 = vmatpush3.msra.mxu0 %v8991_v36  ;;  %6567 = vmatpush3.msra.mxu1 %v8845_v0  ;;  %v10111_v0 = vld [vmem:[#allocation24_spill] sm:$0xff]  ;;  %v10118_v36 = vld [vmem:[#allocation31_spill] sm:$0xff]  ;;  %v9251_v34 = vsub.f32 %v2687_v13, %v9222_v16 }
 0x2bc   : > { %6598 = vmatprep.mubr.f32.mxu1 %v9072_v53  ;;  %6487 = vmatprep.subr.mxu0 %v9011_v1 }
 0x2bd   : > { %6568 = vmatprep.subr.mxu1 %v8857_v21  ;;  %6488 = vmatpush3.msra.mxu0 %v9011_v1  ;;  %v9280_v40 = vand.u32 4294901760, %v9251_v34 }
 0x2be   : > { %6569 = vmatpush3.msra.mxu1 %v8857_v21  ;;  %6489 = vmatprep.subr.mxu0 %v9017_v20  ;;  %v10112_v21 = vld [vmem:[#allocation25_spill] sm:$0xff] }
 0x2bf   : > { %6570 = vmatprep.subr.mxu1 %v8864_v35  ;;  %6490 = vmatpush3.msra.mxu0 %v9017_v20  ;;  %v2686_v20 = vld [vmem:[#allocation8 + $0x48] sm:$0xff] }
 0x2c0   : > { %6571 = vmatpush3.msra.mxu1 %v8864_v35  ;;  %6491 = vmatprep.subr.mxu0 %v10110_v18  ;;  %v10113_v35 = vld [vmem:[#allocation26_spill] sm:$0xff]  ;;  %v9239_v54 = vand.u32 4294901760, %v2686_v20 }
 0x2c1   : > { %6572 = vmatprep.subr.mxu1 %v8876_v55  ;;  %6492 = vmatpush3.msra.mxu0 %v10110_v18 }
 0x2c2   : > { %6573 = vmatpush3.msra.mxu1 %v8876_v55  ;;  %6494 = vmatmul.mubr.f32.vlgmr.msra.gmra.mxu0 %v9084_v33  ;;  %v2691_v55 = vld [vmem:[#allocation8 + $0x70] sm:$0xff]  ;;  %v9269_v47 = vsub.f32 %v2686_v20, %v9239_v54 }
 0x2c3   : > { %6531 = vmatprep.subr.mxu0 %v10111_v0  ;;  %6574 = vmatprep.subr.mxu1 %v8888_v45  ;;  %v2679_v20 = vld [vmem:[#allocation8 + $0x10] sm:$0xff] }
 0x2c4   : > { %6532 = vmatpush3.msra.mxu0 %v10111_v0  ;;  %6563 = vmatprep.mubr.f32.mxu0 %v9072_v53  ;;  %v10122_v53 = vld [vmem:[#allocation35_spill] sm:$0xff]  ;;  %v9293_v18 = vand.u32 4294901760, %v9269_v47  ;;  %v2681_v0 = vld [vmem:[#allocation8 + $0x20] sm:$0xff] }
 0x2c5   : > { %6575 = vmatpush3.msra.mxu1 %v8888_v45  ;;  %6533 = vmatprep.subr.mxu0 %v10112_v21  ;;  %v2690_v45 = vld [vmem:[#allocation8 + $0x68] sm:$0xff] }
 0x2c6   : > { %6576 = vmatprep.subr.mxu1 %v8903_v14  ;;  %6534 = vmatpush3.msra.mxu0 %v10112_v21  ;;  %v9189_v9 = vand.u32 4294901760, %v2690_v45  ;;  %v10124_v21 = vld [vmem:[#allocation37_spill] sm:$0xff] }
 0x2c7   : > { %6577 = vmatpush3.msra.mxu1 %v8903_v14  ;;  %6535 = vmatprep.subr.mxu0 %v10113_v35  ;;  %v9180_v14 = vand.u32 4294901760, %v2691_v55 }
 0x2c8   : > { %6578 = vmatprep.subr.mxu1 %v8908_v4  ;;  %6536 = vmatpush3.msra.mxu0 %v10113_v35  ;;  %v9300_v35 = vand.u32 4294901760, %v2682_v63 }
 0x2c9   : > { %6579 = vmatpush3.msra.mxu1 %v8908_v4  ;;  %6537 = vmatprep.subr.mxu0 %v10114_v62  ;;  %v2689_v4 = vld [vmem:[#allocation8 + $0x60] sm:$0xff]  ;;  %v9196_v43 = vsub.f32 %v2691_v55, %v9180_v14 }
 0x2ca   : > { %6580 = vmatprep.subr.mxu1 %v8920_v26  ;;  %6538 = vmatpush3.msra.mxu0 %v10114_v62  ;;  %v9198_v61 = vand.u32 4294901760, %v2689_v4  ;;  %v3543_v62 = vsub.f32 %v9251_v34, %v9280_v40 }
 0x2cb   : > { %6581 = vmatpush3.msra.mxu1 %v8920_v26  ;;  %6539 = vmatprep.subr.mxu0 %v10115_v2  ;;  %v2688_v26 = vld [vmem:[#allocation8 + $0x58] sm:$0xff]  ;;  %v9217_v27 = vand.u32 4294901760, %v9196_v43 }
 0x2cc   : > { %6582 = vmatprep.subr.mxu1 %v8935_v25  ;;  %6540 = vmatpush3.msra.mxu0 %v10115_v2  ;;  %v9210_v1 = vand.u32 4294901760, %v2688_v26  ;;  %v2680_v2 = vld [vmem:[#allocation8 + $0x18] sm:$0xff] }
 0x2cd   : > { %6583 = vmatpush3.msra.mxu1 %v8935_v25  ;;  %6541 = vmatprep.subr.mxu0 %v10116_v48  ;;  %v9203_v25 = vand.u32 4294901760, %v9185_v6 }
 0x2ce   : > { %6584 = vmatprep.subr.mxu1 %v8949_v50  ;;  %6542 = vmatpush3.msra.mxu0 %v10116_v48  ;;  %v9237_v37 = vsub.f32 %v2688_v26, %v9210_v1  ;;  %v9313_v26 = vsub.f32 %v2683_v39, %v9287_v46  ;;  %v9339_v39 = vand.u32 4294901760, %v2679_v20 }
 0x2cf   : > { %6585 = vmatpush3.msra.mxu1 %v8949_v50  ;;  %6543 = vmatprep.subr.mxu0 %v10117_v32  ;;  %v9208_v50 = vsub.f32 %v2690_v45, %v9189_v9  ;;  %v3508_v17 = vsub.f32 %v9185_v6, %v9203_v25 }
 0x2d0   : > { %6586 = vmatprep.subr.mxu1 %v8962_v42  ;;  %6544 = vmatpush3.msra.mxu0 %v10117_v32  ;;  %v9266_v22 = vand.u32 4294901760, %v9237_v37  ;;  %v9315_v32 = vand.u32 4294901760, %v2681_v0 }
 0x2d1   : > { %6587 = vmatpush3.msra.mxu1 %v8962_v42  ;;  %6545 = vmatprep.subr.mxu0 %v10118_v36  ;;  %v9220_v42 = vsub.f32 %v2689_v4, %v9198_v61  ;;  %v9234_v52 = vand.u32 4294901760, %v9208_v50  ;;  %v3509_v51 = vand.u32 4294901760, %v3508_v17  ;;  %v10125_v4 = vld [vmem:[#allocation38_spill] sm:$0xff] }
 0x2d2   : > { %6588 = vmatprep.subr.mxu1 %v8974_v8  ;;  %6546 = vmatpush3.msra.mxu0 %v10118_v36  ;;  %v3536_v7 = vsub.f32 %v9237_v37, %v9266_v22  ;;  %v3550_v36 = vsub.f32 %v9269_v47, %v9293_v18 }
 0x2d3   : > { %6589 = vmatpush3.msra.mxu1 %v8974_v8  ;;  %6547 = vmatprep.subr.mxu0 %v10119_v29  ;;  %v2685_v8 = vld [vmem:[#allocation8 + $0x40] sm:$0xff]  ;;  %v9248_v31 = vand.u32 4294901760, %v9220_v42  ;;  %v3522_v11 = vsub.f32 %v9208_v50, %v9234_v52 }
 0x2d4   : > { %6590 = vmatprep.subr.mxu1 %v8979_v58  ;;  %6548 = vmatpush3.msra.mxu0 %v10119_v29  ;;  %v9253_v59 = vand.u32 4294901760, %v2685_v8  ;;  %v3537_v13 = vand.u32 4294901760, %v3536_v7  ;;  %v10126_v29 = vld [vmem:[#allocation40_spill] sm:$0xff] }
 0x2d5   : > { %6591 = vmatpush3.msra.mxu1 %v8979_v58  ;;  %6549 = vmatprep.subr.mxu0 %v10120_v30  ;;  %v3515_v58 = vsub.f32 %v9196_v43, %v9217_v27  ;;  %v3529_v12 = vsub.f32 %v9220_v42, %v9248_v31 }
 0x2d6   : > { %6592 = vmatprep.subr.mxu1 %v8999_v5  ;;  %6550 = vmatpush3.msra.mxu0 %v10120_v30  ;;  %v9283_v33 = vsub.f32 %v2685_v8, %v9253_v59  ;;  %v9325_v8 = vsub.f32 %v2682_v63, %v9300_v35  ;;  %v9327_v30 = vand.u32 4294901760, %v2680_v2 }
 0x2d7   : > { %6593 = vmatpush3.msra.mxu1 %v8999_v5  ;;  %6551 = vmatprep.subr.mxu0 %v10121_v57  ;;  %v9259_v5 = vsub.f32 %v9059_v28, %v9229_v44  ;;  %v9273_v28 = vand.u32 4294901760, %v2684_v19  ;;  %v3516_v15 = vand.u32 4294901760, %v3515_v58  ;;  %v3530_v55 = vand.u32 4294901760, %v3529_v12 }
 0x2d8   : > { %6594 = vmatprep.subr.mxu1 %v9005_v49  ;;  %6552 = vmatpush3.msra.mxu0 %v10121_v57  ;;  %v9306_v45 = vand.u32 4294901760, %v9283_v33  ;;  %v3544_v57 = vand.u32 4294901760, %v3543_v62  ;;  %v9346_v12 = vand.u32 4294901760, %v9325_v8  ;;  %v9349_v63 = vsub.f32 %v2680_v2, %v9327_v30 }
 0x2d9   : > { %6595 = vmatpush3.msra.mxu1 %v9005_v49  ;;  %6553 = vmatprep.subr.mxu0 %v10122_v53  ;;  %v10123_v49 = vld [vmem:[#allocation36_spill] sm:$0xff]  ;;  %v3486_v60 = vand.u32 4294901760, %v9259_v5  ;;  %v9298_v38 = vsub.f32 %v2684_v19, %v9273_v28  ;;  %v2678_v19 = vld [vmem:[#allocation8 + $0x8] sm:$0xff] }
 0x2da   : > { %6596 = vmatprep.subr.mxu1 %v9019_v23  ;;  %6554 = vmatpush3.msra.mxu0 %v10122_v53  ;;  %v3557_v58 = vsub.f32 %v9283_v33, %v9306_v45  ;;  %v9334_v53 = vand.u32 4294901760, %v9313_v26 }
 0x2db   : > { %6597 = vmatpush3.msra.mxu1 %v9019_v23  ;;  %6555 = vmatprep.subr.mxu0 %v10123_v49  ;;  %v3523_v23 = vand.u32 4294901760, %v3522_v11  ;;  %v3487_v48 = vsub.f32 %v9259_v5, %v3486_v60  ;;  %v9322_v17 = vand.u32 4294901760, %v9298_v38  ;;  %v9337_v11 = vsub.f32 %v2681_v0, %v9315_v32 }
 0x2dc   : > { %6599 = vmatmul.mubr.f32.vlgmr.msra.gmra.mxu1 %v9080_v10  ;;  %6636 = vmatprep.subr.mxu1 %v3509_v51  ;;  %v3558_v7 = vand.u32 4294901760, %v3557_v58  ;;  %v3571_v0 = vsub.f32 %v9313_v26, %v9334_v53 }
 0x2dd   : > { %6556 = vmatpush3.msra.mxu0 %v10123_v49  ;;  %6637 = vmatpush3.msra.mxu1 %v3509_v51  ;;  %v3488_v51 = vand.u32 4294901760, %v3487_v48  ;;  %v3551_v49 = vand.u32 4294901760, %v3550_v36  ;;  %v9370_v48 = vand.u32 4294901760, %v9349_v63 }
 0x2de   : > { %6668 = vmatprep.mubr.f32.mxu1 %v9229_v44  ;;  %6557 = vmatprep.subr.mxu0 %v10124_v21  ;;  %v3572_v36 = vand.u32 4294901760, %v3571_v0 }
 0x2df   : > { %6638 = vmatprep.subr.mxu1 %v3516_v15  ;;  %6558 = vmatpush3.msra.mxu0 %v10124_v21  ;;  %v9358_v21 = vand.u32 4294901760, %v9337_v11 }
 0x2e0   : > { %6639 = vmatpush3.msra.mxu1 %v3516_v15  ;;  %6559 = vmatprep.subr.mxu0 %v10125_v4  ;;  %v2677_v15 = vld [vmem:[#allocation8] sm:$0xff] }
 0x2e1   : > { %6640 = vmatprep.subr.mxu1 %v3523_v23  ;;  %6560 = vmatpush3.msra.mxu0 %v10125_v4  ;;  %v9363_v62 = vand.u32 4294901760, %v2677_v15  ;;  %v3578_v4 = vsub.f32 %v9325_v8, %v9346_v12 }
 0x2e2   : > { %6641 = vmatpush3.msra.mxu1 %v3523_v23  ;;  %6561 = vmatprep.subr.mxu0 %v10126_v29  ;;  %v9351_v23 = vand.u32 4294901760, %v2678_v19 }
 0x2e3   : > { %6642 = vmatprep.subr.mxu1 %v3530_v55  ;;  %6562 = vmatpush3.msra.mxu0 %v10126_v29  ;;  %v3579_v58 = vand.u32 4294901760, %v3578_v4 }
 0x2e4   : > { %6643 = vmatpush3.msra.mxu1 %v3530_v55  ;;  %6564 = vmatmul.mubr.f32.vlgmr.msra.gmra.mxu0 %v9080_v10  ;;  %v3564_v10 = vsub.f32 %v9298_v38, %v9322_v17  ;;  %v9361_v55 = vsub.f32 %v2679_v20, %v9339_v39  ;;  %v3585_v20 = vsub.f32 %v9337_v11, %v9358_v21 }
 0x2e5   : > { %6601 = vmatprep.subr.mxu0 %v9172_v3  ;;  %6644 = vmatprep.subr.mxu1 %v3537_v13 }
 0x2e6   : > { %6602 = vmatpush3.msra.mxu0 %v9172_v3  ;;  %6633 = vmatprep.mubr.f32.mxu0 %v3488_v51  ;;  %v3565_v2 = vand.u32 4294901760, %v3564_v10  ;;  %v9380_v29 = vand.u32 4294901760, %v9361_v55 }
 0x2e7   : > { %6645 = vmatpush3.msra.mxu1 %v3537_v13  ;;  %6603 = vmatprep.subr.mxu0 %v9180_v14  ;;  %v9373_v13 = vsub.f32 %v2678_v19, %v9351_v23  ;;  %v3592_v19 = vsub.f32 %v9349_v63, %v9370_v48 }
 0x2e8   : > { %6646 = vmatprep.subr.mxu1 %v3544_v57  ;;  %6604 = vmatpush3.msra.mxu0 %v9180_v14 }
 0x2e9   : > { %6647 = vmatpush3.msra.mxu1 %v3544_v57  ;;  %6605 = vmatprep.subr.mxu0 %v9189_v9  ;;  %v9383_v57 = vsub.f32 %v2677_v15, %v9363_v62  ;;  %v9390_v51 = vand.u32 4294901760, %v9373_v13  ;;  %v3599_v15 = vsub.f32 %v9361_v55, %v9380_v29 }
 0x2ea   : > { %6648 = vmatprep.subr.mxu1 %v3551_v49  ;;  %6606 = vmatpush3.msra.mxu0 %v9189_v9 }
 0x2eb   : > { %6649 = vmatpush3.msra.mxu1 %v3551_v49  ;;  %6607 = vmatprep.subr.mxu0 %v9198_v61  ;;  %v3586_v49 = vand.u32 4294901760, %v3585_v20  ;;  %v9397_v10 = vand.u32 4294901760, %v9383_v57  ;;  %v3606_v0 = vsub.f32 %v9373_v13, %v9390_v51 }
 0x2ec   : > { %6650 = vmatprep.subr.mxu1 %v3558_v7  ;;  %6608 = vmatpush3.msra.mxu0 %v9198_v61 }
 0x2ed   : > { %6651 = vmatpush3.msra.mxu1 %v3558_v7  ;;  %6609 = vmatprep.subr.mxu0 %v9210_v1  ;;  %v3593_v7 = vand.u32 4294901760, %v3592_v19  ;;  %v3613_v4 = vsub.f32 %v9383_v57, %v9397_v10  ;;  %v3607_v20 = vand.u32 4294901760, %v3606_v0 }
 0x2ee   : > { %6652 = vmatprep.subr.mxu1 %v3565_v2  ;;  %6610 = vmatpush3.msra.mxu0 %v9210_v1 }
 0x2ef   : > { %6653 = vmatpush3.msra.mxu1 %v3565_v2  ;;  %6611 = vmatprep.subr.mxu0 %v9222_v16  ;;  %v3600_v2 = vand.u32 4294901760, %v3599_v15  ;;  %v4091_v15 = vld [vmem:[#allocation8 + $0x120] sm:$0xff] }
 0x2f0   : > { %6654 = vmatprep.subr.mxu1 %v3572_v36  ;;  %6612 = vmatpush3.msra.mxu0 %v9222_v16 }
 0x2f1   : > { %6655 = vmatpush3.msra.mxu1 %v3572_v36  ;;  %6613 = vmatprep.subr.mxu0 %v9239_v54  ;;  %v9408_v36 = vand.u32 4294901760, %v9061_v41 }
 0x2f2   : > { %6656 = vmatprep.subr.mxu1 %v3579_v58  ;;  %6614 = vmatpush3.msra.mxu0 %v9239_v54 }
 0x2f3   : > { %6657 = vmatpush3.msra.mxu1 %v3579_v58  ;;  %6615 = vmatprep.subr.mxu0 %v9253_v59  ;;  %v3614_v58 = vand.u32 4294901760, %v3613_v4  ;;  %v9416_v19 = vsub.f32 %v9061_v41, %v9408_v36 }
 0x2f4   : > { %6658 = vmatprep.subr.mxu1 %v3586_v49  ;;  %6616 = vmatpush3.msra.mxu0 %v9253_v59 }
 0x2f5   : > { %6659 = vmatpush3.msra.mxu1 %v3586_v49  ;;  %6617 = vmatprep.subr.mxu0 %v9273_v28  ;;  %v3496_v49 = vand.u32 4294901760, %v9416_v19 }
 0x2f6   : > { %6660 = vmatprep.subr.mxu1 %v3593_v7  ;;  %6618 = vmatpush3.msra.mxu0 %v9273_v28 }
 0x2f7   : > { %6661 = vmatpush3.msra.mxu1 %v3593_v7  ;;  %6619 = vmatprep.subr.mxu0 %v9287_v46  ;;  %v3497_v41 = vsub.f32 %v9416_v19, %v3496_v49 }
 0x2f8   : > { %6662 = vmatprep.subr.mxu1 %v3600_v2  ;;  %6620 = vmatpush3.msra.mxu0 %v9287_v46 }
 0x2f9   : > { %6663 = vmatpush3.msra.mxu1 %v3600_v2  ;;  %6621 = vmatprep.subr.mxu0 %v9300_v35 }
 0x2fa   : > { %6664 = vmatprep.subr.mxu1 %v3607_v20  ;;  %6622 = vmatpush3.msra.mxu0 %v9300_v35 }
 0x2fb   : > { %6665 = vmatpush3.msra.mxu1 %v3607_v20  ;;  %6623 = vmatprep.subr.mxu0 %v9315_v32  ;;  %v4090_v20 = vld [vmem:[#allocation8 + $0x118] sm:$0xff] }
 0x2fc   : > { %6666 = vmatprep.subr.mxu1 %v3614_v58  ;;  %6624 = vmatpush3.msra.mxu0 %v9315_v32 }
 0x2fd   : > { %6667 = vmatpush3.msra.mxu1 %v3614_v58  ;;  %6625 = vmatprep.subr.mxu0 %v9327_v30 }
 0x2fe   : > { %6669 = vmatmul.mubr.f32.vlgmr.msra.gmra.mxu1 %v9408_v36  ;;  %6706 = vmatprep.subr.mxu1 %v9172_v3 }
 0x2ff   : > { %6626 = vmatpush3.msra.mxu0 %v9327_v30  ;;  %6707 = vmatpush3.msra.mxu1 %v9172_v3 }
 0x300   : > { %6738 = vmatprep.mubr.f32.mxu1 %v3486_v60  ;;  %6627 = vmatprep.subr.mxu0 %v9339_v39  ;;  %v3498_v60 = vand.u32 4294901760, %v3497_v41 }
 0x301   : > { %6708 = vmatprep.subr.mxu1 %v9180_v14  ;;  %6628 = vmatpush3.msra.mxu0 %v9339_v39 }
 0x302   : > { %6709 = vmatpush3.msra.mxu1 %v9180_v14  ;;  %6629 = vmatprep.subr.mxu0 %v9351_v23 }
 0x303   : > { %6710 = vmatprep.subr.mxu1 %v9189_v9  ;;  %6630 = vmatpush3.msra.mxu0 %v9351_v23 }
 0x304   : > { %6711 = vmatpush3.msra.mxu1 %v9189_v9  ;;  %6631 = vmatprep.subr.mxu0 %v9363_v62 }
 0x305   : > { %6712 = vmatprep.subr.mxu1 %v9198_v61  ;;  %6632 = vmatpush3.msra.mxu0 %v9363_v62 }
 0x306   : > { %6713 = vmatpush3.msra.mxu1 %v9198_v61  ;;  %6634 = vmatmul.mubr.f32.vlgmr.msra.gmra.mxu0 %v3498_v60  ;;  %v4089_v60 = vld [vmem:[#allocation8 + $0x110] sm:$0xff] }
 0x307   : > { %6671 = vmatprep.subr.mxu0 %v9185_v6  ;;  %6714 = vmatprep.subr.mxu1 %v9210_v1 }
 0x308   : > { %6672 = vmatpush3.msra.mxu0 %v9185_v6  ;;  %6703 = vmatprep.mubr.f32.mxu0 %v9259_v5  ;;  %v4101_v6 = vld [vmem:[#allocation8 + $0x170] sm:$0xff] }
 0x309   : > { %6715 = vmatpush3.msra.mxu1 %v9210_v1  ;;  %6673 = vmatprep.subr.mxu0 %v9196_v43 }
 0x30a   : > { %6716 = vmatprep.subr.mxu1 %v9222_v16  ;;  %6674 = vmatpush3.msra.mxu0 %v9196_v43  ;;  %v9534_v43 = vand.u32 4294901760, %v4101_v6 }
 0x30b   : > { %6717 = vmatpush3.msra.mxu1 %v9222_v16  ;;  %6675 = vmatprep.subr.mxu0 %v9208_v50 }
 0x30c   : > { %6718 = vmatprep.subr.mxu1 %v9239_v54  ;;  %6676 = vmatpush3.msra.mxu0 %v9208_v50 }
 0x30d   : > { %6719 = vmatpush3.msra.mxu1 %v9239_v54  ;;  %6677 = vmatprep.subr.mxu0 %v9220_v42 }
 0x30e   : > { %6720 = vmatprep.subr.mxu1 %v9253_v59  ;;  %6678 = vmatpush3.msra.mxu0 %v9220_v42 }
 0x30f   : > { %6721 = vmatpush3.msra.mxu1 %v9253_v59  ;;  %6679 = vmatprep.subr.mxu0 %v9237_v37 }
 0x310   : > { %6722 = vmatprep.subr.mxu1 %v9273_v28  ;;  %6680 = vmatpush3.msra.mxu0 %v9237_v37  ;;  %v4097_v37 = vld [vmem:[#allocation8 + $0x150] sm:$0xff] }
 0x311   : > { %6723 = vmatpush3.msra.mxu1 %v9273_v28  ;;  %6681 = vmatprep.subr.mxu0 %v9251_v34 }
 0x312   : > { %6724 = vmatprep.subr.mxu1 %v9287_v46  ;;  %6682 = vmatpush3.msra.mxu0 %v9251_v34 }
 0x313   : > { %6725 = vmatpush3.msra.mxu1 %v9287_v46  ;;  %6683 = vmatprep.subr.mxu0 %v9269_v47 }
 0x314   : > { %6726 = vmatprep.subr.mxu1 %v9300_v35  ;;  %6684 = vmatpush3.msra.mxu0 %v9269_v47  ;;  %v4095_v47 = vld [vmem:[#allocation8 + $0x140] sm:$0xff] }
 0x315   : > { %6727 = vmatpush3.msra.mxu1 %v9300_v35  ;;  %6685 = vmatprep.subr.mxu0 %v9283_v33 }
 0x316   : > { %6728 = vmatprep.subr.mxu1 %v9315_v32  ;;  %6686 = vmatpush3.msra.mxu0 %v9283_v33 }
 0x317   : > { %6729 = vmatpush3.msra.mxu1 %v9315_v32  ;;  %6687 = vmatprep.subr.mxu0 %v9298_v38 }
 0x318   : > { %6730 = vmatprep.subr.mxu1 %v9327_v30  ;;  %6688 = vmatpush3.msra.mxu0 %v9298_v38 }
 0x319   : > { %6731 = vmatpush3.msra.mxu1 %v9327_v30  ;;  %6689 = vmatprep.subr.mxu0 %v9313_v26 }
 0x31a   : > { %6732 = vmatprep.subr.mxu1 %v9339_v39  ;;  %6690 = vmatpush3.msra.mxu0 %v9313_v26 }
 0x31b   : > { %6733 = vmatpush3.msra.mxu1 %v9339_v39  ;;  %6691 = vmatprep.subr.mxu0 %v9325_v8 }
 0x31c   : > { %6734 = vmatprep.subr.mxu1 %v9351_v23  ;;  %6692 = vmatpush3.msra.mxu0 %v9325_v8 }
 0x31d   : > { %6735 = vmatpush3.msra.mxu1 %v9351_v23  ;;  %6693 = vmatprep.subr.mxu0 %v9337_v11 }
 0x31e   : > { %6736 = vmatprep.subr.mxu1 %v9363_v62  ;;  %6694 = vmatpush3.msra.mxu0 %v9337_v11 }
 0x31f   : > { %6737 = vmatpush3.msra.mxu1 %v9363_v62  ;;  %6695 = vmatprep.subr.mxu0 %v9349_v63 }
 0x320   : > { %6739 = vmatmul.mubr.f32.vlgmr.msra.gmra.mxu1 %v3496_v49  ;;  %6776 = vmatprep.subr.mxu1 %v9172_v3  ;;  %v9669_v49 = vand.u32 4294901760, %v4091_v15 }
 0x321   : > { %6696 = vmatpush3.msra.mxu0 %v9349_v63  ;;  %6777 = vmatpush3.msra.mxu1 %v9172_v3  ;;  %v4102_v3 = vld [vmem:[#allocation8 + $0x178] sm:$0xff] }
 0x322   : > { %6808 = vmatprep.mubr.f32.mxu1 %v9229_v44  ;;  %6697 = vmatprep.subr.mxu0 %v9361_v55 }
 0x323   : > { %6778 = vmatprep.subr.mxu1 %v9180_v14  ;;  %6698 = vmatpush3.msra.mxu0 %v9361_v55 }
 0x324   : > { %6779 = vmatpush3.msra.mxu1 %v9180_v14  ;;  %6699 = vmatprep.subr.mxu0 %v9373_v13  ;;  %v9526_v14 = vand.u32 4294901760, %v4102_v3 }
 0x325   : > { %6780 = vmatprep.subr.mxu1 %v9189_v9  ;;  %6700 = vmatpush3.msra.mxu0 %v9373_v13 }
 0x326   : > { %6781 = vmatpush3.msra.mxu1 %v9189_v9  ;;  %6701 = vmatprep.subr.mxu0 %v9383_v57  ;;  %v4100_v9 = vld [vmem:[#allocation8 + $0x168] sm:$0xff] }
 0x327   : > { %6782 = vmatprep.subr.mxu1 %v9198_v61  ;;  %6702 = vmatpush3.msra.mxu0 %v9383_v57  ;;  %v9543_v50 = vand.u32 4294901760, %v4100_v9 }
 0x328   : > { %6783 = vmatpush3.msra.mxu1 %v9198_v61  ;;  %6704 = vmatmul.mubr.f32.vlgmr.msra.gmra.mxu0 %v9416_v19  ;;  %v9539_v61 = vsub.f32 %v4102_v3, %v9526_v14 }
 0x329   : > { %6741 = vmatprep.subr.mxu0 %v9203_v25  ;;  %6784 = vmatprep.subr.mxu1 %v9210_v1 }
 0x32a   : > { %6742 = vmatpush3.msra.mxu0 %v9203_v25  ;;  %6773 = vmatprep.mubr.f32.mxu0 %v9229_v44  ;;  %v4099_v25 = vld [vmem:[#allocation8 + $0x160] sm:$0xff]  ;;  %v9562_v44 = vsub.f32 %v4100_v9, %v9543_v50  ;;  %v9681_v9 = vand.u32 4294901760, %v4090_v20 }
 0x32b   : > { %6785 = vmatpush3.msra.mxu1 %v9210_v1  ;;  %6743 = vmatprep.subr.mxu0 %v9217_v27  ;;  %v4098_v1 = vld [vmem:[#allocation8 + $0x158] sm:$0xff]  ;;  %v9552_v42 = vand.u32 4294901760, %v4099_v25 }
 0x32c   : > { %6786 = vmatprep.subr.mxu1 %v9222_v16  ;;  %6744 = vmatpush3.msra.mxu0 %v9217_v27  ;;  %v9550_v27 = vsub.f32 %v4101_v6, %v9534_v43 }
 0x32d   : > { %6787 = vmatpush3.msra.mxu1 %v9222_v16  ;;  %6745 = vmatprep.subr.mxu0 %v9234_v52  ;;  %v9557_v16 = vand.u32 4294901760, %v9539_v61 }
 0x32e   : > { %6788 = vmatprep.subr.mxu1 %v9239_v54  ;;  %6746 = vmatpush3.msra.mxu0 %v9234_v52  ;;  %v9564_v52 = vand.u32 4294901760, %v4098_v1  ;;  %v9574_v34 = vand.u32 4294901760, %v9550_v27 }
 0x32f   : > { %6789 = vmatpush3.msra.mxu1 %v9239_v54  ;;  %6747 = vmatprep.subr.mxu0 %v9248_v31  ;;  %v4096_v54 = vld [vmem:[#allocation8 + $0x148] sm:$0xff]  ;;  %v4215_v5 = vsub.f32 %v9539_v61, %v9557_v16 }
 0x330   : > { %6790 = vmatprep.subr.mxu1 %v9253_v59  ;;  %6748 = vmatpush3.msra.mxu0 %v9248_v31  ;;  %v9571_v31 = vand.u32 4294901760, %v9070_v56  ;;  %v9593_v33 = vand.u32 4294901760, %v4096_v54 }
 0x331   : > { %6791 = vmatpush3.msra.mxu1 %v9253_v59  ;;  %6749 = vmatprep.subr.mxu0 %v9266_v22  ;;  %v9577_v59 = vsub.f32 %v4099_v25, %v9552_v42  ;;  %v4216_v26 = vand.u32 4294901760, %v4215_v5  ;;  %v9691_v5 = vsub.f32 %v4091_v15, %v9669_v49 }
 0x332   : > { %6792 = vmatprep.subr.mxu1 %v9273_v28  ;;  %6750 = vmatpush3.msra.mxu0 %v9266_v22  ;;  %v9583_v22 = vand.u32 4294901760, %v4097_v37  ;;  %v9606_v38 = vsub.f32 %v9070_v56, %v9571_v31  ;;  %v9623_v8 = vsub.f32 %v4096_v54, %v9593_v33 }
 0x333   : > { %6793 = vmatpush3.msra.mxu1 %v9273_v28  ;;  %6751 = vmatprep.subr.mxu0 %v9280_v40  ;;  %v9588_v28 = vand.u32 4294901760, %v9562_v44 }
 0x334   : > { %6794 = vmatprep.subr.mxu1 %v9287_v46  ;;  %6752 = vmatpush3.msra.mxu0 %v9280_v40  ;;  %v9591_v40 = vsub.f32 %v4098_v1, %v9564_v52  ;;  %v9647_v57 = vand.u32 4294901760, %v9623_v8  ;;  %v4088_v1 = vld [vmem:[#allocation8 + $0x108] sm:$0xff] }
 0x335   : > { %6795 = vmatpush3.msra.mxu1 %v9287_v46  ;;  %6753 = vmatprep.subr.mxu0 %v9293_v18  ;;  %v4222_v46 = vsub.f32 %v9550_v27, %v9574_v34 }
 0x336   : > { %6796 = vmatprep.subr.mxu1 %v9300_v35  ;;  %6754 = vmatpush3.msra.mxu0 %v9293_v18  ;;  %v9602_v18 = vand.u32 4294901760, %v9577_v59  ;;  %v9620_v56 = vand.u32 4294901760, %v9591_v40  ;;  %v4257_v41 = vsub.f32 %v9623_v8, %v9647_v57 }
 0x337   : > { %6797 = vmatpush3.msra.mxu1 %v9300_v35  ;;  %6755 = vmatprep.subr.mxu0 %v9306_v45  ;;  %v9608_v35 = vand.u32 4294901760, %v4095_v47  ;;  %v4223_v11 = vand.u32 4294901760, %v4222_v46  ;;  %v4087_v46 = vld [vmem:[#allocation8 + $0x100] sm:$0xff] }
 0x338   : > { %6798 = vmatprep.subr.mxu1 %v9315_v32  ;;  %6756 = vmatpush3.msra.mxu0 %v9306_v45  ;;  %v4094_v45 = vld [vmem:[#allocation8 + $0x138] sm:$0xff]  ;;  %v4243_v13 = vsub.f32 %v9591_v40, %v9620_v56 }
 0x339   : > { %6799 = vmatpush3.msra.mxu1 %v9315_v32  ;;  %6757 = vmatprep.subr.mxu0 %v9322_v17  ;;  %v9613_v32 = vsub.f32 %v4097_v37, %v9583_v22  ;;  %v9635_v63 = vsub.f32 %v4095_v47, %v9608_v35  ;;  %v9693_v47 = vand.u32 4294901760, %v4089_v60 }
 0x33a   : > { %6800 = vmatprep.subr.mxu1 %v9327_v30  ;;  %6758 = vmatpush3.msra.mxu0 %v9322_v17  ;;  %v4229_v17 = vsub.f32 %v9562_v44, %v9588_v28 }
 0x33b   : > { %6801 = vmatpush3.msra.mxu1 %v9327_v30  ;;  %6759 = vmatprep.subr.mxu0 %v9334_v53  ;;  %v4093_v30 = vld [vmem:[#allocation8 + $0x130] sm:$0xff]  ;;  %v9661_v4 = vand.u32 4294901760, %v9635_v63 }
 0x33c   : > { %6802 = vmatprep.subr.mxu1 %v9339_v39  ;;  %6760 = vmatpush3.msra.mxu0 %v9334_v53  ;;  %v9627_v53 = vand.u32 4294901760, %v4094_v45  ;;  %v9641_v55 = vand.u32 4294901760, %v4093_v30 }
 0x33d   : > { %6803 = vmatpush3.msra.mxu1 %v9339_v39  ;;  %6761 = vmatprep.subr.mxu0 %v9346_v12  ;;  %v4236_v39 = vsub.f32 %v9577_v59, %v9602_v18  ;;  %v4264_v25 = vsub.f32 %v9635_v63, %v9661_v4 }
 0x33e   : > { %6804 = vmatprep.subr.mxu1 %v9351_v23  ;;  %6762 = vmatpush3.msra.mxu0 %v9346_v12  ;;  %v4193_v12 = vand.u32 4294901760, %v9606_v38  ;;  %v9652_v7 = vsub.f32 %v4094_v45, %v9627_v53  ;;  %v9667_v19 = vsub.f32 %v4093_v30, %v9641_v55 }
 0x33f   : > { %6805 = vmatpush3.msra.mxu1 %v9351_v23  ;;  %6763 = vmatprep.subr.mxu0 %v9358_v21  ;;  %v4092_v23 = vld [vmem:[#allocation8 + $0x128] sm:$0xff]  ;;  %v4265_v30 = vand.u32 4294901760, %v4264_v25 }
 0x340   : > { %6806 = vmatprep.subr.mxu1 %v9363_v62  ;;  %6764 = vmatpush3.msra.mxu0 %v9358_v21  ;;  %v9639_v21 = vand.u32 4294901760, %v9613_v32  ;;  %v9654_v0 = vand.u32 4294901760, %v4092_v23  ;;  %v4194_v2 = vsub.f32 %v9606_v38, %v4193_v12  ;;  %v9676_v3 = vand.u32 4294901760, %v9652_v7 }
 0x341   : > { %6807 = vmatpush3.msra.mxu1 %v9363_v62  ;;  %6765 = vmatprep.subr.mxu0 %v9370_v48  ;;  %v4230_v62 = vand.u32 4294901760, %v4229_v17  ;;  %v9688_v54 = vand.u32 4294901760, %v9667_v19  ;;  %v9705_v17 = vand.u32 4294901760, %v4088_v1 }
 0x342   : > { %6809 = vmatmul.mubr.f32.vlgmr.msra.gmra.mxu1 %v9408_v36  ;;  %6846 = vmatprep.subr.mxu1 %v4216_v26  ;;  %v4250_v58 = vsub.f32 %v9613_v32, %v9639_v21  ;;  %v9679_v6 = vsub.f32 %v4092_v23, %v9654_v0  ;;  %v9715_v23 = vsub.f32 %v4089_v60, %v9693_v47 }
 0x343   : > { %6766 = vmatpush3.msra.mxu0 %v9370_v48  ;;  %6847 = vmatpush3.msra.mxu1 %v4216_v26  ;;  %v4237_v48 = vand.u32 4294901760, %v4236_v39  ;;  %v9703_v26 = vsub.f32 %v4090_v20, %v9681_v9  ;;  %v9712_v39 = vand.u32 4294901760, %v9691_v5 }
 0x344   : > { %6878 = vmatprep.mubr.f32.mxu1 %v9571_v31  ;;  %6767 = vmatprep.subr.mxu0 %v9380_v29  ;;  %v4251_v37 = vand.u32 4294901760, %v4250_v58  ;;  %v9700_v45 = vand.u32 4294901760, %v9679_v6 }
 0x345   : > { %6848 = vmatprep.subr.mxu1 %v4223_v11  ;;  %6768 = vmatpush3.msra.mxu0 %v9380_v29  ;;  %v4244_v29 = vand.u32 4294901760, %v4243_v13  ;;  %v4292_v58 = vsub.f32 %v9691_v5, %v9712_v39 }
 0x346   : > { %6849 = vmatpush3.msra.mxu1 %v4223_v11  ;;  %6769 = vmatprep.subr.mxu0 %v9390_v51  ;;  %v4278_v11 = vsub.f32 %v9667_v19, %v9688_v54  ;;  %v4285_v15 = vsub.f32 %v9679_v6, %v9700_v45 }
 0x347   : > { %6850 = vmatprep.subr.mxu1 %v4230_v62  ;;  %6770 = vmatpush3.msra.mxu0 %v9390_v51  ;;  %v4195_v51 = vand.u32 4294901760, %v4194_v2  ;;  %v9727_v2 = vsub.f32 %v4088_v1, %v9705_v17  ;;  %v4293_v1 = vand.u32 4294901760, %v4292_v58 }
 0x348   : > { %6851 = vmatpush3.msra.mxu1 %v4230_v62  ;;  %6771 = vmatprep.subr.mxu0 %v9397_v10  ;;  %v9717_v62 = vand.u32 4294901760, %v4087_v46  ;;  %v4279_v20 = vand.u32 4294901760, %v4278_v11  ;;  %v4286_v60 = vand.u32 4294901760, %v4285_v15 }
 0x349   : > { %6852 = vmatprep.subr.mxu1 %v4237_v48  ;;  %6772 = vmatpush3.msra.mxu0 %v9397_v10  ;;  %v4258_v10 = vand.u32 4294901760, %v4257_v41  ;;  %v9744_v25 = vand.u32 4294901760, %v9727_v2 }
 0x34a   : > { %6853 = vmatpush3.msra.mxu1 %v4237_v48  ;;  %6774 = vmatmul.mubr.f32.vlgmr.msra.gmra.mxu0 %v9408_v36  ;;  %v4271_v36 = vsub.f32 %v9652_v7, %v9676_v3  ;;  %v9724_v48 = vand.u32 4294901760, %v9703_v26  ;;  %v9737_v41 = vsub.f32 %v4087_v46, %v9717_v62 }
 0x34b   : > { %6811 = vmatprep.subr.mxu0 %v9526_v14  ;;  %6854 = vmatprep.subr.mxu1 %v4244_v29 }
 0x34c   : > { %6812 = vmatpush3.msra.mxu0 %v9526_v14  ;;  %6843 = vmatprep.mubr.f32.mxu0 %v4195_v51  ;;  %v4272_v13 = vand.u32 4294901760, %v4271_v36  ;;  %v4299_v51 = vsub.f32 %v9703_v26, %v9724_v48  ;;  %v4313_v36 = vsub.f32 %v9727_v2, %v9744_v25 }
 0x34d   : > { %6855 = vmatpush3.msra.mxu1 %v4244_v29  ;;  %6813 = vmatprep.subr.mxu0 %v9534_v43  ;;  %v9734_v29 = vand.u32 4294901760, %v9715_v23 }
 0x34e   : > { %6856 = vmatprep.subr.mxu1 %v4251_v37  ;;  %6814 = vmatpush3.msra.mxu0 %v9534_v43  ;;  %v4300_v46 = vand.u32 4294901760, %v4299_v51  ;;  %v4314_v15 = vand.u32 4294901760, %v4313_v36 }
 0x34f   : > { %6857 = vmatpush3.msra.mxu1 %v4251_v37  ;;  %6815 = vmatprep.subr.mxu0 %v9543_v50  ;;  %v4306_v37 = vsub.f32 %v9715_v23, %v9734_v29 }
 0x350   : > { %6858 = vmatprep.subr.mxu1 %v4258_v10  ;;  %6816 = vmatpush3.msra.mxu0 %v9543_v50 }
 0x351   : > { %6859 = vmatpush3.msra.mxu1 %v4258_v10  ;;  %6817 = vmatprep.subr.mxu0 %v9552_v42  ;;  %v9751_v10 = vand.u32 4294901760, %v9737_v41 }
 0x352   : > { %6860 = vmatprep.subr.mxu1 %v4265_v30  ;;  %6818 = vmatpush3.msra.mxu0 %v9552_v42 }
 0x353   : > { %6861 = vmatpush3.msra.mxu1 %v4265_v30  ;;  %6819 = vmatprep.subr.mxu0 %v9564_v52  ;;  %v4307_v30 = vand.u32 4294901760, %v4306_v37  ;;  %v4320_v11 = vsub.f32 %v9737_v41, %v9751_v10 }
 0x354   : > { %6862 = vmatprep.subr.mxu1 %v4272_v13  ;;  %6820 = vmatpush3.msra.mxu0 %v9564_v52 }
 0x355   : > { %6863 = vmatpush3.msra.mxu1 %v4272_v13  ;;  %6821 = vmatprep.subr.mxu0 %v9583_v22  ;;  %v9762_v13 = vand.u32 4294901760, %v9078_v24 }
 0x356   : > { %6864 = vmatprep.subr.mxu1 %v4279_v20  ;;  %6822 = vmatpush3.msra.mxu0 %v9583_v22 }
 0x357   : > { %6865 = vmatpush3.msra.mxu1 %v4279_v20  ;;  %6823 = vmatprep.subr.mxu0 %v9593_v33  ;;  %v4321_v20 = vand.u32 4294901760, %v4320_v11  ;;  %v9770_v58 = vsub.f32 %v9078_v24, %v9762_v13 }
 0x358   : > { %6866 = vmatprep.subr.mxu1 %v4286_v60  ;;  %6824 = vmatpush3.msra.mxu0 %v9593_v33 }
 0x359   : > { %6867 = vmatpush3.msra.mxu1 %v4286_v60  ;;  %6825 = vmatprep.subr.mxu0 %v9608_v35  ;;  %v4203_v60 = vand.u32 4294901760, %v9770_v58 }
 0x35a   : > { %6868 = vmatprep.subr.mxu1 %v4293_v1  ;;  %6826 = vmatpush3.msra.mxu0 %v9608_v35 }
 0x35b   : > { %6869 = vmatpush3.msra.mxu1 %v4293_v1  ;;  %6827 = vmatprep.subr.mxu0 %v9627_v53  ;;  %v4204_v24 = vsub.f32 %v9770_v58, %v4203_v60 }
 0x35c   : > { %6870 = vmatprep.subr.mxu1 %v4300_v46  ;;  %6828 = vmatpush3.msra.mxu0 %v9627_v53 }
 0x35d   : > { %6871 = vmatpush3.msra.mxu1 %v4300_v46  ;;  %6829 = vmatprep.subr.mxu0 %v9641_v55 }
 0x35e   : > { %6872 = vmatprep.subr.mxu1 %v4307_v30  ;;  %6830 = vmatpush3.msra.mxu0 %v9641_v55 }
 0x35f   : > { %6873 = vmatpush3.msra.mxu1 %v4307_v30  ;;  %6831 = vmatprep.subr.mxu0 %v9654_v0 }
 0x360   : > { %6874 = vmatprep.subr.mxu1 %v4314_v15  ;;  %6832 = vmatpush3.msra.mxu0 %v9654_v0 }
 0x361   : > { %6875 = vmatpush3.msra.mxu1 %v4314_v15  ;;  %6833 = vmatprep.subr.mxu0 %v9669_v49 }
 0x362   : > { %6876 = vmatprep.subr.mxu1 %v4321_v20  ;;  %6834 = vmatpush3.msra.mxu0 %v9669_v49 }
 0x363   : > { %6877 = vmatpush3.msra.mxu1 %v4321_v20  ;;  %6835 = vmatprep.subr.mxu0 %v9681_v9 }
 0x364   : > { %6879 = vmatmul.mubr.f32.vlgmr.msra.gmra.mxu1 %v9762_v13  ;;  %6916 = vmatprep.subr.mxu1 %v9526_v14 }
 0x365   : > { %6836 = vmatpush3.msra.mxu0 %v9681_v9  ;;  %6917 = vmatpush3.msra.mxu1 %v9526_v14 }
 0x366   : > { %6948 = vmatprep.mubr.f32.mxu1 %v4193_v12  ;;  %6837 = vmatprep.subr.mxu0 %v9693_v47  ;;  %v4205_v12 = vand.u32 4294901760, %v4204_v24 }
 0x367   : > { %6918 = vmatprep.subr.mxu1 %v9534_v43  ;;  %6838 = vmatpush3.msra.mxu0 %v9693_v47 }
 0x368   : > { %6919 = vmatpush3.msra.mxu1 %v9534_v43  ;;  %6839 = vmatprep.subr.mxu0 %v9705_v17 }
 0x369   : > { %6920 = vmatprep.subr.mxu1 %v9543_v50  ;;  %6840 = vmatpush3.msra.mxu0 %v9705_v17 }
 0x36a   : > { %6921 = vmatpush3.msra.mxu1 %v9543_v50  ;;  %6841 = vmatprep.subr.mxu0 %v9717_v62 }
 0x36b   : > { %6922 = vmatprep.subr.mxu1 %v9552_v42  ;;  %6842 = vmatpush3.msra.mxu0 %v9717_v62 }
 0x36c   : > { %6923 = vmatpush3.msra.mxu1 %v9552_v42  ;;  %6844 = vmatmul.mubr.f32.vlgmr.msra.gmra.mxu0 %v4205_v12 }
 0x36d   : > { %6881 = vmatprep.subr.mxu0 %v9539_v61  ;;  %6924 = vmatprep.subr.mxu1 %v9564_v52 }
 0x36e   : > { %6882 = vmatpush3.msra.mxu0 %v9539_v61  ;;  %6913 = vmatprep.mubr.f32.mxu0 %v9606_v38 }
 0x36f   : > { %6925 = vmatpush3.msra.mxu1 %v9564_v52  ;;  %6883 = vmatprep.subr.mxu0 %v9550_v27 }
 0x370   : > { %6926 = vmatprep.subr.mxu1 %v9583_v22  ;;  %6884 = vmatpush3.msra.mxu0 %v9550_v27 }
 0x371   : > { %6927 = vmatpush3.msra.mxu1 %v9583_v22  ;;  %6885 = vmatprep.subr.mxu0 %v9562_v44 }
 0x372   : > { %6928 = vmatprep.subr.mxu1 %v9593_v33  ;;  %6886 = vmatpush3.msra.mxu0 %v9562_v44 }
 0x373   : > { %6929 = vmatpush3.msra.mxu1 %v9593_v33  ;;  %6887 = vmatprep.subr.mxu0 %v9577_v59 }
 0x374   : > { %6930 = vmatprep.subr.mxu1 %v9608_v35  ;;  %6888 = vmatpush3.msra.mxu0 %v9577_v59 }
 0x375   : > { %6931 = vmatpush3.msra.mxu1 %v9608_v35  ;;  %6889 = vmatprep.subr.mxu0 %v9591_v40 }
 0x376   : > { %6932 = vmatprep.subr.mxu1 %v9627_v53  ;;  %6890 = vmatpush3.msra.mxu0 %v9591_v40 }
 0x377   : > { %6933 = vmatpush3.msra.mxu1 %v9627_v53  ;;  %6891 = vmatprep.subr.mxu0 %v9613_v32 }
 0x378   : > { %6934 = vmatprep.subr.mxu1 %v9641_v55  ;;  %6892 = vmatpush3.msra.mxu0 %v9613_v32 }
 0x379   : > { %6935 = vmatpush3.msra.mxu1 %v9641_v55  ;;  %6893 = vmatprep.subr.mxu0 %v9623_v8 }
 0x37a   : > { %6936 = vmatprep.subr.mxu1 %v9654_v0  ;;  %6894 = vmatpush3.msra.mxu0 %v9623_v8 }
 0x37b   : > { %6937 = vmatpush3.msra.mxu1 %v9654_v0  ;;  %6895 = vmatprep.subr.mxu0 %v9635_v63 }
 0x37c   : > { %6938 = vmatprep.subr.mxu1 %v9669_v49  ;;  %6896 = vmatpush3.msra.mxu0 %v9635_v63 }
 0x37d   : > { %6939 = vmatpush3.msra.mxu1 %v9669_v49  ;;  %6897 = vmatprep.subr.mxu0 %v9652_v7 }
 0x37e   : > { %6940 = vmatprep.subr.mxu1 %v9681_v9  ;;  %6898 = vmatpush3.msra.mxu0 %v9652_v7 }
 0x37f   : > { %6941 = vmatpush3.msra.mxu1 %v9681_v9  ;;  %6899 = vmatprep.subr.mxu0 %v9667_v19 }
 0x380   : > { %6942 = vmatprep.subr.mxu1 %v9693_v47  ;;  %6900 = vmatpush3.msra.mxu0 %v9667_v19 }
 0x381   : > { %6943 = vmatpush3.msra.mxu1 %v9693_v47  ;;  %6901 = vmatprep.subr.mxu0 %v9679_v6 }
 0x382   : > { %6944 = vmatprep.subr.mxu1 %v9705_v17  ;;  %6902 = vmatpush3.msra.mxu0 %v9679_v6 }
 0x383   : > { %6945 = vmatpush3.msra.mxu1 %v9705_v17  ;;  %6903 = vmatprep.subr.mxu0 %v9691_v5 }
 0x384   : > { %6946 = vmatprep.subr.mxu1 %v9717_v62  ;;  %6904 = vmatpush3.msra.mxu0 %v9691_v5 }
 0x385   : > { %6947 = vmatpush3.msra.mxu1 %v9717_v62  ;;  %6905 = vmatprep.subr.mxu0 %v9703_v26 }
 0x386   : > { %6949 = vmatmul.mubr.f32.vlgmr.msra.gmra.mxu1 %v4203_v60  ;;  %6986 = vmatprep.subr.mxu1 %v9526_v14 }
 0x387   : > { %6906 = vmatpush3.msra.mxu0 %v9703_v26  ;;  %6987 = vmatpush3.msra.mxu1 %v9526_v14  ;;  %v6425_v14 = vpop.f32.mrf.mxu0 }
 0x388   : > { %7018 = vmatprep.mubr.f32.mxu1 %v9571_v31  ;;  %6907 = vmatprep.subr.mxu0 %v9715_v23 }
 0x389   : > { %6988 = vmatprep.subr.mxu1 %v9534_v43  ;;  %6908 = vmatpush3.msra.mxu0 %v9715_v23  ;;  %v2806_v61 = vpop.f32.mrf.mxu0 }
 0x38a   : > { %6989 = vmatpush3.msra.mxu1 %v9534_v43  ;;  %6909 = vmatprep.subr.mxu0 %v9727_v2  ;;  %v6460_v43 = vpop.f32.mrf.mxu1 }
 0x38b   : > { %6990 = vmatprep.subr.mxu1 %v9543_v50  ;;  %6910 = vmatpush3.msra.mxu0 %v9727_v2 }
 0x38c   : > { %6991 = vmatpush3.msra.mxu1 %v9543_v50  ;;  %6911 = vmatprep.subr.mxu0 %v9737_v41  ;;  %v6495_v50 = vpop.f32.mrf.mxu0  ;;  %v2967_v27 = vpop.f32.mrf.mxu1 }
 0x38d   : > { %6992 = vmatprep.subr.mxu1 %v9552_v42  ;;  %6912 = vmatpush3.msra.mxu0 %v9737_v41 }
 0x38e   : > { %6993 = vmatpush3.msra.mxu1 %v9552_v42  ;;  %6914 = vmatmul.mubr.f32.vlgmr.msra.gmra.mxu0 %v9770_v58  ;;  %v6530_v42 = vpop.f32.mrf.mxu1 }
 0x38f   : > { %6951 = vmatprep.subr.mxu0 %v9557_v16  ;;  %6994 = vmatprep.subr.mxu1 %v9564_v52 }
 0x390   : > { %6952 = vmatpush3.msra.mxu0 %v9557_v16  ;;  %6983 = vmatprep.mubr.f32.mxu0 %v9571_v31  ;;  %v3077_v16 = vpop.f32.mrf.mxu0 }
 0x391   : > { %6995 = vmatpush3.msra.mxu1 %v9564_v52  ;;  %6953 = vmatprep.subr.mxu0 %v9574_v34  ;;  %v3173_v52 = vpop.f32.mrf.mxu1 }
 0x392   : > { %6996 = vmatprep.subr.mxu1 %v9583_v22  ;;  %6954 = vmatpush3.msra.mxu0 %v9574_v34 }
 0x393   : > { %6997 = vmatpush3.msra.mxu1 %v9583_v22  ;;  %6955 = vmatprep.subr.mxu0 %v9588_v28 }
 0x394   : > { %6998 = vmatprep.subr.mxu1 %v9593_v33  ;;  %6956 = vmatpush3.msra.mxu0 %v9588_v28 }
 0x395   : > { %6999 = vmatpush3.msra.mxu1 %v9593_v33  ;;  %6957 = vmatprep.subr.mxu0 %v9602_v18 }
 0x396   : > { %7000 = vmatprep.subr.mxu1 %v9608_v35  ;;  %6958 = vmatpush3.msra.mxu0 %v9602_v18  ;;  %v2974_v18 = vadd.f32 %v6460_v43, %v6425_v14 }
 0x397   : > { %7001 = vmatpush3.msra.mxu1 %v9608_v35  ;;  %6959 = vmatprep.subr.mxu0 %v9620_v56  ;;  %v2968_v35 = vadd.f32 %v2967_v27, %v2806_v61  ;;  %v4980_v61 = vld [vmem:[%s9993_s5] ss:$0 sm:$0xff] }
 0x398   : > { %7002 = vmatprep.subr.mxu1 %v9627_v53  ;;  %6960 = vmatpush3.msra.mxu0 %v9620_v56  ;;  %v3085_v32 = vadd.f32 %v6495_v50, %v2974_v18 }
 0x399   : > { %7003 = vmatpush3.msra.mxu1 %v9627_v53  ;;  %6961 = vmatprep.subr.mxu0 %v9639_v21  ;;  %v3078_v53 = vadd.f32 %v3077_v16, %v2968_v35 }
 0x39a   : > { %7004 = vmatprep.subr.mxu1 %v9641_v55  ;;  %6962 = vmatpush3.msra.mxu0 %v9639_v21  ;;  %v3182_v21 = vadd.f32 %v6530_v42, %v3085_v32 }
 0x39b   : > { %7005 = vmatpush3.msra.mxu1 %v9641_v55  ;;  %6963 = vmatprep.subr.mxu0 %v9647_v57  ;;  %v3174_v7 = vadd.f32 %v3173_v52, %v3078_v53 }
 0x39c   : > { %7006 = vmatprep.subr.mxu1 %v9654_v0  ;;  %6964 = vmatpush3.msra.mxu0 %v9647_v57  ;;  %v6600_v31 = vpop.f32.mrf.mxu1 }
 0x39d   : > { %7007 = vmatpush3.msra.mxu1 %v9654_v0  ;;  %6965 = vmatprep.subr.mxu0 %v9661_v4 }
 0x39e   : > { %7008 = vmatprep.subr.mxu1 %v9669_v49  ;;  %6966 = vmatpush3.msra.mxu0 %v9661_v4  ;;  %v3393_v22 = vpop.f32.mrf.mxu1 }
 0x39f   : > { %7009 = vmatpush3.msra.mxu1 %v9669_v49  ;;  %6967 = vmatprep.subr.mxu0 %v9676_v3 }
 0x3a0   : > { %7010 = vmatprep.subr.mxu1 %v9681_v9  ;;  %6968 = vmatpush3.msra.mxu0 %v9676_v3 }
 0x3a1   : > { %7011 = vmatpush3.msra.mxu1 %v9681_v9  ;;  %6969 = vmatprep.subr.mxu0 %v9688_v54 }
 0x3a2   : > { %7012 = vmatprep.subr.mxu1 %v9693_v47  ;;  %6970 = vmatpush3.msra.mxu0 %v9688_v54 }
 0x3a3   : > { %7013 = vmatpush3.msra.mxu1 %v9693_v47  ;;  %6971 = vmatprep.subr.mxu0 %v9700_v45 }
 0x3a4   : > { %7014 = vmatprep.subr.mxu1 %v9705_v17  ;;  %6972 = vmatpush3.msra.mxu0 %v9700_v45  ;;  %v6565_v44 = vpop.f32.mrf.mxu0 }
 0x3a5   : > { %7015 = vmatpush3.msra.mxu1 %v9705_v17  ;;  %6973 = vmatprep.subr.mxu0 %v9712_v39  ;;  %v3307_v57 = vadd.f32 %v6565_v44, %v3182_v21 }
 0x3a6   : > { %7016 = vmatprep.subr.mxu1 %v9717_v62  ;;  %6974 = vmatpush3.msra.mxu0 %v9712_v39  ;;  %v3300_v34 = vpop.f32.mrf.mxu0 }
 0x3a7   : > { %7017 = vmatpush3.msra.mxu1 %v9717_v62  ;;  %6975 = vmatprep.subr.mxu0 %v9724_v48  ;;  %v3301_v19 = vadd.f32 %v3300_v34, %v3174_v7  ;;  %v3400_v3 = vadd.f32 %v6600_v31, %v3307_v57  ;;  %v10127_v34 = vld [vmem:[#allocation23_spill] sm:$0xff] }
 0x3a8   : > { %7019 = vmatmul.mubr.f32.vlgmr.msra.gmra.mxu1 %v9762_v13  ;;  %6976 = vmatpush3.msra.mxu0 %v9724_v48 }
 0x3a9   : > { %6977 = vmatprep.subr.mxu0 %v9734_v29  ;;  %v3394_v54 = vadd.f32 %v3393_v22, %v3301_v19 }
 0x3aa   : > { %6978 = vmatpush3.msra.mxu0 %v9734_v29 }
 0x3ab   : > { %6979 = vmatprep.subr.mxu0 %v9744_v25 }
 0x3ac   : > { %6980 = vmatpush3.msra.mxu0 %v9744_v25 }
 0x3ad   : > { %6981 = vmatprep.subr.mxu0 %v9751_v10 }
 0x3ae   : > { %6982 = vmatpush3.msra.mxu0 %v9751_v10 }
 0x3af   : > { %6984 = vmatmul.mubr.f32.vlgmr.msra.gmra.mxu0 %v9762_v13 }
 0x3be   : > { %v6670_v28 = vpop.f32.mrf.mxu1 }
 0x3c0   : > { %v3651_v38 = vpop.f32.mrf.mxu1 }
 0x3c6   : > { %v6635_v59 = vpop.f32.mrf.mxu0 }
 0x3c7   : > { %v3501_v9 = vadd.f32 %v6635_v59, %v3400_v3 }
 0x3c8   : > { %v3490_v40 = vpop.f32.mrf.mxu0 }
 0x3c9   : > { %v3491_v45 = vadd.f32 %v3490_v40, %v3394_v54  ;;  %v3658_v17 = vadd.f32 %v6670_v28, %v3501_v9  ;;  %v10128_v28 = vld [vmem:[#allocation22_spill] sm:$0xff] }
 0x3cb   : > { %v3652_v62 = vadd.f32 %v3651_v38, %v3491_v45 }
 0x3e0   : > { %v6740_v56 = vpop.f32.mrf.mxu1 }
 0x3e2   : > { %v3857_v55 = vpop.f32.mrf.mxu1 }
 0x3e8   : > { %v6705_v33 = vpop.f32.mrf.mxu0 }
 0x3e9   : > { %v3769_v23 = vadd.f32 %v6705_v33, %v3658_v17 }
 0x3ea   : > { %v3761_v8 = vpop.f32.mrf.mxu0 }
 0x3eb   : > { %v3762_v41 = vadd.f32 %v3761_v8, %v3652_v62  ;;  %v3866_v1 = vadd.f32 %v6740_v56, %v3769_v23 }
 0x3ed   : > { %v3858_v36 = vadd.f32 %v3857_v55, %v3762_v41 }
 0x402   : > { %v6810_v0 = vpop.f32.mrf.mxu1 }
 0x404   : > { %v4077_v6 = vpop.f32.mrf.mxu1 }
 0x40a   : > { %v6775_v63 = vpop.f32.mrf.mxu0 }
 0x40b   : > { %v3991_v46 = vadd.f32 %v6775_v63, %v3866_v1 }
 0x40c   : > { %v3984_v4 = vpop.f32.mrf.mxu0 }
 0x40d   : > { %v3985_v15 = vadd.f32 %v3984_v4, %v3858_v36  ;;  %v4084_v24 = vadd.f32 %v6810_v0, %v3991_v46 }
 0x40f   : > { %v4078_v50 = vadd.f32 %v4077_v6, %v3985_v15 }
 0x424   : > { %v6880_v5 = vpop.f32.mrf.mxu1 }
 0x426   : > { %v4358_v39 = vpop.f32.mrf.mxu1 }
 0x42c   : > { %v6845_v49 = vpop.f32.mrf.mxu0 }
 0x42d   : > { %v4365_v48 = vadd.f32 %v6880_v5, %v6845_v49 }
 0x42e   : > { %v4197_v47 = vpop.f32.mrf.mxu0 }
 0x42f   : > { %v4359_v51 = vadd.f32 %v4358_v39, %v4197_v47 }
 0x446   : > { %v6950_v2 = vpop.f32.mrf.mxu1 }
 0x448   : > { %v4564_v10 = vpop.f32.mrf.mxu1 }
 0x44e   : > { %v6915_v26 = vpop.f32.mrf.mxu0 }
 0x44f   : > { %v4476_v25 = vadd.f32 %v6915_v26, %v4365_v48 }
 0x450   : > { %v4468_v29 = vpop.f32.mrf.mxu0 }
 0x451   : > { %v4469_v37 = vadd.f32 %v4468_v29, %v4359_v51  ;;  %v4573_v30 = vadd.f32 %v6950_v2, %v4476_v25 }
 0x453   : > { %v4565_v58 = vadd.f32 %v4564_v10, %v4469_v37 }
 0x468   : > { %v7020_v11 = vpop.f32.mrf.mxu1 }
 0x46a   : > { %v4784_v43 = vpop.f32.mrf.mxu1 }
 0x46f   : > { %v6985_v13 = vpop.f32.mrf.mxu0 }
 0x470   : > { %v4698_v20 = vadd.f32 %v6985_v13, %v4573_v30 }
 0x471   : > { %v4691_v60 = vpop.f32.mrf.mxu0 }
 0x472   : > { %v4791_v12 = vadd.f32 %v7020_v11, %v4698_v20  ;;  %v4692_v14 = vadd.f32 %v4691_v60, %v4565_v58 }
 0x474   : > { %v4795_v27 = vadd.f32 %v4791_v12, %v4084_v24  ;;  %v4785_v42 = vadd.f32 %v4784_v43, %v4692_v14 }
 0x476   : > { %v4804_v16 = vadd.f32 %v4980_v61, %v4795_v27  ;;  %v4794_v44 = vadd.f32 %v4785_v42, %v4078_v50 }
 0x478   : > { %v4806_v52 = vmax.f32 %v4804_v16, 0.0  ;;  %v4803_v31 = vadd.f32 %v4980_v61, %v4794_v44 }
 0x47a   : > { %v4808_v59 = vadd.f32 %v4806_v52, %v10127_v34  ;;  %v4805_v22 = vmax.f32 %v4803_v31, 0.0 }
 0x47c   : > { %4810 = vst [vmem:[%s369_s13 + $0x8] sm:$0xff] %v4808_v59  ;;  %v4807_v40 = vadd.f32 %v4805_v22, %v10128_v28 }
 0x47e   : > { %4809 = vst [vmem:[%s369_s13] sm:$0xff] %v4807_v40 }
 0x47f   : > { %7239 = shalt.err (!%p7236_p12)
}
 0x480   : > { %s7240_s0 = scalar_lea.hbm %s9937_s20, 256  ;;  %s7244_s25 = scalar_lea.hbm %s9994_s6, 512 }
 0x481   : > { %p7241_p13 = scmp.ne.s32.totalorder %s9937_s20, %s7240_s0  ;;  %p7245_p10 = scmp.lt.s32.totalorder %s9937_s20, %s9994_s6 }
 0x482   : > { %p7246_p11 = scmp.lt.s32.totalorder %s7244_s25, %s7240_s0 }
 0x483   : > { %p7242_p0 = pnand %p7241_p13, %p7463_p3 }
 0x484   : > { %p7247_p1 = por %p7246_p11, %p7245_p10 }
 0x485   : > { %p7243_p5 = pneg %p7242_p0 }
 0x487   : > { %p7248_p4 = pnand %p7247_p1, %p7243_p5 }
 0x489   : > { %7251 = shalt.err (!%p7248_p4)
}
 0x48a   : > { %s7329_s7 = smov 128   ;;  %s7330_s14 = smov 8  }
 0x48b   : > { %7034 = dma.vmem_to_hbm [thread:$0]  (%p7463_p3), %s9939_s16, 256, %s9937_s20, %s4812_s24, %s7329_s7, %s7329_s7, %s7330_s14  }
 0x48c PF: > { %s10130_s29 = sld [smem:[#allocation18_spill]]  ;;  %s4842_s15 = sand.u32 1, %s7298_s21  }
 0x48d   : > { %s4843_s28 = scalar_lea.sflag [#allocation4], %s4842_s15 }
 0x492   : > { %p10131_p8 = scmp.ge.s32.totalorder %s10130_s29, 2 }
 0x494   : > { %p7051_p2 = pnand %p10131_p8, %p7411_p6 }
 0x496   : > { %p7052_p7 = pneg %p7051_p2 }
 0x498   : > { %7293 = dma.done.wait (%p7052_p7), %s4843_s28, 256  }
 0x499   : > { %7295 = vsyncadd (%p7052_p7), %s4843_s28, 4294967040  ;;  %s26_s26 = sadd.s32 1, %s10130_s29   ;;  %s10132_s11 = sld [smem:[#allocation16_spill]] }
 0x49a   : > { %p23_p9 = scmp.ge.s32.totalorder %s26_s26, 4   ;;  %s10133_s23 = sld [smem:[#allocation21_spill]] }
 0x49b   : > { %s10134_s24 = sld [smem:[#allocation17_spill]]  ;;  %s10136_s21 = smov %s7302_s22 }
 0x49c   : > { %s10135_s25 = sld [smem:[#allocation20_spill]]  ;;  %25 = sbr.rel (!%p23_p9) target bundleno = 13 (0xd), region = 110 }
 0x49f   : > { %s10137_s22 = smov %s10132_s11 }
 0x4a1   :  { %4848 = vsyncpa [#allocation3], 1 }
 0x4a2   :  { %4850 = vsyncpa [#allocation3 + $0x1], 1 }
 0x4a3   :  { %4851 = vsyncpa [#allocation6], 1 }
 0x4a4   :  { %4853 = vsyncpa [#allocation6 + $0x1], 1 }
 0x4a5   :  { %4854 = vsyncpa [#allocation9], 1 }
 0x4a6   :  { %4855 = vsyncpa [#allocation4], 1 }
 0x4a7   :  { %4857 = vsyncpa [#allocation4 + $0x1], 1 }

</bundles_post_ra>
